<compile_context>
chip_gen: v7x
topology: tpu7x:2x2x1
jax: 0.10.0
libtpu: 0.0.40
codegen_flags: <defaults>
</compile_context>

<pallas_src>
import functools

import jax
import jax.numpy as jnp
import numpy as np
from jax.experimental import pallas as pl
from jax.experimental.pallas import tpu as pltpu

EPS = 1e-5  # PyTorch LayerNorm default eps


# ----------------------------------------------------------------------------
# small math helpers (used both inside the kernel and in the pure-JAX reference)
# ----------------------------------------------------------------------------
def _erf(x):
    # Abramowitz & Stegun 7.1.26 (max abs err ~1.5e-7); avoids relying on an
    # erf lowering inside Mosaic.
    a1, a2, a3, a4, a5 = 0.254829592, -0.284496736, 1.421413741, -1.453152027, 1.061405429
    p = 0.3275911
    sgn = jnp.where(x >= 0.0, 1.0, -1.0)
    ax = jnp.abs(x)
    t = 1.0 / (1.0 + p * ax)
    poly = ((((a5 * t + a4) * t + a3) * t + a2) * t + a1) * t
    return sgn * (1.0 - poly * jnp.exp(-ax * ax))


def _gelu_exact(x):
    # PyTorch nn.GELU() default (exact, erf-based) GELU.
    return 0.5 * x * (1.0 + _erf(x * (1.0 / np.sqrt(2.0))))


def _layernorm(x, g, b):
    mu = jnp.mean(x, axis=-1, keepdims=True)
    var = jnp.mean((x - mu) ** 2, axis=-1, keepdims=True)
    return (x - mu) * jax.lax.rsqrt(var + EPS) * g + b


# per-encoder-block parameter order as passed to the fused kernel
_BLOCK_KEYS = ("ln1_g", "ln1_b", "wqkv", "bqkv", "wo", "bo",
               "ln2_g", "ln2_b", "w1", "b1", "w2", "b2")
_N_BLOCK = len(_BLOCK_KEYS)


# ----------------------------------------------------------------------------
# The single fused kernel: conv1 -> conv2 -> +pos -> encoder block(s) -> head
# ----------------------------------------------------------------------------
def fused_classification_kernel(*refs, num_heads, num_layers, seq_len, batch):
    n_in = 10 + _N_BLOCK * num_layers
    (x_ref, pos_ref, cw1_ref, cb1_ref, cw2_ref, cb2_ref,
     clsg_ref, clsb_ref, clsw_ref, clsbias_ref) = refs[:10]
    block_refs = refs[10:n_in]
    o_ref = refs[n_in]
    xpad_s = refs[n_in + 1]        # VMEM scratch (B, L+2, Cin) f32
    hpad_s = refs[n_in + 2]        # VMEM scratch (B, L+2, D)  f32

    B, L = batch, seq_len
    Cin = x_ref.shape[2]
    D = cw2_ref.shape[2]
    dh = D // num_heads
    f32 = jnp.float32
    bf16 = jnp.bfloat16

    # ---- Conv1d(k=3, pad=1) + GELU as a sum of 3 matmuls ---------------------
    # Only the two boundary rows of the padded scratch are zeroed (interior is
    # fully overwritten).  No lane-dim im2col concat; each shifted read is a
    # lane-dense (B*L, C) @ (C, 256) bf16 matmul accumulated in f32.
    def conv3(pad_ref, src, w_ref, b_ref, cin):
        pad_ref[:, pl.ds(0, 1), :] = jnp.zeros((B, 1, cin), f32)
        pad_ref[:, pl.ds(L + 1, 1), :] = jnp.zeros((B, 1, cin), f32)
        pad_ref[:, pl.ds(1, L), :] = src
        cout = w_ref.shape[2]
        acc = jnp.zeros((B * L, cout), f32)
        for k in range(3):   # static unroll, kernel_size = 3
            xs = pad_ref[:, pl.ds(k, L), :].reshape(B * L, cin).astype(bf16)
            acc = acc + jnp.dot(xs, w_ref[k], preferred_element_type=f32)
        return _gelu_exact(acc + b_ref[...])

    h = conv3(xpad_s, x_ref[...].astype(f32), cw1_ref, cb1_ref, Cin)   # (B*L, D)
    h = conv3(hpad_s, h.reshape(B, L, D), cw2_ref, cb2_ref, D)         # (B*L, D)

    # ---- positional embedding add (f32, residual stream stays f32) ----------
    xf = (h.reshape(B, L, D) + pos_ref[...][None, :, :]).reshape(B * L, D)

    # ---- transformer encoder blocks ------------------------------------------
    for layer in range(num_layers):
        (ln1g, ln1b, wqkv, bqkv, wo, bo,
         ln2g, ln2b, w1, b1, w2, b2) = \
            block_refs[layer * _N_BLOCK:(layer + 1) * _N_BLOCK]

        hn = _layernorm(xf, ln1g[...], ln1b[...])                      # (B*L, D) f32

        # One fused, lane-dense QKV projection (scale pre-folded into Q cols).
        qkv = jnp.dot(hn.astype(bf16), wqkv[...],
                      preferred_element_type=f32) + bqkv[...]          # (B*L, 3D)

        head_outs = []
        for hh in range(num_heads):   # static unroll (num_heads small)
            q = qkv[:, hh * dh:(hh + 1) * dh].reshape(B, L, dh).astype(bf16)
            k = qkv[:, D + hh * dh:D + (hh + 1) * dh].reshape(B, L, dh).astype(bf16)
            v = qkv[:, 2 * D + hh * dh:2 * D + (hh + 1) * dh].reshape(B, L, dh).astype(bf16)
            s = jnp.einsum("bqd,bkd->bqk", q, k,
                           preferred_element_type=f32)                 # (B, L, L)
            s = s - jnp.max(s, axis=-1, keepdims=True)
            p = jnp.exp(s)
            p = p * pl.reciprocal(jnp.sum(p, axis=-1, keepdims=True),
                                  approx=True)                         # EUP reciprocal
            oh = jnp.einsum("bqk,bkd->bqd", p.astype(bf16), v,
                            preferred_element_type=f32)                # (B, L, dh)
            head_outs.append(oh.reshape(B * L, dh))

        # One fused, lane-dense output projection on the concatenated heads.
        attn = jnp.concatenate(head_outs, axis=-1)                     # (B*L, D)
        attn = jnp.dot(attn.astype(bf16), wo[...],
                       preferred_element_type=f32) + bo[...]
        xf = xf + attn                                                 # residual 1

        hn2 = _layernorm(xf, ln2g[...], ln2b[...])
        ff = jnp.dot(hn2.astype(bf16), w1[...],
                     preferred_element_type=f32) + b1[...]
        ff = jnp.maximum(ff, 0.0)
        ff = jnp.dot(ff.astype(bf16), w2[...],
                     preferred_element_type=f32) + b2[...]
        xf = xf + ff                                                   # residual 2

    # ---- mean over sequence + LayerNorm + (lane-padded) classifier ----------
    pooled = jnp.mean(xf.reshape(B, L, D), axis=1)                     # (B, D)
    hc = _layernorm(pooled, clsg_ref[...], clsb_ref[...])
    logits = jnp.dot(hc.astype(bf16), clsw_ref[...],
                     preferred_element_type=f32) + clsbias_ref[...]    # (B, 128)
    o_ref[...] = logits.astype(o_ref.dtype)


# ----------------------------------------------------------------------------
# Wrapper: one pallas_call for the whole forward pass
# ----------------------------------------------------------------------------
def classification_forward(x_ncl, kp, *, num_heads=4, num_classes=None):
    # x_ncl: (B, C_in, L) -- PyTorch Conv1d layout.  Only this ~KB-sized input
    # gets a boundary layout transpose; everything else runs in the kernel.
    B, Cin, L = x_ncl.shape
    if L > kp["pos"].shape[0]:
        raise ValueError(f"sequence length {L} exceeds positional table "
                         f"{kp['pos'].shape[0]}")
    x = jnp.transpose(x_ncl, (0, 2, 1))                                # (B, L, Cin)

    D = kp["cw2"].shape[2]
    C_pad = kp["cls_w"].shape[1]
    num_layers = len(kp["blocks"])
    pos_l = kp["pos"][:L]                                              # (L, D)

    block_args = []
    for blk in kp["blocks"]:
        block_args.extend(blk[k] for k in _BLOCK_KEYS)

    inputs = (x, pos_l, kp["cw1"], kp["cb1"], kp["cw2"], kp["cb2"],
              kp["cls_g"], kp["cls_b"], kp["cls_w"], kp["cls_bias"], *block_args)

    # VMEM budget: only override the scoped default when the real footprint
    # (bf16 weights + f32 activations + pad scratches) actually needs more.
    def _nbytes(a):
        return int(np.prod(a.shape)) * jnp.dtype(a.dtype).itemsize
    param_bytes = sum(_nbytes(a) for a in inputs)
    mlp_dim = kp["blocks"][0]["w1"].shape[1] if num_layers else D
    act_bytes = 4 * B * L * (12 * D + mlp_dim)
    scratch_bytes = 4 * B * (L + 2) * (Cin + D)
    est = 2 * param_bytes + act_bytes + scratch_bytes + (4 << 20)
    compiler_params = None
    if est > (16 << 20):
        compiler_params = pltpu.CompilerParams(
            vmem_limit_bytes=int(min(est, 56 << 20)))

    kernel = functools.partial(fused_classification_kernel,
                               num_heads=num_heads, num_layers=num_layers,
                               seq_len=L, batch=B)
    out = pl.pallas_call(
        kernel,
        out_shape=jax.ShapeDtypeStruct((B, C_pad), jnp.float32),
        scratch_shapes=[
            pltpu.VMEM((B, L + 2, Cin), jnp.float32),   # conv1 boundary-padded input
            pltpu.VMEM((B, L + 2, D), jnp.float32),     # conv2 boundary-padded activation
        ],
        compiler_params=compiler_params,
    )(*inputs)
    if num_classes is None:
        return out
    return out[:, :num_classes]


# ----------------------------------------------------------------------------
# Parameters: logical (PyTorch-like) layout + one-time conversion to kernel layout
# ----------------------------------------------------------------------------
def init_params(key, *, input_length, embed_dim, mlp_dimension, num_classes,
                num_layers):
    ks = iter(jax.random.split(key, 8 + 10 * num_layers))

    def nrm(shape, scale=0.02):
        return scale * jax.random.normal(next(ks), shape, jnp.float32)

    params = {
        # conv weights stored as (K, Cin, Cout)  (== PyTorch (Cout, Cin, K) transposed)
        "conv1_w": nrm((3, input_length, 256)),
        "conv1_b": nrm((256,)),
        "conv2_w": nrm((3, 256, 256)),
        "conv2_b": nrm((256,)),
        "positional": jax.random.normal(next(ks), (1, 128, embed_dim), jnp.float32),
        "cls_ln_g": jnp.ones((embed_dim,), jnp.float32),
        "cls_ln_b": jnp.zeros((embed_dim,), jnp.float32),
        "cls_w": nrm((embed_dim, num_classes)),
        "cls_b": nrm((num_classes,)),
    }
    blocks = []
    for _ in range(num_layers):
        blocks.append({
            "ln1_g": jnp.ones((1, embed_dim), jnp.float32),
            "ln1_b": jnp.zeros((1, embed_dim), jnp.float32),
            "wqkv": nrm((embed_dim, 3 * embed_dim)),     # in_proj_weight.T
            "bqkv": nrm((1, 3 * embed_dim)),
            "wo": nrm((embed_dim, embed_dim)),           # out_proj.weight.T
            "bo": nrm((1, embed_dim)),
            "ln2_g": jnp.ones((1, embed_dim), jnp.float32),
            "ln2_b": jnp.zeros((1, embed_dim), jnp.float32),
            "w1": nrm((embed_dim, mlp_dimension)),
            "b1": nrm((1, mlp_dimension)),
            "w2": nrm((mlp_dimension, embed_dim)),
            "b2": nrm((1, embed_dim)),
        })
    params["blocks"] = blocks
    return params


def prepare_kernel_params(params, num_heads):
    """One-time host-side repacking: bf16 matmul weights, attention scale folded
    into the Q columns of the fused QKV weight, classifier padded to 128 lanes."""
    D = params["conv2_w"].shape[2]
    dh = D // num_heads
    scale = 1.0 / np.sqrt(dh)
    bf16 = jnp.bfloat16

    nc = params["cls_w"].shape[1]
    c_pad = int(np.ceil(max(nc, 1) / 128)) * 128
    cls_w_pad = jnp.zeros((D, c_pad), jnp.float32).at[:, :nc].set(params["cls_w"])
    cls_bias_pad = jnp.zeros((1, c_pad), jnp.float32).at[:, :nc].set(
        params["cls_b"].reshape(1, -1))

    kp = {
        "cw1": params["conv1_w"].astype(bf16),          # (3, Cin, 256)
        "cb1": params["conv1_b"].reshape(1, -1),
        "cw2": params["conv2_w"].astype(bf16),          # (3, 256, 256)
        "cb2": params["conv2_b"].reshape(1, -1),
        "pos": params["positional"][0],                 # (128, D) f32
        "cls_g": params["cls_ln_g"].reshape(1, -1),
        "cls_b": params["cls_ln_b"].reshape(1, -1),
        "cls_w": cls_w_pad.astype(bf16),                # (D, 128)
        "cls_bias": cls_bias_pad,                       # (1, 128)
    }

    # fold 1/sqrt(dh) into the Q third of the fused QKV projection
    q_scale = jnp.concatenate([jnp.full((D,), scale, jnp.float32),
                               jnp.ones((2 * D,), jnp.float32)])

    blocks = []
    for blk in params["blocks"]:
        blocks.append({
            "ln1_g": blk["ln1_g"], "ln1_b": blk["ln1_b"],
            "wqkv": (blk["wqkv"] * q_scale[None, :]).astype(bf16),   # (D, 3D)
            "bqkv": blk["bqkv"] * q_scale[None, :],                  # (1, 3D) f32
            "wo": blk["wo"].astype(bf16), "bo": blk["bo"],
            "ln2_g": blk["ln2_g"], "ln2_b": blk["ln2_b"],
            "w1": blk["w1"].astype(bf16), "b1": blk["b1"],
            "w2": blk["w2"].astype(bf16), "b2": blk["b2"],
        })
    kp["blocks"] = blocks
    return kp


# ----------------------------------------------------------------------------
# pure-JAX f32 reference (same math, no Pallas) for a correctness check
# ----------------------------------------------------------------------------
def reference_forward(x_ncl, params, num_heads=4):
    x = jnp.transpose(x_ncl, (0, 2, 1))

    def conv(x, w, b):
        L = x.shape[1]
        xp = jnp.pad(x, ((0, 0), (1, 1), (0, 0)))
        y = b.reshape(1, 1, -1)
        for k in range(3):
            y = y + jnp.einsum("blc,co->blo", xp[:, k:k + L, :], w[k])
        return _gelu_exact(y)

    x = conv(x, params["conv1_w"], params["conv1_b"])
    x = conv(x, params["conv2_w"], params["conv2_b"])
    B, L, D = x.shape
    x = x + params["positional"][:, :L]
    dh = D // num_heads
    for blk in params["blocks"]:
        h = _layernorm(x, blk["ln1_g"], blk["ln1_b"])
        qkv = h @ blk["wqkv"] + blk["bqkv"]
        q, k, v = jnp.split(qkv, 3, axis=-1)
        q = q.reshape(B, L, num_heads, dh).transpose(0, 2, 1, 3) / np.sqrt(dh)
        k = k.reshape(B, L, num_heads, dh).transpose(0, 2, 1, 3)
        v = v.reshape(B, L, num_heads, dh).transpose(0, 2, 1, 3)
        s = jnp.einsum("bhqd,bhkd->bhqk", q, k)
        p = jax.nn.softmax(s, axis=-1)
        a = jnp.einsum("bhqk,bhkd->bhqd", p, v).transpose(0, 2, 1, 3).reshape(B, L, D)
        x = x + (a @ blk["wo"] + blk["bo"])
        h2 = _layernorm(x, blk["ln2_g"], blk["ln2_b"])
        x = x + (jnp.maximum(h2 @ blk["w1"] + blk["b1"], 0.0) @ blk["w2"] + blk["b2"])
    pooled = jnp.mean(x, axis=1)
    h = _layernorm(pooled, params["cls_ln_g"], params["cls_ln_b"])
    return h @ params["cls_w"] + params["cls_b"]


if __name__ == "__main__":
    # small shapes consistent with the module:
    # input_length (= conv in_channels) = 32, seq length L = 8 (<=128), batch = 2
    B, C_in, L = 2, 32, 8
    num_heads, num_classes, num_layers = 4, 10, 1

    key = jax.random.PRNGKey(0)
    kx, kparam = jax.random.split(key)
    params = init_params(kparam, input_length=C_in, embed_dim=256,
                         mlp_dimension=512, num_classes=num_classes,
                         num_layers=num_layers)
    kparams = prepare_kernel_params(params, num_heads)
    x = jax.random.normal(kx, (B, C_in, L), jnp.float32)

    fwd = jax.jit(functools.partial(classification_forward,
                                    num_heads=num_heads, num_classes=num_classes))
    logits = jax.block_until_ready(fwd(x, kparams))

    ref = reference_forward(x, params, num_heads)
    max_err = float(jnp.max(jnp.abs(logits - ref)))

    assert logits.shape == (B, num_classes)
    assert bool(jnp.all(jnp.isfinite(logits)))
    # bf16 matmul operands (f32 accumulation) vs the pure-f32 reference
    assert max_err < 3e-2, f"max abs err vs reference: {max_err}"
    print("KERNEL_OK")
</pallas_src>

<mosaic_0001>
module attributes {stable_mosaic.version = 11 : i64} {
  func.func @fused_classification_kernel(%arg0: memref<2x8x32xf32, #tpu.memory_space<vmem>>, %arg1: memref<8x256xf32, #tpu.memory_space<vmem>>, %arg2: memref<3x32x256xbf16, #tpu.memory_space<vmem>>, %arg3: memref<1x256xf32, #tpu.memory_space<vmem>>, %arg4: memref<3x256x256xbf16, #tpu.memory_space<vmem>>, %arg5: memref<1x256xf32, #tpu.memory_space<vmem>>, %arg6: memref<1x256xf32, #tpu.memory_space<vmem>>, %arg7: memref<1x256xf32, #tpu.memory_space<vmem>>, %arg8: memref<256x128xbf16, #tpu.memory_space<vmem>>, %arg9: memref<1x128xf32, #tpu.memory_space<vmem>>, %arg10: memref<1x256xf32, #tpu.memory_space<vmem>>, %arg11: memref<1x256xf32, #tpu.memory_space<vmem>>, %arg12: memref<256x768xbf16, #tpu.memory_space<vmem>>, %arg13: memref<1x768xf32, #tpu.memory_space<vmem>>, %arg14: memref<256x256xbf16, #tpu.memory_space<vmem>>, %arg15: memref<1x256xf32, #tpu.memory_space<vmem>>, %arg16: memref<1x256xf32, #tpu.memory_space<vmem>>, %arg17: memref<1x256xf32, #tpu.memory_space<vmem>>, %arg18: memref<256x512xbf16, #tpu.memory_space<vmem>>, %arg19: memref<1x512xf32, #tpu.memory_space<vmem>>, %arg20: memref<512x256xbf16, #tpu.memory_space<vmem>>, %arg21: memref<1x256xf32, #tpu.memory_space<vmem>>, %arg22: memref<2x128xf32, #tpu.memory_space<vmem>>, %arg23: memref<2x10x32xf32, #tpu.memory_space<vmem>>, %arg24: memref<2x10x256xf32, #tpu.memory_space<vmem>>) attributes {dimension_semantics = [], scalar_prefetch = 0 : i64, scratch_operands = 2 : i64, tpu.core_type = #tpu.core_type<tc>} {
    %c0 = arith.constant 0 : index
    %c0_0 = arith.constant 0 : index
    %c0_1 = arith.constant 0 : index
    %0 = vector.load %arg0[%c0, %c0_0, %c0_1] : memref<2x8x32xf32, #tpu.memory_space<vmem>>, vector<2x8x32xf32>
    %cst = arith.constant 0.000000e+00 : f32
    %1 = vector.broadcast %cst : f32 to vector<2x1x32xf32>
    %c0_2 = arith.constant 0 : index
    %c0_3 = arith.constant 0 : index
    %c0_4 = arith.constant 0 : index
    %2 = vector.load %arg23[%c0_2, %c0_3, %c0_4] : memref<2x10x32xf32, #tpu.memory_space<vmem>>, vector<2x1x32xf32>
    tpu.vector_store %arg23[%c0_2, %c0_3, %c0_4], %1 {strides = array<i32>} : memref<2x10x32xf32, #tpu.memory_space<vmem>>, vector<2x1x32xf32>,
    %cst_5 = arith.constant 0.000000e+00 : f32
    %3 = vector.broadcast %cst_5 : f32 to vector<2x1x32xf32>
    %c0_6 = arith.constant 0 : index
    %c9 = arith.constant 9 : index
    %c0_7 = arith.constant 0 : index
    %4 = vector.load %arg23[%c0_6, %c9, %c0_7] : memref<2x10x32xf32, #tpu.memory_space<vmem>>, vector<2x1x32xf32>
    tpu.vector_store %arg23[%c0_6, %c9, %c0_7], %3 {strides = array<i32>} : memref<2x10x32xf32, #tpu.memory_space<vmem>>, vector<2x1x32xf32>,
    %c0_8 = arith.constant 0 : index
    %c1 = arith.constant 1 : index
    %c0_9 = arith.constant 0 : index
    %5 = vector.load %arg23[%c0_8, %c1, %c0_9] : memref<2x10x32xf32, #tpu.memory_space<vmem>>, vector<2x8x32xf32>
    tpu.vector_store %arg23[%c0_8, %c1, %c0_9], %0 {strides = array<i32>} : memref<2x10x32xf32, #tpu.memory_space<vmem>>, vector<2x8x32xf32>,
    %cst_10 = arith.constant 0.000000e+00 : f32
    %6 = vector.broadcast %cst_10 : f32 to vector<16x256xf32>
    %c0_11 = arith.constant 0 : index
    %c0_12 = arith.constant 0 : index
    %c0_13 = arith.constant 0 : index
    %7 = vector.load %arg23[%c0_11, %c0_12, %c0_13] : memref<2x10x32xf32, #tpu.memory_space<vmem>>, vector<2x8x32xf32>
    %8 = vector.shape_cast %7 : vector<2x8x32xf32> to vector<16x32xf32>
    %9 = arith.truncf %8 : vector<16x32xf32> to vector<16x32xbf16>
    %c0_14 = arith.constant 0 : index
    %c0_15 = arith.constant 0 : index
    %c0_16 = arith.constant 0 : index
    %10 = vector.load %arg2[%c0_14, %c0_15, %c0_16] : memref<3x32x256xbf16, #tpu.memory_space<vmem>>, vector<1x32x256xbf16>
    %11 = vector.shape_cast %10 : vector<1x32x256xbf16> to vector<32x256xbf16>
    %cst_17 = arith.constant dense<0.000000e+00> : vector<16x256xf32>
    %12 = tpu.matmul %9, %11, %cst_17 {dimension_numbers = #tpu.dot_dimension_numbers<[1], [0], [0], [1], [0, 0, 1, 1], [], []>} : vector<16x32xbf16>, vector<32x256xbf16>, vector<16x256xf32> -> vector<16x256xf32>
    %13 = arith.addf %6, %12 : vector<16x256xf32>
    %c0_18 = arith.constant 0 : index
    %c1_19 = arith.constant 1 : index
    %c0_20 = arith.constant 0 : index
    %14 = vector.load %arg23[%c0_18, %c1_19, %c0_20] : memref<2x10x32xf32, #tpu.memory_space<vmem>>, vector<2x8x32xf32>
    %15 = vector.shape_cast %14 : vector<2x8x32xf32> to vector<16x32xf32>
    %16 = arith.truncf %15 : vector<16x32xf32> to vector<16x32xbf16>
    %c1_21 = arith.constant 1 : index
    %c0_22 = arith.constant 0 : index
    %c0_23 = arith.constant 0 : index
    %17 = vector.load %arg2[%c1_21, %c0_22, %c0_23] : memref<3x32x256xbf16, #tpu.memory_space<vmem>>, vector<1x32x256xbf16>
    %18 = vector.shape_cast %17 : vector<1x32x256xbf16> to vector<32x256xbf16>
    %cst_24 = arith.constant dense<0.000000e+00> : vector<16x256xf32>
    %19 = tpu.matmul %16, %18, %cst_24 {dimension_numbers = #tpu.dot_dimension_numbers<[1], [0], [0], [1], [0, 0, 1, 1], [], []>} : vector<16x32xbf16>, vector<32x256xbf16>, vector<16x256xf32> -> vector<16x256xf32>
    %20 = arith.addf %13, %19 : vector<16x256xf32>
    %c0_25 = arith.constant 0 : index
    %c2 = arith.constant 2 : index
    %c0_26 = arith.constant 0 : index
    %21 = vector.load %arg23[%c0_25, %c2, %c0_26] : memref<2x10x32xf32, #tpu.memory_space<vmem>>, vector<2x8x32xf32>
    %22 = vector.shape_cast %21 : vector<2x8x32xf32> to vector<16x32xf32>
    %23 = arith.truncf %22 : vector<16x32xf32> to vector<16x32xbf16>
    %c2_27 = arith.constant 2 : index
    %c0_28 = arith.constant 0 : index
    %c0_29 = arith.constant 0 : index
    %24 = vector.load %arg2[%c2_27, %c0_28, %c0_29] : memref<3x32x256xbf16, #tpu.memory_space<vmem>>, vector<1x32x256xbf16>
    %25 = vector.shape_cast %24 : vector<1x32x256xbf16> to vector<32x256xbf16>
    %cst_30 = arith.constant dense<0.000000e+00> : vector<16x256xf32>
    %26 = tpu.matmul %23, %25, %cst_30 {dimension_numbers = #tpu.dot_dimension_numbers<[1], [0], [0], [1], [0, 0, 1, 1], [], []>} : vector<16x32xbf16>, vector<32x256xbf16>, vector<16x256xf32> -> vector<16x256xf32>
    %27 = arith.addf %20, %26 : vector<16x256xf32>
    %c0_31 = arith.constant 0 : index
    %c0_32 = arith.constant 0 : index
    %28 = vector.load %arg3[%c0_31, %c0_32] : memref<1x256xf32, #tpu.memory_space<vmem>>, vector<1x256xf32>
    %29 = vector.broadcast %28 : vector<1x256xf32> to vector<16x256xf32>
    %30 = arith.addf %27, %29 : vector<16x256xf32>
    %cst_33 = arith.constant 5.000000e-01 : f32
    %31 = vector.broadcast %cst_33 : f32 to vector<16x256xf32>
    %32 = arith.mulf %31, %30 : vector<16x256xf32>
    %cst_34 = arith.constant 0.707106769 : f32
    %33 = vector.broadcast %cst_34 : f32 to vector<16x256xf32>
    %34 = arith.mulf %30, %33 : vector<16x256xf32>
    %cst_35 = arith.constant 0.000000e+00 : f32
    %35 = vector.broadcast %cst_35 : f32 to vector<16x256xf32>
    %36 = arith.cmpf oge, %34, %35 : vector<16x256xf32>
    %cst_36 = arith.constant 1.000000e+00 : f32
    %cst_37 = arith.constant -1.000000e+00 : f32
    %37 = vector.broadcast %cst_36 : f32 to vector<16x256xf32>
    %38 = vector.broadcast %cst_37 : f32 to vector<16x256xf32>
    %39 = arith.select %36, %37, %38 : vector<16x256xi1>, vector<16x256xf32>
    %40 = math.absf %34 : vector<16x256xf32>
    %cst_38 = arith.constant 0.327591091 : f32
    %41 = vector.broadcast %cst_38 : f32 to vector<16x256xf32>
    %42 = arith.mulf %41, %40 : vector<16x256xf32>
    %cst_39 = arith.constant 1.000000e+00 : f32
    %43 = vector.broadcast %cst_39 : f32 to vector<16x256xf32>
    %44 = arith.addf %43, %42 : vector<16x256xf32>
    %cst_40 = arith.constant 1.000000e+00 : f32
    %45 = vector.broadcast %cst_40 : f32 to vector<16x256xf32>
    %46 = arith.divf %45, %44 : vector<16x256xf32>
    %cst_41 = arith.constant 1.06140542 : f32
    %47 = vector.broadcast %cst_41 : f32 to vector<16x256xf32>
    %48 = arith.mulf %47, %46 : vector<16x256xf32>
    %cst_42 = arith.constant -1.45315206 : f32
    %49 = vector.broadcast %cst_42 : f32 to vector<16x256xf32>
    %50 = arith.addf %48, %49 : vector<16x256xf32>
    %51 = arith.mulf %50, %46 : vector<16x256xf32>
    %cst_43 = arith.constant 1.42141378 : f32
    %52 = vector.broadcast %cst_43 : f32 to vector<16x256xf32>
    %53 = arith.addf %51, %52 : vector<16x256xf32>
    %54 = arith.mulf %53, %46 : vector<16x256xf32>
    %cst_44 = arith.constant -0.284496725 : f32
    %55 = vector.broadcast %cst_44 : f32 to vector<16x256xf32>
    %56 = arith.addf %54, %55 : vector<16x256xf32>
    %57 = arith.mulf %56, %46 : vector<16x256xf32>
    %cst_45 = arith.constant 0.254829586 : f32
    %58 = vector.broadcast %cst_45 : f32 to vector<16x256xf32>
    %59 = arith.addf %57, %58 : vector<16x256xf32>
    %60 = arith.mulf %59, %46 : vector<16x256xf32>
    %cst_46 = arith.constant 0.000000e+00 : f32
    %61 = vector.broadcast %cst_46 : f32 to vector<16x256xf32>
    %62 = arith.subf %61, %40 : vector<16x256xf32>
    %63 = arith.mulf %62, %40 : vector<16x256xf32>
    %64 = math.exp %63 : vector<16x256xf32>
    %65 = arith.mulf %60, %64 : vector<16x256xf32>
    %cst_47 = arith.constant 1.000000e+00 : f32
    %66 = vector.broadcast %cst_47 : f32 to vector<16x256xf32>
    %67 = arith.subf %66, %65 : vector<16x256xf32>
    %68 = arith.mulf %39, %67 : vector<16x256xf32>
    %cst_48 = arith.constant 1.000000e+00 : f32
    %69 = vector.broadcast %cst_48 : f32 to vector<16x256xf32>
    %70 = arith.addf %69, %68 : vector<16x256xf32>
    %71 = arith.mulf %32, %70 : vector<16x256xf32>
    %72 = vector.shape_cast %71 : vector<16x256xf32> to vector<2x8x256xf32>
    %cst_49 = arith.constant 0.000000e+00 : f32
    %73 = vector.broadcast %cst_49 : f32 to vector<2x1x256xf32>
    %c0_50 = arith.constant 0 : index
    %c0_51 = arith.constant 0 : index
    %c0_52 = arith.constant 0 : index
    %74 = vector.load %arg24[%c0_50, %c0_51, %c0_52] : memref<2x10x256xf32, #tpu.memory_space<vmem>>, vector<2x1x256xf32>
    tpu.vector_store %arg24[%c0_50, %c0_51, %c0_52], %73 {strides = array<i32>} : memref<2x10x256xf32, #tpu.memory_space<vmem>>, vector<2x1x256xf32>,
    %cst_53 = arith.constant 0.000000e+00 : f32
    %75 = vector.broadcast %cst_53 : f32 to vector<2x1x256xf32>
    %c0_54 = arith.constant 0 : index
    %c9_55 = arith.constant 9 : index
    %c0_56 = arith.constant 0 : index
    %76 = vector.load %arg24[%c0_54, %c9_55, %c0_56] : memref<2x10x256xf32, #tpu.memory_space<vmem>>, vector<2x1x256xf32>
    tpu.vector_store %arg24[%c0_54, %c9_55, %c0_56], %75 {strides = array<i32>} : memref<2x10x256xf32, #tpu.memory_space<vmem>>, vector<2x1x256xf32>,
    %c0_57 = arith.constant 0 : index
    %c1_58 = arith.constant 1 : index
    %c0_59 = arith.constant 0 : index
    %77 = vector.load %arg24[%c0_57, %c1_58, %c0_59] : memref<2x10x256xf32, #tpu.memory_space<vmem>>, vector<2x8x256xf32>
    tpu.vector_store %arg24[%c0_57, %c1_58, %c0_59], %72 {strides = array<i32>} : memref<2x10x256xf32, #tpu.memory_space<vmem>>, vector<2x8x256xf32>,
    %cst_60 = arith.constant 0.000000e+00 : f32
    %78 = vector.broadcast %cst_60 : f32 to vector<16x256xf32>
    %c0_61 = arith.constant 0 : index
    %c0_62 = arith.constant 0 : index
    %c0_63 = arith.constant 0 : index
    %79 = vector.load %arg24[%c0_61, %c0_62, %c0_63] : memref<2x10x256xf32, #tpu.memory_space<vmem>>, vector<2x8x256xf32>
    %80 = vector.shape_cast %79 : vector<2x8x256xf32> to vector<16x256xf32>
    %81 = arith.truncf %80 : vector<16x256xf32> to vector<16x256xbf16>
    %c0_64 = arith.constant 0 : index
    %c0_65 = arith.constant 0 : index
    %c0_66 = arith.constant 0 : index
    %82 = vector.load %arg4[%c0_64, %c0_65, %c0_66] : memref<3x256x256xbf16, #tpu.memory_space<vmem>>, vector<1x256x256xbf16>
    %83 = vector.shape_cast %82 : vector<1x256x256xbf16> to vector<256x256xbf16>
    %cst_67 = arith.constant dense<0.000000e+00> : vector<16x256xf32>
    %84 = tpu.matmul %81, %83, %cst_67 {dimension_numbers = #tpu.dot_dimension_numbers<[1], [0], [0], [1], [0, 0, 1, 1], [], []>} : vector<16x256xbf16>, vector<256x256xbf16>, vector<16x256xf32> -> vector<16x256xf32>
    %85 = arith.addf %78, %84 : vector<16x256xf32>
    %c0_68 = arith.constant 0 : index
    %c1_69 = arith.constant 1 : index
    %c0_70 = arith.constant 0 : index
    %86 = vector.load %arg24[%c0_68, %c1_69, %c0_70] : memref<2x10x256xf32, #tpu.memory_space<vmem>>, vector<2x8x256xf32>
    %87 = vector.shape_cast %86 : vector<2x8x256xf32> to vector<16x256xf32>
    %88 = arith.truncf %87 : vector<16x256xf32> to vector<16x256xbf16>
    %c1_71 = arith.constant 1 : index
    %c0_72 = arith.constant 0 : index
    %c0_73 = arith.constant 0 : index
    %89 = vector.load %arg4[%c1_71, %c0_72, %c0_73] : memref<3x256x256xbf16, #tpu.memory_space<vmem>>, vector<1x256x256xbf16>
    %90 = vector.shape_cast %89 : vector<1x256x256xbf16> to vector<256x256xbf16>
    %cst_74 = arith.constant dense<0.000000e+00> : vector<16x256xf32>
    %91 = tpu.matmul %88, %90, %cst_74 {dimension_numbers = #tpu.dot_dimension_numbers<[1], [0], [0], [1], [0, 0, 1, 1], [], []>} : vector<16x256xbf16>, vector<256x256xbf16>, vector<16x256xf32> -> vector<16x256xf32>
    %92 = arith.addf %85, %91 : vector<16x256xf32>
    %c0_75 = arith.constant 0 : index
    %c2_76 = arith.constant 2 : index
    %c0_77 = arith.constant 0 : index
    %93 = vector.load %arg24[%c0_75, %c2_76, %c0_77] : memref<2x10x256xf32, #tpu.memory_space<vmem>>, vector<2x8x256xf32>
    %94 = vector.shape_cast %93 : vector<2x8x256xf32> to vector<16x256xf32>
    %95 = arith.truncf %94 : vector<16x256xf32> to vector<16x256xbf16>
    %c2_78 = arith.constant 2 : index
    %c0_79 = arith.constant 0 : index
    %c0_80 = arith.constant 0 : index
    %96 = vector.load %arg4[%c2_78, %c0_79, %c0_80] : memref<3x256x256xbf16, #tpu.memory_space<vmem>>, vector<1x256x256xbf16>
    %97 = vector.shape_cast %96 : vector<1x256x256xbf16> to vector<256x256xbf16>
    %cst_81 = arith.constant dense<0.000000e+00> : vector<16x256xf32>
    %98 = tpu.matmul %95, %97, %cst_81 {dimension_numbers = #tpu.dot_dimension_numbers<[1], [0], [0], [1], [0, 0, 1, 1], [], []>} : vector<16x256xbf16>, vector<256x256xbf16>, vector<16x256xf32> -> vector<16x256xf32>
    %99 = arith.addf %92, %98 : vector<16x256xf32>
    %c0_82 = arith.constant 0 : index
    %c0_83 = arith.constant 0 : index
    %100 = vector.load %arg5[%c0_82, %c0_83] : memref<1x256xf32, #tpu.memory_space<vmem>>, vector<1x256xf32>
    %101 = vector.broadcast %100 : vector<1x256xf32> to vector<16x256xf32>
    %102 = arith.addf %99, %101 : vector<16x256xf32>
    %cst_84 = arith.constant 5.000000e-01 : f32
    %103 = vector.broadcast %cst_84 : f32 to vector<16x256xf32>
    %104 = arith.mulf %103, %102 : vector<16x256xf32>
    %cst_85 = arith.constant 0.707106769 : f32
    %105 = vector.broadcast %cst_85 : f32 to vector<16x256xf32>
    %106 = arith.mulf %102, %105 : vector<16x256xf32>
    %cst_86 = arith.constant 0.000000e+00 : f32
    %107 = vector.broadcast %cst_86 : f32 to vector<16x256xf32>
    %108 = arith.cmpf oge, %106, %107 : vector<16x256xf32>
    %cst_87 = arith.constant 1.000000e+00 : f32
    %cst_88 = arith.constant -1.000000e+00 : f32
    %109 = vector.broadcast %cst_87 : f32 to vector<16x256xf32>
    %110 = vector.broadcast %cst_88 : f32 to vector<16x256xf32>
    %111 = arith.select %108, %109, %110 : vector<16x256xi1>, vector<16x256xf32>
    %112 = math.absf %106 : vector<16x256xf32>
    %cst_89 = arith.constant 0.327591091 : f32
    %113 = vector.broadcast %cst_89 : f32 to vector<16x256xf32>
    %114 = arith.mulf %113, %112 : vector<16x256xf32>
    %cst_90 = arith.constant 1.000000e+00 : f32
    %115 = vector.broadcast %cst_90 : f32 to vector<16x256xf32>
    %116 = arith.addf %115, %114 : vector<16x256xf32>
    %cst_91 = arith.constant 1.000000e+00 : f32
    %117 = vector.broadcast %cst_91 : f32 to vector<16x256xf32>
    %118 = arith.divf %117, %116 : vector<16x256xf32>
    %cst_92 = arith.constant 1.06140542 : f32
    %119 = vector.broadcast %cst_92 : f32 to vector<16x256xf32>
    %120 = arith.mulf %119, %118 : vector<16x256xf32>
    %cst_93 = arith.constant -1.45315206 : f32
    %121 = vector.broadcast %cst_93 : f32 to vector<16x256xf32>
    %122 = arith.addf %120, %121 : vector<16x256xf32>
    %123 = arith.mulf %122, %118 : vector<16x256xf32>
    %cst_94 = arith.constant 1.42141378 : f32
    %124 = vector.broadcast %cst_94 : f32 to vector<16x256xf32>
    %125 = arith.addf %123, %124 : vector<16x256xf32>
    %126 = arith.mulf %125, %118 : vector<16x256xf32>
    %cst_95 = arith.constant -0.284496725 : f32
    %127 = vector.broadcast %cst_95 : f32 to vector<16x256xf32>
    %128 = arith.addf %126, %127 : vector<16x256xf32>
    %129 = arith.mulf %128, %118 : vector<16x256xf32>
    %cst_96 = arith.constant 0.254829586 : f32
    %130 = vector.broadcast %cst_96 : f32 to vector<16x256xf32>
    %131 = arith.addf %129, %130 : vector<16x256xf32>
    %132 = arith.mulf %131, %118 : vector<16x256xf32>
    %cst_97 = arith.constant 0.000000e+00 : f32
    %133 = vector.broadcast %cst_97 : f32 to vector<16x256xf32>
    %134 = arith.subf %133, %112 : vector<16x256xf32>
    %135 = arith.mulf %134, %112 : vector<16x256xf32>
    %136 = math.exp %135 : vector<16x256xf32>
    %137 = arith.mulf %132, %136 : vector<16x256xf32>
    %cst_98 = arith.constant 1.000000e+00 : f32
    %138 = vector.broadcast %cst_98 : f32 to vector<16x256xf32>
    %139 = arith.subf %138, %137 : vector<16x256xf32>
    %140 = arith.mulf %111, %139 : vector<16x256xf32>
    %cst_99 = arith.constant 1.000000e+00 : f32
    %141 = vector.broadcast %cst_99 : f32 to vector<16x256xf32>
    %142 = arith.addf %141, %140 : vector<16x256xf32>
    %143 = arith.mulf %104, %142 : vector<16x256xf32>
    %144 = vector.shape_cast %143 : vector<16x256xf32> to vector<2x8x256xf32>
    %c0_100 = arith.constant 0 : index
    %c0_101 = arith.constant 0 : index
    %145 = vector.load %arg1[%c0_100, %c0_101] : memref<8x256xf32, #tpu.memory_space<vmem>>, vector<8x256xf32>
    %146 = vector.shape_cast %145 : vector<8x256xf32> to vector<1x8x256xf32>
    %147 = vector.broadcast %146 : vector<1x8x256xf32> to vector<2x8x256xf32>
    %148 = arith.addf %144, %147 : vector<2x8x256xf32>
    %149 = vector.shape_cast %148 : vector<2x8x256xf32> to vector<16x256xf32>
    %c0_102 = arith.constant 0 : index
    %c0_103 = arith.constant 0 : index
    %150 = vector.load %arg10[%c0_102, %c0_103] : memref<1x256xf32, #tpu.memory_space<vmem>>, vector<1x256xf32>
    %c0_104 = arith.constant 0 : index
    %c0_105 = arith.constant 0 : index
    %151 = vector.load %arg11[%c0_104, %c0_105] : memref<1x256xf32, #tpu.memory_space<vmem>>, vector<1x256xf32>
    %cst_106 = arith.constant dense<0.000000e+00> : vector<16xf32>
    %152 = vector.multi_reduction <add>, %149, %cst_106 [1] : vector<16x256xf32> to vector<16xf32>
    %153 = vector.shape_cast %152 : vector<16xf32> to vector<16x1xf32>
    %cst_107 = arith.constant 2.560000e+02 : f32
    %154 = vector.broadcast %cst_107 : f32 to vector<16x1xf32>
    %155 = arith.divf %153, %154 : vector<16x1xf32>
    %156 = vector.broadcast %155 : vector<16x1xf32> to vector<16x256xf32>
    %157 = arith.subf %149, %156 : vector<16x256xf32>
    %158 = arith.mulf %157, %157 : vector<16x256xf32>
    %cst_108 = arith.constant dense<0.000000e+00> : vector<16xf32>
    %159 = vector.multi_reduction <add>, %158, %cst_108 [1] : vector<16x256xf32> to vector<16xf32>
    %160 = vector.shape_cast %159 : vector<16xf32> to vector<16x1xf32>
    %cst_109 = arith.constant 2.560000e+02 : f32
    %161 = vector.broadcast %cst_109 : f32 to vector<16x1xf32>
    %162 = arith.divf %160, %161 : vector<16x1xf32>
    %163 = vector.broadcast %155 : vector<16x1xf32> to vector<16x256xf32>
    %164 = arith.subf %149, %163 : vector<16x256xf32>
    %cst_110 = arith.constant 9.99999974E-6 : f32
    %165 = vector.broadcast %cst_110 : f32 to vector<16x1xf32>
    %166 = arith.addf %162, %165 : vector<16x1xf32>
    %167 = math.rsqrt %166 : vector<16x1xf32>
    %168 = vector.broadcast %167 : vector<16x1xf32> to vector<16x256xf32>
    %169 = arith.mulf %164, %168 : vector<16x256xf32>
    %170 = vector.broadcast %150 : vector<1x256xf32> to vector<16x256xf32>
    %171 = arith.mulf %169, %170 : vector<16x256xf32>
    %172 = vector.broadcast %151 : vector<1x256xf32> to vector<16x256xf32>
    %173 = arith.addf %171, %172 : vector<16x256xf32>
    %174 = arith.truncf %173 : vector<16x256xf32> to vector<16x256xbf16>
    %c0_111 = arith.constant 0 : index
    %c0_112 = arith.constant 0 : index
    %175 = vector.load %arg12[%c0_111, %c0_112] : memref<256x768xbf16, #tpu.memory_space<vmem>>, vector<256x768xbf16>
    %cst_113 = arith.constant dense<0.000000e+00> : vector<16x768xf32>
    %176 = tpu.matmul %174, %175, %cst_113 {dimension_numbers = #tpu.dot_dimension_numbers<[1], [0], [0], [1], [0, 0, 1, 1], [], []>} : vector<16x256xbf16>, vector<256x768xbf16>, vector<16x768xf32> -> vector<16x768xf32>
    %c0_114 = arith.constant 0 : index
    %c0_115 = arith.constant 0 : index
    %177 = vector.load %arg13[%c0_114, %c0_115] : memref<1x768xf32, #tpu.memory_space<vmem>>, vector<1x768xf32>
    %178 = vector.broadcast %177 : vector<1x768xf32> to vector<16x768xf32>
    %179 = arith.addf %176, %178 : vector<16x768xf32>
    %180 = vector.extract_strided_slice %179 {offsets = [0, 0], sizes = [16, 64], strides = [1, 1]} : vector<16x768xf32> to vector<16x64xf32>
    %181 = vector.shape_cast %180 : vector<16x64xf32> to vector<2x8x64xf32>
    %182 = arith.truncf %181 : vector<2x8x64xf32> to vector<2x8x64xbf16>
    %183 = vector.extract_strided_slice %179 {offsets = [0, 256], sizes = [16, 64], strides = [1, 1]} : vector<16x768xf32> to vector<16x64xf32>
    %184 = vector.shape_cast %183 : vector<16x64xf32> to vector<2x8x64xf32>
    %185 = arith.truncf %184 : vector<2x8x64xf32> to vector<2x8x64xbf16>
    %186 = vector.extract_strided_slice %179 {offsets = [0, 512], sizes = [16, 64], strides = [1, 1]} : vector<16x768xf32> to vector<16x64xf32>
    %187 = vector.shape_cast %186 : vector<16x64xf32> to vector<2x8x64xf32>
    %188 = arith.truncf %187 : vector<2x8x64xf32> to vector<2x8x64xbf16>
    "tpu.trace_start"() <{level = 10 : i32, message = "bqd,bkd->bqk"}> : () -> ()
    %cst_116 = arith.constant dense<0.000000e+00> : vector<2x8x8xf32>
    %189 = tpu.matmul %182, %185, %cst_116 {dimension_numbers = #tpu.dot_dimension_numbers<[2], [2], [1], [1], [0, 0, 0, 1, 1, 1], [0], [0]>} : vector<2x8x64xbf16>, vector<2x8x64xbf16>, vector<2x8x8xf32> -> vector<2x8x8xf32>
    "tpu.trace_stop"() : () -> ()
    %cst_117 = arith.constant dense<0xFF800000> : vector<2x8xf32>
    %190 = vector.multi_reduction <maximumf>, %189, %cst_117 [2] : vector<2x8x8xf32> to vector<2x8xf32>
    %191 = vector.shape_cast %190 : vector<2x8xf32> to vector<2x8x1xf32>
    %192 = vector.broadcast %191 : vector<2x8x1xf32> to vector<2x8x8xf32>
    %193 = arith.subf %189, %192 : vector<2x8x8xf32>
    %194 = math.exp %193 : vector<2x8x8xf32>
    %cst_118 = arith.constant dense<0.000000e+00> : vector<2x8xf32>
    %195 = vector.multi_reduction <add>, %194, %cst_118 [2] : vector<2x8x8xf32> to vector<2x8xf32>
    %196 = vector.shape_cast %195 : vector<2x8xf32> to vector<2x8x1xf32>
    %197 = tpu.reciprocal %196 {approx = true} : vector<2x8x1xf32> -> vector<2x8x1xf32>
    %198 = vector.broadcast %197 : vector<2x8x1xf32> to vector<2x8x8xf32>
    %199 = arith.mulf %194, %198 : vector<2x8x8xf32>
    %200 = arith.truncf %199 : vector<2x8x8xf32> to vector<2x8x8xbf16>
    "tpu.trace_start"() <{level = 10 : i32, message = "bqk,bkd->bqd"}> : () -> ()
    %cst_119 = arith.constant dense<0.000000e+00> : vector<2x8x64xf32>
    %201 = tpu.matmul %200, %188, %cst_119 {dimension_numbers = #tpu.dot_dimension_numbers<[2], [1], [1], [2], [0, 0, 0, 1, 1, 2], [0], [0]>} : vector<2x8x8xbf16>, vector<2x8x64xbf16>, vector<2x8x64xf32> -> vector<2x8x64xf32>
    "tpu.trace_stop"() : () -> ()
    %202 = vector.shape_cast %201 : vector<2x8x64xf32> to vector<16x64xf32>
    %203 = vector.extract_strided_slice %179 {offsets = [0, 64], sizes = [16, 64], strides = [1, 1]} : vector<16x768xf32> to vector<16x64xf32>
    %204 = vector.shape_cast %203 : vector<16x64xf32> to vector<2x8x64xf32>
    %205 = arith.truncf %204 : vector<2x8x64xf32> to vector<2x8x64xbf16>
    %206 = vector.extract_strided_slice %179 {offsets = [0, 320], sizes = [16, 64], strides = [1, 1]} : vector<16x768xf32> to vector<16x64xf32>
    %207 = vector.shape_cast %206 : vector<16x64xf32> to vector<2x8x64xf32>
    %208 = arith.truncf %207 : vector<2x8x64xf32> to vector<2x8x64xbf16>
    %209 = vector.extract_strided_slice %179 {offsets = [0, 576], sizes = [16, 64], strides = [1, 1]} : vector<16x768xf32> to vector<16x64xf32>
    %210 = vector.shape_cast %209 : vector<16x64xf32> to vector<2x8x64xf32>
    %211 = arith.truncf %210 : vector<2x8x64xf32> to vector<2x8x64xbf16>
    "tpu.trace_start"() <{level = 10 : i32, message = "bqd,bkd->bqk"}> : () -> ()
    %cst_120 = arith.constant dense<0.000000e+00> : vector<2x8x8xf32>
    %212 = tpu.matmul %205, %208, %cst_120 {dimension_numbers = #tpu.dot_dimension_numbers<[2], [2], [1], [1], [0, 0, 0, 1, 1, 1], [0], [0]>} : vector<2x8x64xbf16>, vector<2x8x64xbf16>, vector<2x8x8xf32> -> vector<2x8x8xf32>
    "tpu.trace_stop"() : () -> ()
    %cst_121 = arith.constant dense<0xFF800000> : vector<2x8xf32>
    %213 = vector.multi_reduction <maximumf>, %212, %cst_121 [2] : vector<2x8x8xf32> to vector<2x8xf32>
    %214 = vector.shape_cast %213 : vector<2x8xf32> to vector<2x8x1xf32>
    %215 = vector.broadcast %214 : vector<2x8x1xf32> to vector<2x8x8xf32>
    %216 = arith.subf %212, %215 : vector<2x8x8xf32>
    %217 = math.exp %216 : vector<2x8x8xf32>
    %cst_122 = arith.constant dense<0.000000e+00> : vector<2x8xf32>
    %218 = vector.multi_reduction <add>, %217, %cst_122 [2] : vector<2x8x8xf32> to vector<2x8xf32>
    %219 = vector.shape_cast %218 : vector<2x8xf32> to vector<2x8x1xf32>
    %220 = tpu.reciprocal %219 {approx = true} : vector<2x8x1xf32> -> vector<2x8x1xf32>
    %221 = vector.broadcast %220 : vector<2x8x1xf32> to vector<2x8x8xf32>
    %222 = arith.mulf %217, %221 : vector<2x8x8xf32>
    %223 = arith.truncf %222 : vector<2x8x8xf32> to vector<2x8x8xbf16>
    "tpu.trace_start"() <{level = 10 : i32, message = "bqk,bkd->bqd"}> : () -> ()
    %cst_123 = arith.constant dense<0.000000e+00> : vector<2x8x64xf32>
    %224 = tpu.matmul %223, %211, %cst_123 {dimension_numbers = #tpu.dot_dimension_numbers<[2], [1], [1], [2], [0, 0, 0, 1, 1, 2], [0], [0]>} : vector<2x8x8xbf16>, vector<2x8x64xbf16>, vector<2x8x64xf32> -> vector<2x8x64xf32>
    "tpu.trace_stop"() : () -> ()
    %225 = vector.shape_cast %224 : vector<2x8x64xf32> to vector<16x64xf32>
    %226 = vector.extract_strided_slice %179 {offsets = [0, 128], sizes = [16, 64], strides = [1, 1]} : vector<16x768xf32> to vector<16x64xf32>
    %227 = vector.shape_cast %226 : vector<16x64xf32> to vector<2x8x64xf32>
    %228 = arith.truncf %227 : vector<2x8x64xf32> to vector<2x8x64xbf16>
    %229 = vector.extract_strided_slice %179 {offsets = [0, 384], sizes = [16, 64], strides = [1, 1]} : vector<16x768xf32> to vector<16x64xf32>
    %230 = vector.shape_cast %229 : vector<16x64xf32> to vector<2x8x64xf32>
    %231 = arith.truncf %230 : vector<2x8x64xf32> to vector<2x8x64xbf16>
    %232 = vector.extract_strided_slice %179 {offsets = [0, 640], sizes = [16, 64], strides = [1, 1]} : vector<16x768xf32> to vector<16x64xf32>
    %233 = vector.shape_cast %232 : vector<16x64xf32> to vector<2x8x64xf32>
    %234 = arith.truncf %233 : vector<2x8x64xf32> to vector<2x8x64xbf16>
    "tpu.trace_start"() <{level = 10 : i32, message = "bqd,bkd->bqk"}> : () -> ()
    %cst_124 = arith.constant dense<0.000000e+00> : vector<2x8x8xf32>
    %235 = tpu.matmul %228, %231, %cst_124 {dimension_numbers = #tpu.dot_dimension_numbers<[2], [2], [1], [1], [0, 0, 0, 1, 1, 1], [0], [0]>} : vector<2x8x64xbf16>, vector<2x8x64xbf16>, vector<2x8x8xf32> -> vector<2x8x8xf32>
    "tpu.trace_stop"() : () -> ()
    %cst_125 = arith.constant dense<0xFF800000> : vector<2x8xf32>
    %236 = vector.multi_reduction <maximumf>, %235, %cst_125 [2] : vector<2x8x8xf32> to vector<2x8xf32>
    %237 = vector.shape_cast %236 : vector<2x8xf32> to vector<2x8x1xf32>
    %238 = vector.broadcast %237 : vector<2x8x1xf32> to vector<2x8x8xf32>
    %239 = arith.subf %235, %238 : vector<2x8x8xf32>
    %240 = math.exp %239 : vector<2x8x8xf32>
    %cst_126 = arith.constant dense<0.000000e+00> : vector<2x8xf32>
    %241 = vector.multi_reduction <add>, %240, %cst_126 [2] : vector<2x8x8xf32> to vector<2x8xf32>
    %242 = vector.shape_cast %241 : vector<2x8xf32> to vector<2x8x1xf32>
    %243 = tpu.reciprocal %242 {approx = true} : vector<2x8x1xf32> -> vector<2x8x1xf32>
    %244 = vector.broadcast %243 : vector<2x8x1xf32> to vector<2x8x8xf32>
    %245 = arith.mulf %240, %244 : vector<2x8x8xf32>
    %246 = arith.truncf %245 : vector<2x8x8xf32> to vector<2x8x8xbf16>
    "tpu.trace_start"() <{level = 10 : i32, message = "bqk,bkd->bqd"}> : () -> ()
    %cst_127 = arith.constant dense<0.000000e+00> : vector<2x8x64xf32>
    %247 = tpu.matmul %246, %234, %cst_127 {dimension_numbers = #tpu.dot_dimension_numbers<[2], [1], [1], [2], [0, 0, 0, 1, 1, 2], [0], [0]>} : vector<2x8x8xbf16>, vector<2x8x64xbf16>, vector<2x8x64xf32> -> vector<2x8x64xf32>
    "tpu.trace_stop"() : () -> ()
    %248 = vector.shape_cast %247 : vector<2x8x64xf32> to vector<16x64xf32>
    %249 = vector.extract_strided_slice %179 {offsets = [0, 192], sizes = [16, 64], strides = [1, 1]} : vector<16x768xf32> to vector<16x64xf32>
    %250 = vector.shape_cast %249 : vector<16x64xf32> to vector<2x8x64xf32>
    %251 = arith.truncf %250 : vector<2x8x64xf32> to vector<2x8x64xbf16>
    %252 = vector.extract_strided_slice %179 {offsets = [0, 448], sizes = [16, 64], strides = [1, 1]} : vector<16x768xf32> to vector<16x64xf32>
    %253 = vector.shape_cast %252 : vector<16x64xf32> to vector<2x8x64xf32>
    %254 = arith.truncf %253 : vector<2x8x64xf32> to vector<2x8x64xbf16>
    %255 = vector.extract_strided_slice %179 {offsets = [0, 704], sizes = [16, 64], strides = [1, 1]} : vector<16x768xf32> to vector<16x64xf32>
    %256 = vector.shape_cast %255 : vector<16x64xf32> to vector<2x8x64xf32>
    %257 = arith.truncf %256 : vector<2x8x64xf32> to vector<2x8x64xbf16>
    "tpu.trace_start"() <{level = 10 : i32, message = "bqd,bkd->bqk"}> : () -> ()
    %cst_128 = arith.constant dense<0.000000e+00> : vector<2x8x8xf32>
    %258 = tpu.matmul %251, %254, %cst_128 {dimension_numbers = #tpu.dot_dimension_numbers<[2], [2], [1], [1], [0, 0, 0, 1, 1, 1], [0], [0]>} : vector<2x8x64xbf16>, vector<2x8x64xbf16>, vector<2x8x8xf32> -> vector<2x8x8xf32>
    "tpu.trace_stop"() : () -> ()
    %cst_129 = arith.constant dense<0xFF800000> : vector<2x8xf32>
    %259 = vector.multi_reduction <maximumf>, %258, %cst_129 [2] : vector<2x8x8xf32> to vector<2x8xf32>
    %260 = vector.shape_cast %259 : vector<2x8xf32> to vector<2x8x1xf32>
    %261 = vector.broadcast %260 : vector<2x8x1xf32> to vector<2x8x8xf32>
    %262 = arith.subf %258, %261 : vector<2x8x8xf32>
    %263 = math.exp %262 : vector<2x8x8xf32>
    %cst_130 = arith.constant dense<0.000000e+00> : vector<2x8xf32>
    %264 = vector.multi_reduction <add>, %263, %cst_130 [2] : vector<2x8x8xf32> to vector<2x8xf32>
    %265 = vector.shape_cast %264 : vector<2x8xf32> to vector<2x8x1xf32>
    %266 = tpu.reciprocal %265 {approx = true} : vector<2x8x1xf32> -> vector<2x8x1xf32>
    %267 = vector.broadcast %266 : vector<2x8x1xf32> to vector<2x8x8xf32>
    %268 = arith.mulf %263, %267 : vector<2x8x8xf32>
    %269 = arith.truncf %268 : vector<2x8x8xf32> to vector<2x8x8xbf16>
    "tpu.trace_start"() <{level = 10 : i32, message = "bqk,bkd->bqd"}> : () -> ()
    %cst_131 = arith.constant dense<0.000000e+00> : vector<2x8x64xf32>
    %270 = tpu.matmul %269, %257, %cst_131 {dimension_numbers = #tpu.dot_dimension_numbers<[2], [1], [1], [2], [0, 0, 0, 1, 1, 2], [0], [0]>} : vector<2x8x8xbf16>, vector<2x8x64xbf16>, vector<2x8x64xf32> -> vector<2x8x64xf32>
    "tpu.trace_stop"() : () -> ()
    %271 = vector.shape_cast %270 : vector<2x8x64xf32> to vector<16x64xf32>
    %272 = tpu.concatenate %202, %225, %248, %271 in 1 : vector<16x64xf32>, vector<16x64xf32>, vector<16x64xf32>, vector<16x64xf32> -> vector<16x256xf32>
    %273 = arith.truncf %272 : vector<16x256xf32> to vector<16x256xbf16>
    %c0_132 = arith.constant 0 : index
    %c0_133 = arith.constant 0 : index
    %274 = vector.load %arg14[%c0_132, %c0_133] : memref<256x256xbf16, #tpu.memory_space<vmem>>, vector<256x256xbf16>
    %cst_134 = arith.constant dense<0.000000e+00> : vector<16x256xf32>
    %275 = tpu.matmul %273, %274, %cst_134 {dimension_numbers = #tpu.dot_dimension_numbers<[1], [0], [0], [1], [0, 0, 1, 1], [], []>} : vector<16x256xbf16>, vector<256x256xbf16>, vector<16x256xf32> -> vector<16x256xf32>
    %c0_135 = arith.constant 0 : index
    %c0_136 = arith.constant 0 : index
    %276 = vector.load %arg15[%c0_135, %c0_136] : memref<1x256xf32, #tpu.memory_space<vmem>>, vector<1x256xf32>
    %277 = vector.broadcast %276 : vector<1x256xf32> to vector<16x256xf32>
    %278 = arith.addf %275, %277 : vector<16x256xf32>
    %279 = arith.addf %149, %278 : vector<16x256xf32>
    %c0_137 = arith.constant 0 : index
    %c0_138 = arith.constant 0 : index
    %280 = vector.load %arg16[%c0_137, %c0_138] : memref<1x256xf32, #tpu.memory_space<vmem>>, vector<1x256xf32>
    %c0_139 = arith.constant 0 : index
    %c0_140 = arith.constant 0 : index
    %281 = vector.load %arg17[%c0_139, %c0_140] : memref<1x256xf32, #tpu.memory_space<vmem>>, vector<1x256xf32>
    %cst_141 = arith.constant dense<0.000000e+00> : vector<16xf32>
    %282 = vector.multi_reduction <add>, %279, %cst_141 [1] : vector<16x256xf32> to vector<16xf32>
    %283 = vector.shape_cast %282 : vector<16xf32> to vector<16x1xf32>
    %cst_142 = arith.constant 2.560000e+02 : f32
    %284 = vector.broadcast %cst_142 : f32 to vector<16x1xf32>
    %285 = arith.divf %283, %284 : vector<16x1xf32>
    %286 = vector.broadcast %285 : vector<16x1xf32> to vector<16x256xf32>
    %287 = arith.subf %279, %286 : vector<16x256xf32>
    %288 = arith.mulf %287, %287 : vector<16x256xf32>
    %cst_143 = arith.constant dense<0.000000e+00> : vector<16xf32>
    %289 = vector.multi_reduction <add>, %288, %cst_143 [1] : vector<16x256xf32> to vector<16xf32>
    %290 = vector.shape_cast %289 : vector<16xf32> to vector<16x1xf32>
    %cst_144 = arith.constant 2.560000e+02 : f32
    %291 = vector.broadcast %cst_144 : f32 to vector<16x1xf32>
    %292 = arith.divf %290, %291 : vector<16x1xf32>
    %293 = vector.broadcast %285 : vector<16x1xf32> to vector<16x256xf32>
    %294 = arith.subf %279, %293 : vector<16x256xf32>
    %cst_145 = arith.constant 9.99999974E-6 : f32
    %295 = vector.broadcast %cst_145 : f32 to vector<16x1xf32>
    %296 = arith.addf %292, %295 : vector<16x1xf32>
    %297 = math.rsqrt %296 : vector<16x1xf32>
    %298 = vector.broadcast %297 : vector<16x1xf32> to vector<16x256xf32>
    %299 = arith.mulf %294, %298 : vector<16x256xf32>
    %300 = vector.broadcast %280 : vector<1x256xf32> to vector<16x256xf32>
    %301 = arith.mulf %299, %300 : vector<16x256xf32>
    %302 = vector.broadcast %281 : vector<1x256xf32> to vector<16x256xf32>
    %303 = arith.addf %301, %302 : vector<16x256xf32>
    %304 = arith.truncf %303 : vector<16x256xf32> to vector<16x256xbf16>
    %c0_146 = arith.constant 0 : index
    %c0_147 = arith.constant 0 : index
    %305 = vector.load %arg18[%c0_146, %c0_147] : memref<256x512xbf16, #tpu.memory_space<vmem>>, vector<256x512xbf16>
    %cst_148 = arith.constant dense<0.000000e+00> : vector<16x512xf32>
    %306 = tpu.matmul %304, %305, %cst_148 {dimension_numbers = #tpu.dot_dimension_numbers<[1], [0], [0], [1], [0, 0, 1, 1], [], []>} : vector<16x256xbf16>, vector<256x512xbf16>, vector<16x512xf32> -> vector<16x512xf32>
    %c0_149 = arith.constant 0 : index
    %c0_150 = arith.constant 0 : index
    %307 = vector.load %arg19[%c0_149, %c0_150] : memref<1x512xf32, #tpu.memory_space<vmem>>, vector<1x512xf32>
    %308 = vector.broadcast %307 : vector<1x512xf32> to vector<16x512xf32>
    %309 = arith.addf %306, %308 : vector<16x512xf32>
    %cst_151 = arith.constant 0.000000e+00 : f32
    %310 = vector.broadcast %cst_151 : f32 to vector<16x512xf32>
    %311 = arith.maximumf %309, %310 : vector<16x512xf32>
    %312 = arith.truncf %311 : vector<16x512xf32> to vector<16x512xbf16>
    %c0_152 = arith.constant 0 : index
    %c0_153 = arith.constant 0 : index
    %313 = vector.load %arg20[%c0_152, %c0_153] : memref<512x256xbf16, #tpu.memory_space<vmem>>, vector<512x256xbf16>
    %cst_154 = arith.constant dense<0.000000e+00> : vector<16x256xf32>
    %314 = tpu.matmul %312, %313, %cst_154 {dimension_numbers = #tpu.dot_dimension_numbers<[1], [0], [0], [1], [0, 0, 1, 1], [], []>} : vector<16x512xbf16>, vector<512x256xbf16>, vector<16x256xf32> -> vector<16x256xf32>
    %c0_155 = arith.constant 0 : index
    %c0_156 = arith.constant 0 : index
    %315 = vector.load %arg21[%c0_155, %c0_156] : memref<1x256xf32, #tpu.memory_space<vmem>>, vector<1x256xf32>
    %316 = vector.broadcast %315 : vector<1x256xf32> to vector<16x256xf32>
    %317 = arith.addf %314, %316 : vector<16x256xf32>
    %318 = arith.addf %279, %317 : vector<16x256xf32>
    %319 = vector.shape_cast %318 : vector<16x256xf32> to vector<2x8x256xf32>
    %cst_157 = arith.constant dense<0.000000e+00> : vector<2x256xf32>
    %320 = vector.multi_reduction <add>, %319, %cst_157 [1] : vector<2x8x256xf32> to vector<2x256xf32>
    %cst_158 = arith.constant 8.000000e+00 : f32
    %321 = vector.broadcast %cst_158 : f32 to vector<2x256xf32>
    %322 = arith.divf %320, %321 : vector<2x256xf32>
    %c0_159 = arith.constant 0 : index
    %c0_160 = arith.constant 0 : index
    %323 = vector.load %arg6[%c0_159, %c0_160] : memref<1x256xf32, #tpu.memory_space<vmem>>, vector<1x256xf32>
    %c0_161 = arith.constant 0 : index
    %c0_162 = arith.constant 0 : index
    %324 = vector.load %arg7[%c0_161, %c0_162] : memref<1x256xf32, #tpu.memory_space<vmem>>, vector<1x256xf32>
    %cst_163 = arith.constant dense<0.000000e+00> : vector<2xf32>
    %325 = vector.multi_reduction <add>, %322, %cst_163 [1] : vector<2x256xf32> to vector<2xf32>
    %326 = vector.shape_cast %325 : vector<2xf32> to vector<2x1xf32>
    %cst_164 = arith.constant 2.560000e+02 : f32
    %327 = vector.broadcast %cst_164 : f32 to vector<2x1xf32>
    %328 = arith.divf %326, %327 : vector<2x1xf32>
    %329 = vector.broadcast %328 : vector<2x1xf32> to vector<2x256xf32>
    %330 = arith.subf %322, %329 : vector<2x256xf32>
    %331 = arith.mulf %330, %330 : vector<2x256xf32>
    %cst_165 = arith.constant dense<0.000000e+00> : vector<2xf32>
    %332 = vector.multi_reduction <add>, %331, %cst_165 [1] : vector<2x256xf32> to vector<2xf32>
    %333 = vector.shape_cast %332 : vector<2xf32> to vector<2x1xf32>
    %cst_166 = arith.constant 2.560000e+02 : f32
    %334 = vector.broadcast %cst_166 : f32 to vector<2x1xf32>
    %335 = arith.divf %333, %334 : vector<2x1xf32>
    %336 = vector.broadcast %328 : vector<2x1xf32> to vector<2x256xf32>
    %337 = arith.subf %322, %336 : vector<2x256xf32>
    %cst_167 = arith.constant 9.99999974E-6 : f32
    %338 = vector.broadcast %cst_167 : f32 to vector<2x1xf32>
    %339 = arith.addf %335, %338 : vector<2x1xf32>
    %340 = math.rsqrt %339 : vector<2x1xf32>
    %341 = vector.broadcast %340 : vector<2x1xf32> to vector<2x256xf32>
    %342 = arith.mulf %337, %341 : vector<2x256xf32>
    %343 = vector.broadcast %323 : vector<1x256xf32> to vector<2x256xf32>
    %344 = arith.mulf %342, %343 : vector<2x256xf32>
    %345 = vector.broadcast %324 : vector<1x256xf32> to vector<2x256xf32>
    %346 = arith.addf %344, %345 : vector<2x256xf32>
    %347 = arith.truncf %346 : vector<2x256xf32> to vector<2x256xbf16>
    %c0_168 = arith.constant 0 : index
    %c0_169 = arith.constant 0 : index
    %348 = vector.load %arg8[%c0_168, %c0_169] : memref<256x128xbf16, #tpu.memory_space<vmem>>, vector<256x128xbf16>
    %cst_170 = arith.constant dense<0.000000e+00> : vector<2x128xf32>
    %349 = tpu.matmul %347, %348, %cst_170 {dimension_numbers = #tpu.dot_dimension_numbers<[1], [0], [0], [1], [0, 0, 1, 1], [], []>} : vector<2x256xbf16>, vector<256x128xbf16>, vector<2x128xf32> -> vector<2x128xf32>
    %c0_171 = arith.constant 0 : index
    %c0_172 = arith.constant 0 : index
    %350 = vector.load %arg9[%c0_171, %c0_172] : memref<1x128xf32, #tpu.memory_space<vmem>>, vector<1x128xf32>
    %351 = vector.broadcast %350 : vector<1x128xf32> to vector<2x128xf32>
    %352 = arith.addf %349, %351 : vector<2x128xf32>
    %c0_173 = arith.constant 0 : index
    %c0_174 = arith.constant 0 : index
    %353 = vector.load %arg22[%c0_173, %c0_174] : memref<2x128xf32, #tpu.memory_space<vmem>>, vector<2x128xf32>
    tpu.vector_store %arg22[%c0_173, %c0_174], %352 {strides = array<i32>} : memref<2x128xf32, #tpu.memory_space<vmem>>, vector<2x128xf32>,
    return
  }
}

</mosaic_0001>

<bundles_post_ra>
// kernel: classification_forward.1
= control target key start
LH: loop header
LB: loop body
LE: loop exit
PB: predicated region body
PF: predicated region fallthrough
CT: control target
= control target key end

     0   :  { %s7493_s0 = inlined_call_operand.hbm [shape: f32[2,8,32], index: 0, kind: input, shape index: {}]   ;;  %s7494_s1 = inlined_call_operand.vmem [shape: f32[8,256], index: 1, kind: input, shape index: {}]   ;;  %s7495_s2 = inlined_call_operand.vmem [shape: bf16[3,32,256], index: 2, kind: input, shape index: {}]   ;;  %s7496_s3 = inlined_call_operand.vmem [shape: f32[1,256], index: 3, kind: input, shape index: {}]   ;;  %s7497_s4 = inlined_call_operand.hbm [shape: bf16[3,256,256], index: 4, kind: input, shape index: {}]   ;;  %s7498_s5 = inlined_call_operand.hbm [shape: f32[1,256], index: 5, kind: input, shape index: {}]   ;;  %s7499_s6 = inlined_call_operand.hbm [shape: f32[1,256], index: 6, kind: input, shape index: {}]   ;;  %s7500_s7 = inlined_call_operand.hbm [shape: f32[1,256], index: 7, kind: input, shape index: {}]   ;;  %s7501_s8 = inlined_call_operand.hbm [shape: bf16[256,128], index: 8, kind: input, shape index: {}]   ;;  %s7502_s9 = inlined_call_operand.vmem [shape: f32[1,128], index: 9, kind: input, shape index: {}]   ;;  %s7503_s10 = inlined_call_operand.hbm [shape: f32[1,256], index: 10, kind: input, shape index: {}]   ;;  %s7504_s11 = inlined_call_operand.hbm [shape: f32[1,256], index: 11, kind: input, shape index: {}]   ;;  %s7505_s12 = inlined_call_operand.hbm [shape: bf16[256,768], index: 12, kind: input, shape index: {}]   ;;  %s7506_s13 = inlined_call_operand.hbm [shape: f32[1,768], index: 13, kind: input, shape index: {}]   ;;  %s7507_s14 = inlined_call_operand.hbm [shape: bf16[256,256], index: 14, kind: input, shape index: {}]   ;;  %s7508_s15 = inlined_call_operand.hbm [shape: f32[1,256], index: 15, kind: input, shape index: {}]   ;;  %s7509_s16 = inlined_call_operand.hbm [shape: f32[1,256], index: 16, kind: input, shape index: {}]   ;;  %s7510_s17 = inlined_call_operand.hbm [shape: f32[1,256], index: 17, kind: input, shape index: {}]   ;;  %s7511_s18 = inlined_call_operand.hbm [shape: bf16[256,512], index: 18, kind: input, shape index: {}]   ;;  %s7512_s19 = inlined_call_operand.hbm [shape: f32[1,512], index: 19, kind: input, shape index: {}]   ;;  %s7513_s20 = inlined_call_operand.hbm [shape: bf16[512,256], index: 20, kind: input, shape index: {}]   ;;  %s7514_s21 = inlined_call_operand.hbm [shape: f32[1,256], index: 21, kind: input, shape index: {}]   ;;  %s7515_s22 = inlined_call_operand.hbm [shape: f32[2,128], index: 22, kind: output, shape index: {}]  }
   0x1   :  { %7527 = sst [smem:[#allocation45_spill]] %s7493_s0 }
   0x2   :  { %7528 = sst [smem:[#allocation46_spill]] %s7494_s1 }
   0x3   :  { %7529 = sst [smem:[#allocation47_spill]] %s7495_s2 }
   0x4   :  { %7530 = sst [smem:[#allocation48_spill]] %s7496_s3 }
   0x5   :  { %7531 = sst [smem:[#allocation49_spill]] %s7497_s4 }
   0x6   :  { %7532 = sst [smem:[#allocation50_spill]] %s7498_s5 }
   0x7   :  { %7533 = sst [smem:[#allocation51_spill]] %s7499_s6 }
   0x8   :  { %7534 = sst [smem:[#allocation52_spill]] %s7515_s22 }
   0x9   :  { %27 = vsyncpa [#allocation5], 0 }
   0xa   :  { %28 = vsyncpa [#allocation8], 0 }
   0xb   :  { %29 = vsyncpa [#allocation11], 0 }
   0xc   :  { %30 = vsyncpa [#allocation14], 0 }
   0xd   :  { %31 = vsyncpa [#allocation17], 0 }
   0xe   :  { %32 = vsyncpa [#allocation20], 0 }
   0xf   :  { %33 = vsyncpa [#allocation23], 0 }
  0x10   :  { %34 = vsyncpa [#allocation26], 0 }
  0x11   :  { %35 = vsyncpa [#allocation29], 0 }
  0x12   :  { %36 = vsyncpa [#allocation32], 0 }
  0x13   :  { %37 = vsyncpa [#allocation6], 0  ;;  %s6656_s3 = smov [#allocation7]   ;;  %s6657_s29 = smov [#allocation10]  }
  0x14   :  { %s61_s28 = sshll.u32 %s6656_s3, 4  ;;  %s84_s30 = sshll.u32 %s6657_s29, 4  ;;  %s62_s28 = int_to_ptr.vmem [resolvable:$true] %s61_s28  ;;  %s85_s30 = int_to_ptr.vmem [resolvable:$true] %s84_s30 }
  0x15   :  { %s7535_s23 = sld [smem:[#allocation49_spill]] }
  0x1b   :  { %s6216_s1 = scalar_lea.hbm %s7535_s23, 12288 }
  0x1c   :  { %p6217_p0 = scmp.ne.s32.totalorder %s7535_s23, %s6216_s1  ;;  %p6220_p1 = scmp.lt.u32.totalorder %s6216_s1, %s7535_s23 }
  0x1e   :  { %p6222_p2 = pnand %p6220_p1, %p6217_p0 }
  0x20   :  { %6225 = shalt.err (!%p6222_p2)
}
  0x21   :  { %s6226_s26 = scalar_lea.vmem %s62_s28, 12288  ;;  %p6231_p4 = scmp.lt.s32.totalorder %s62_s28, %s62_s28 }
  0x22   :  { %p6227_p3 = scmp.ne.s32.totalorder %s62_s28, %s6226_s26  ;;  %p6232_p5 = scmp.lt.s32.totalorder %s6226_s26, %s6226_s26 }
  0x24   :  { %p6233_p6 = por %p6232_p5, %p6231_p4 }
  0x26   :  { %p6234_p7 = pnand %p6233_p6, %p6227_p3 }
  0x28   :  { %6237 = shalt.err (!%p6234_p7)
}
  0x29   :  { %s7523_s2 = smov 128   ;;  %s7525_s27 = smov 8  }
  0x2a   :  { %67 = dma.hbm_to_vmem [thread:$0]  %s7535_s23, 12288, %s62_s28, [#allocation8], %s7523_s2, %s7523_s2, %s7525_s27  }
  0x2b   :  { %s7536_s1 = sld [smem:[#allocation51_spill]] }
  0x31   :  { %s6238_s5 = scalar_lea.hbm %s7536_s1, 32 }
  0x32   :  { %p6239_p8 = scmp.ne.s32.totalorder %s7536_s1, %s6238_s5  ;;  %p6242_p9 = scmp.lt.u32.totalorder %s6238_s5, %s7536_s1 }
  0x34   :  { %p6244_p10 = pnand %p6242_p9, %p6239_p8 }
  0x36   :  { %6247 = shalt.err (!%p6244_p10)
}
  0x37   :  { %s6248_s22 = scalar_lea.vmem %s85_s30, 32  ;;  %p6253_p12 = scmp.lt.s32.totalorder %s85_s30, %s85_s30 }
  0x38   :  { %p6249_p11 = scmp.ne.s32.totalorder %s85_s30, %s6248_s22  ;;  %p6254_p13 = scmp.lt.s32.totalorder %s6248_s22, %s6248_s22 }
  0x3a   :  { %p6255_p0 = por %p6254_p13, %p6253_p12 }
  0x3c   :  { %p6256_p1 = pnand %p6255_p0, %p6249_p11 }
  0x3e   :  { %6259 = shalt.err (!%p6256_p1)
}
  0x3f   :  { %87 = dma.hbm_to_vmem [thread:$0]  %s7536_s1, 32, %s85_s30, [#allocation11]  }
  0x40   :  { %s6660_s3 = smov [#allocation13]   ;;  %s6260_s5 = scalar_lea.hbm %s7501_s8, 2048 }
  0x41   :  { %s103_s29 = sshll.u32 %s6660_s3, 4  ;;  %p6261_p2 = scmp.ne.s32.totalorder %s7501_s8, %s6260_s5  ;;  %s104_s29 = int_to_ptr.vmem [resolvable:$true] %s103_s29 }
  0x42   :  { %p6264_p3 = scmp.lt.u32.totalorder %s6260_s5, %s7501_s8 }
  0x44   :  { %p6266_p4 = pnand %p6264_p3, %p6261_p2 }
  0x46   :  { %6269 = shalt.err (!%p6266_p4)
}
  0x47   :  { %s6270_s26 = scalar_lea.vmem %s104_s29, 2048  ;;  %p6275_p6 = scmp.lt.s32.totalorder %s104_s29, %s104_s29 }
  0x48   :  { %p6271_p5 = scmp.ne.s32.totalorder %s104_s29, %s6270_s26  ;;  %p6276_p7 = scmp.lt.s32.totalorder %s6270_s26, %s6270_s26 }
  0x4a   :  { %p6277_p8 = por %p6276_p7, %p6275_p6 }
  0x4c   :  { %p6278_p9 = pnand %p6277_p8, %p6271_p5 }
  0x4e   :  { %6281 = shalt.err (!%p6278_p9)
}
  0x4f   :  { %s6661_s30 = smov 64   ;;  %s6662_s1 = smov 4  }
  0x50   :  { %109 = dma.hbm_to_vmem [thread:$0]  %s7501_s8, 2048, %s104_s29, [#allocation14], %s6661_s30, %s6661_s30, %s6662_s1  }
  0x51   :  { %s6663_s3 = smov [#allocation16]   ;;  %s6664_s0 = smov [#allocation19]  }
  0x52   :  { %s128_s4 = sshll.u32 %s6663_s3, 4  ;;  %s150_s5 = sshll.u32 %s6664_s0, 4  ;;  %s129_s4 = int_to_ptr.vmem [resolvable:$true] %s128_s4  ;;  %s151_s5 = int_to_ptr.vmem [resolvable:$true] %s150_s5 }
  0x53   :  { %s6282_s25 = scalar_lea.hbm %s7504_s11, 32 }
  0x54   :  { %p6283_p10 = scmp.ne.s32.totalorder %s7504_s11, %s6282_s25  ;;  %p6286_p11 = scmp.lt.u32.totalorder %s6282_s25, %s7504_s11 }
  0x56   :  { %p6288_p12 = pnand %p6286_p11, %p6283_p10 }
  0x58   :  { %6291 = shalt.err (!%p6288_p12)
}
  0x59   :  { %s6292_s8 = scalar_lea.vmem %s129_s4, 32  ;;  %p6297_p0 = scmp.lt.s32.totalorder %s129_s4, %s129_s4 }
  0x5a   :  { %p6293_p13 = scmp.ne.s32.totalorder %s129_s4, %s6292_s8  ;;  %p6298_p1 = scmp.lt.s32.totalorder %s6292_s8, %s6292_s8 }
  0x5c   :  { %p6299_p2 = por %p6298_p1, %p6297_p0 }
  0x5e   :  { %p6300_p3 = pnand %p6299_p2, %p6293_p13 }
  0x60   :  { %6303 = shalt.err (!%p6300_p3)
}
  0x61   :  { %131 = dma.hbm_to_vmem [thread:$0]  %s7504_s11, 32, %s129_s4, [#allocation17]  }
  0x62   :  { %s6304_s3 = scalar_lea.hbm %s7506_s13, 96 }
  0x63   :  { %p6305_p4 = scmp.ne.s32.totalorder %s7506_s13, %s6304_s3  ;;  %p6308_p5 = scmp.lt.u32.totalorder %s6304_s3, %s7506_s13 }
  0x65   :  { %p6310_p6 = pnand %p6308_p5, %p6305_p4 }
  0x67   :  { %6313 = shalt.err (!%p6310_p6)
}
  0x68   :  { %s6314_s6 = scalar_lea.vmem %s151_s5, 96  ;;  %p6319_p8 = scmp.lt.s32.totalorder %s151_s5, %s151_s5 }
  0x69   :  { %p6315_p7 = scmp.ne.s32.totalorder %s151_s5, %s6314_s6  ;;  %p6320_p9 = scmp.lt.s32.totalorder %s6314_s6, %s6314_s6 }
  0x6b   :  { %p6321_p10 = por %p6320_p9, %p6319_p8 }
  0x6d   :  { %p6322_p11 = pnand %p6321_p10, %p6315_p7 }
  0x6f   :  { %6325 = shalt.err (!%p6322_p11)
}
  0x70   :  { %153 = dma.hbm_to_vmem [thread:$0]  %s7506_s13, 96, %s151_s5, [#allocation20]  }
  0x71   :  { %s6665_s25 = smov [#allocation22]   ;;  %s6666_s26 = smov [#allocation25]  }
  0x72   :  { %s172_s22 = sshll.u32 %s6665_s25, 4  ;;  %s192_s8 = sshll.u32 %s6666_s26, 4  ;;  %s173_s22 = int_to_ptr.vmem [resolvable:$true] %s172_s22  ;;  %s193_s8 = int_to_ptr.vmem [resolvable:$true] %s192_s8 }
  0x73   :  { %s6326_s28 = scalar_lea.hbm %s7508_s15, 32 }
  0x74   :  { %p6327_p12 = scmp.ne.s32.totalorder %s7508_s15, %s6326_s28  ;;  %p6330_p13 = scmp.lt.u32.totalorder %s6326_s28, %s7508_s15 }
  0x76   :  { %p6332_p0 = pnand %p6330_p13, %p6327_p12 }
  0x78   :  { %6335 = shalt.err (!%p6332_p0)
}
  0x79   :  { %s6336_s13 = scalar_lea.vmem %s173_s22, 32  ;;  %p6341_p2 = scmp.lt.s32.totalorder %s173_s22, %s173_s22 }
  0x7a   :  { %p6337_p1 = scmp.ne.s32.totalorder %s173_s22, %s6336_s13  ;;  %p6342_p3 = scmp.lt.s32.totalorder %s6336_s13, %s6336_s13 }
  0x7c   :  { %p6343_p4 = por %p6342_p3, %p6341_p2 }
  0x7e   :  { %p6344_p5 = pnand %p6343_p4, %p6337_p1 }
  0x80   :  { %6347 = shalt.err (!%p6344_p5)
}
  0x81   :  { %175 = dma.hbm_to_vmem [thread:$0]  %s7508_s15, 32, %s173_s22, [#allocation23]  }
  0x82   :  { %s6348_s11 = scalar_lea.hbm %s7510_s17, 32 }
  0x83   :  { %p6349_p6 = scmp.ne.s32.totalorder %s7510_s17, %s6348_s11  ;;  %p6352_p7 = scmp.lt.u32.totalorder %s6348_s11, %s7510_s17 }
  0x85   :  { %p6354_p8 = pnand %p6352_p7, %p6349_p6 }
  0x87   :  { %6357 = shalt.err (!%p6354_p8)
}
  0x88   :  { %s6358_s1 = scalar_lea.vmem %s193_s8, 32  ;;  %p6363_p10 = scmp.lt.s32.totalorder %s193_s8, %s193_s8 }
  0x89   :  { %p6359_p9 = scmp.ne.s32.totalorder %s193_s8, %s6358_s1  ;;  %p6364_p11 = scmp.lt.s32.totalorder %s6358_s1, %s6358_s1 }
  0x8b   :  { %p6365_p12 = por %p6364_p11, %p6363_p10 }
  0x8d   :  { %p6366_p13 = pnand %p6365_p12, %p6359_p9 }
  0x8f   :  { %6369 = shalt.err (!%p6366_p13)
}
  0x90   :  { %195 = dma.hbm_to_vmem [thread:$0]  %s7510_s17, 32, %s193_s8, [#allocation26]  }
  0x91   :  { %s6667_s28 = smov [#allocation28]   ;;  %s6668_s3 = smov [#allocation4]  }
  0x92   :  { %s214_s23 = sshll.u32 %s6667_s28, 4  ;;  %s43_s2 = sshll.u32 %s6668_s3, 4  ;;  %s215_s23 = int_to_ptr.vmem [resolvable:$true] %s214_s23  ;;  %s44_s2 = int_to_ptr.vmem [resolvable:$true] %s43_s2 }
  0x93   :  { %s6370_s5 = scalar_lea.hbm %s7512_s19, 64 }
  0x94   :  { %p6371_p0 = scmp.ne.s32.totalorder %s7512_s19, %s6370_s5  ;;  %p6374_p1 = scmp.lt.u32.totalorder %s6370_s5, %s7512_s19 }
  0x96   :  { %p6376_p2 = pnand %p6374_p1, %p6371_p0 }
  0x98   :  { %6379 = shalt.err (!%p6376_p2)
}
  0x99   :  { %s6380_s17 = scalar_lea.vmem %s215_s23, 64  ;;  %p6385_p4 = scmp.lt.s32.totalorder %s215_s23, %s215_s23 }
  0x9a   :  { %p6381_p3 = scmp.ne.s32.totalorder %s215_s23, %s6380_s17  ;;  %p6386_p5 = scmp.lt.s32.totalorder %s6380_s17, %s6380_s17 }
  0x9c   :  { %p6387_p6 = por %p6386_p5, %p6385_p4 }
  0x9e   :  { %p6388_p7 = pnand %p6387_p6, %p6381_p3 }
  0xa0   :  { %6391 = shalt.err (!%p6388_p7)
}
  0xa1   :  { %217 = dma.hbm_to_vmem [thread:$0]  %s7512_s19, 64, %s215_s23, [#allocation29]  }
  0xa2   :  { %s7537_s29 = sld [smem:[#allocation45_spill]] }
  0xa8   :  { %s6392_s1 = scalar_lea.hbm %s7537_s29, 256 }
  0xa9   :  { %p6393_p8 = scmp.ne.s32.totalorder %s7537_s29, %s6392_s1  ;;  %p6396_p9 = scmp.lt.u32.totalorder %s6392_s1, %s7537_s29 }
  0xab   :  { %p6398_p10 = pnand %p6396_p9, %p6393_p8 }
  0xad   :  { %6401 = shalt.err (!%p6398_p10)
}
  0xae   :  { %s6402_s27 = scalar_lea.vmem %s44_s2, 256  ;;  %p6407_p12 = scmp.lt.s32.totalorder %s44_s2, %s44_s2 }
  0xaf   :  { %p6403_p11 = scmp.ne.s32.totalorder %s44_s2, %s6402_s27  ;;  %p6408_p13 = scmp.lt.s32.totalorder %s6402_s27, %s6402_s27 }
  0xb1   :  { %p6409_p0 = por %p6408_p13, %p6407_p12 }
  0xb3   :  { %p6410_p1 = pnand %p6409_p0, %p6403_p11 }
  0xb5   :  { %6413 = shalt.err (!%p6410_p1)
}
  0xb6   :  { %s7538_s19 = smov 8   ;;  %s7539_s23 = smov 128  }
  0xb7   :  { %49 = dma.hbm_to_vmem [thread:$0]  %s7537_s29, 256, %s44_s2, [#allocation5], %s7539_s23, %s7539_s23, %s7538_s19  }
  0xb8   :  { %s6669_s0 = smov [#allocation9]   ;;  %s6670_s6 = smov [#allocation12]  }
  0xb9   :  { %s74_s24 = sshll.u32 %s6669_s0, 4  ;;  %s94_s11 = sshll.u32 %s6670_s6, 4  ;;  %s75_s24 = int_to_ptr.vmem [resolvable:$true] %s74_s24  ;;  %s95_s11 = int_to_ptr.vmem [resolvable:$true] %s94_s11 }
  0xba   :  { %s7540_s4 = sld [smem:[#allocation50_spill]] }
  0xc0   :  { %s6414_s25 = scalar_lea.hbm %s7540_s4, 32 }
  0xc1   :  { %p6415_p2 = scmp.ne.s32.totalorder %s7540_s4, %s6414_s25  ;;  %p6418_p3 = scmp.lt.u32.totalorder %s6414_s25, %s7540_s4 }
  0xc3   :  { %p6420_p4 = pnand %p6418_p3, %p6415_p2 }
  0xc5   :  { %6423 = shalt.err (!%p6420_p4)
}
  0xc6   :  { %s6424_s2 = scalar_lea.vmem %s75_s24, 32  ;;  %p6429_p6 = scmp.lt.s32.totalorder %s75_s24, %s75_s24 }
  0xc7   :  { %p6425_p5 = scmp.ne.s32.totalorder %s75_s24, %s6424_s2  ;;  %p6430_p7 = scmp.lt.s32.totalorder %s6424_s2, %s6424_s2 }
  0xc9   :  { %p6431_p8 = por %p6430_p7, %p6429_p6 }
  0xcb   :  { %p6432_p9 = pnand %p6431_p8, %p6425_p5 }
  0xcd   :  { %6435 = shalt.err (!%p6432_p9)
}
  0xce   :  { %77 = dma.hbm_to_vmem [thread:$0]  %s7540_s4, 32, %s75_s24, [#allocation8]  }
  0xcf   :  { %s6436_s13 = scalar_lea.hbm %s7500_s7, 32 }
  0xd0   :  { %p6437_p10 = scmp.ne.s32.totalorder %s7500_s7, %s6436_s13  ;;  %p6440_p11 = scmp.lt.u32.totalorder %s6436_s13, %s7500_s7 }
  0xd2   :  { %p6442_p12 = pnand %p6440_p11, %p6437_p10 }
  0xd4   :  { %6445 = shalt.err (!%p6442_p12)
}
  0xd5   :  { %s6446_s8 = scalar_lea.vmem %s95_s11, 32  ;;  %p6451_p0 = scmp.lt.s32.totalorder %s95_s11, %s95_s11 }
  0xd6   :  { %p6447_p13 = scmp.ne.s32.totalorder %s95_s11, %s6446_s8  ;;  %p6452_p1 = scmp.lt.s32.totalorder %s6446_s8, %s6446_s8 }
  0xd8   :  { %p6453_p2 = por %p6452_p1, %p6451_p0 }
  0xda   :  { %p6454_p3 = pnand %p6453_p2, %p6447_p13 }
  0xdc   :  { %6457 = shalt.err (!%p6454_p3)
}
  0xdd   :  { %97 = dma.hbm_to_vmem [thread:$0]  %s7500_s7, 32, %s95_s11, [#allocation11]  }
  0xde   :  { %s6671_s25 = smov [#allocation15]   ;;  %s6672_s1 = smov [#allocation18]  }
  0xdf   :  { %s118_s26 = sshll.u32 %s6671_s25, 4  ;;  %s137_s15 = sshll.u32 %s6672_s1, 4  ;;  %s119_s26 = int_to_ptr.vmem [resolvable:$true] %s118_s26  ;;  %s138_s15 = int_to_ptr.vmem [resolvable:$true] %s137_s15 }
  0xe0   :  { %s6458_s29 = scalar_lea.hbm %s7503_s10, 32 }
  0xe1   :  { %p6459_p4 = scmp.ne.s32.totalorder %s7503_s10, %s6458_s29  ;;  %p6462_p5 = scmp.lt.u32.totalorder %s6458_s29, %s7503_s10 }
  0xe3   :  { %p6464_p6 = pnand %p6462_p5, %p6459_p4 }
  0xe5   :  { %6467 = shalt.err (!%p6464_p6)
}
  0xe6   :  { %s6468_s7 = scalar_lea.vmem %s119_s26, 32  ;;  %p6473_p8 = scmp.lt.s32.totalorder %s119_s26, %s119_s26 }
  0xe7   :  { %p6469_p7 = scmp.ne.s32.totalorder %s119_s26, %s6468_s7  ;;  %p6474_p9 = scmp.lt.s32.totalorder %s6468_s7, %s6468_s7 }
  0xe9   :  { %p6475_p10 = por %p6474_p9, %p6473_p8 }
  0xeb   :  { %p6476_p11 = pnand %p6475_p10, %p6469_p7 }
  0xed   :  { %6479 = shalt.err (!%p6476_p11)
}
  0xee   :  { %121 = dma.hbm_to_vmem [thread:$0]  %s7503_s10, 32, %s119_s26, [#allocation14]  }
  0xef   :  { %s6480_s17 = scalar_lea.hbm %s7505_s12, 12288 }
  0xf0   :  { %p6481_p12 = scmp.ne.s32.totalorder %s7505_s12, %s6480_s17  ;;  %p6484_p13 = scmp.lt.u32.totalorder %s6480_s17, %s7505_s12 }
  0xf2   :  { %p6486_p0 = pnand %p6484_p13, %p6481_p12 }
  0xf4   :  { %6489 = shalt.err (!%p6486_p0)
}
  0xf5   :  { %s6490_s1 = scalar_lea.vmem %s138_s15, 12288  ;;  %p6495_p2 = scmp.lt.s32.totalorder %s138_s15, %s138_s15 }
  0xf6   :  { %p6491_p1 = scmp.ne.s32.totalorder %s138_s15, %s6490_s1  ;;  %p6496_p3 = scmp.lt.s32.totalorder %s6490_s1, %s6490_s1 }
  0xf8   :  { %p6497_p4 = por %p6496_p3, %p6495_p2 }
  0xfa   :  { %p6498_p5 = pnand %p6497_p4, %p6491_p1 }
  0xfc   :  { %6501 = shalt.err (!%p6498_p5)
}
  0xfd   :  { %s6673_s10 = smov 384   ;;  %s6674_s26 = smov 24  }
  0xfe   :  { %143 = dma.hbm_to_vmem [thread:$0]  %s7505_s12, 12288, %s138_s15, [#allocation17], %s6673_s10, %s6673_s10, %s6674_s26  }
  0xff   :  { %s6675_s29 = smov [#allocation21]   ;;  %s6676_s3 = smov [#allocation24]  }
 0x100   :  { %s159_s28 = sshll.u32 %s6675_s29, 4  ;;  %s182_s27 = sshll.u32 %s6676_s3, 4  ;;  %s160_s28 = int_to_ptr.vmem [resolvable:$true] %s159_s28  ;;  %s183_s27 = int_to_ptr.vmem [resolvable:$true] %s182_s27 }
 0x101   :  { %s6502_s11 = scalar_lea.hbm %s7507_s14, 4096 }
 0x102   :  { %p6503_p6 = scmp.ne.s32.totalorder %s7507_s14, %s6502_s11  ;;  %p6506_p7 = scmp.lt.u32.totalorder %s6502_s11, %s7507_s14 }
 0x104   :  { %p6508_p8 = pnand %p6506_p7, %p6503_p6 }
 0x106   :  { %6511 = shalt.err (!%p6508_p8)
}
 0x107   :  { %s6512_s12 = scalar_lea.vmem %s160_s28, 4096  ;;  %p6517_p10 = scmp.lt.s32.totalorder %s160_s28, %s160_s28 }
 0x108   :  { %p6513_p9 = scmp.ne.s32.totalorder %s160_s28, %s6512_s12  ;;  %p6518_p11 = scmp.lt.s32.totalorder %s6512_s12, %s6512_s12 }
 0x10a   :  { %p6519_p12 = por %p6518_p11, %p6517_p10 }
 0x10c   :  { %p6520_p13 = pnand %p6519_p12, %p6513_p9 }
 0x10e   :  { %6523 = shalt.err (!%p6520_p13)
}
 0x10f   :  { %165 = dma.hbm_to_vmem [thread:$0]  %s7507_s14, 4096, %s160_s28, [#allocation20], %s7539_s23, %s7539_s23, %s7538_s19  }
 0x110   :  { %s6524_s25 = scalar_lea.hbm %s7509_s16, 32 }
 0x111   :  { %p6525_p0 = scmp.ne.s32.totalorder %s7509_s16, %s6524_s25  ;;  %p6528_p1 = scmp.lt.u32.totalorder %s6524_s25, %s7509_s16 }
 0x113   :  { %p6530_p2 = pnand %p6528_p1, %p6525_p0 }
 0x115   :  { %6533 = shalt.err (!%p6530_p2)
}
 0x116   :  { %s6534_s2 = scalar_lea.vmem %s183_s27, 32  ;;  %p6539_p4 = scmp.lt.s32.totalorder %s183_s27, %s183_s27 }
 0x117   :  { %p6535_p3 = scmp.ne.s32.totalorder %s183_s27, %s6534_s2  ;;  %p6540_p5 = scmp.lt.s32.totalorder %s6534_s2, %s6534_s2 }
 0x119   :  { %p6541_p6 = por %p6540_p5, %p6539_p4 }
 0x11b   :  { %p6542_p7 = pnand %p6541_p6, %p6535_p3 }
 0x11d   :  { %6545 = shalt.err (!%p6542_p7)
}
 0x11e   :  { %185 = dma.hbm_to_vmem [thread:$0]  %s7509_s16, 32, %s183_s27, [#allocation23]  }
 0x11f   :  { %s6677_s28 = smov [#allocation27]   ;;  %s6546_s11 = scalar_lea.hbm %s7511_s18, 8192 }
 0x120   :  { %s201_s3 = sshll.u32 %s6677_s28, 4  ;;  %p6547_p8 = scmp.ne.s32.totalorder %s7511_s18, %s6546_s11  ;;  %s202_s3 = int_to_ptr.vmem [resolvable:$true] %s201_s3 }
 0x121   :  { %p6550_p9 = scmp.lt.u32.totalorder %s6546_s11, %s7511_s18 }
 0x123   :  { %p6552_p10 = pnand %p6550_p9, %p6547_p8 }
 0x125   :  { %6555 = shalt.err (!%p6552_p10)
}
 0x126   :  { %s6556_s12 = scalar_lea.vmem %s202_s3, 8192  ;;  %p6561_p12 = scmp.lt.s32.totalorder %s202_s3, %s202_s3 }
 0x127   :  { %p6557_p11 = scmp.ne.s32.totalorder %s202_s3, %s6556_s12  ;;  %p6562_p13 = scmp.lt.s32.totalorder %s6556_s12, %s6556_s12 }
 0x129   :  { %p6563_p0 = por %p6562_p13, %p6561_p12 }
 0x12b   :  { %p6564_p1 = pnand %p6563_p0, %p6557_p11 }
 0x12d   :  { %6567 = shalt.err (!%p6564_p1)
}
 0x12e   :  { %s6678_s16 = smov 256   ;;  %s6679_s27 = smov 16  }
 0x12f   :  { %207 = dma.hbm_to_vmem [thread:$0]  %s7511_s18, 8192, %s202_s3, [#allocation26], %s6678_s16, %s6678_s16, %s6679_s27  }
 0x130   :  { %s6680_s24 = smov [#allocation30]   ;;  %s6681_s25 = smov [#allocation31]  }
 0x131   :  { %s223_s4 = sshll.u32 %s6680_s24, 4  ;;  %s236_s1 = sshll.u32 %s6681_s25, 4  ;;  %s224_s4 = int_to_ptr.vmem [resolvable:$true] %s223_s4  ;;  %s237_s1 = int_to_ptr.vmem [resolvable:$true] %s236_s1 }
 0x132   :  { %s6568_s22 = scalar_lea.hbm %s7513_s20, 8192 }
 0x133   :  { %p6569_p2 = scmp.ne.s32.totalorder %s7513_s20, %s6568_s22  ;;  %p6572_p3 = scmp.lt.u32.totalorder %s6568_s22, %s7513_s20 }
 0x135   :  { %p6574_p4 = pnand %p6572_p3, %p6569_p2 }
 0x137   :  { %6577 = shalt.err (!%p6574_p4)
}
 0x138   :  { %s6578_s18 = scalar_lea.vmem %s224_s4, 8192  ;;  %p6583_p6 = scmp.lt.s32.totalorder %s224_s4, %s224_s4 }
 0x139   :  { %p6579_p5 = scmp.ne.s32.totalorder %s224_s4, %s6578_s18  ;;  %p6584_p7 = scmp.lt.s32.totalorder %s6578_s18, %s6578_s18 }
 0x13b   :  { %p6585_p8 = por %p6584_p7, %p6583_p6 }
 0x13d   :  { %p6586_p9 = pnand %p6585_p8, %p6579_p5 }
 0x13f   :  { %6589 = shalt.err (!%p6586_p9)
}
 0x140   :  { %229 = dma.hbm_to_vmem [thread:$0]  %s7513_s20, 8192, %s224_s4, [#allocation29], %s7539_s23, %s7539_s23, %s7538_s19  }
 0x141   :  { %s6590_s5 = scalar_lea.hbm %s7514_s21, 32 }
 0x142   :  { %p6591_p10 = scmp.ne.s32.totalorder %s7514_s21, %s6590_s5  ;;  %p6594_p11 = scmp.lt.u32.totalorder %s6590_s5, %s7514_s21 }
 0x144   :  { %p6596_p12 = pnand %p6594_p11, %p6591_p10 }
 0x146   :  { %6599 = shalt.err (!%p6596_p12)
}
 0x147   :  { %s6600_s16 = scalar_lea.vmem %s237_s1, 32  ;;  %p6605_p0 = scmp.lt.s32.totalorder %s237_s1, %s237_s1 }
 0x148   :  { %p6601_p13 = scmp.ne.s32.totalorder %s237_s1, %s6600_s16  ;;  %p6606_p1 = scmp.lt.s32.totalorder %s6600_s16, %s6600_s16 }
 0x14a   :  { %p6607_p2 = por %p6606_p1, %p6605_p0 }
 0x14c   :  { %p6608_p3 = pnand %p6607_p2, %p6601_p13 }
 0x14e   :  { %6611 = shalt.err (!%p6608_p3)
}
 0x14f   :  { %239 = dma.hbm_to_vmem [thread:$0]  %s7514_s21, 32, %s237_s1, [#allocation32]  }
 0x150   :  { %6634 = dma.done.wait [#allocation5], 256  }
 0x151   :  { %6635 = vsyncadd [#allocation5], 4294967040 }
 0x152   :  { %6636 = dma.done.wait [#allocation8], 12320  }
 0x153   :  { %6637 = vsyncadd [#allocation8], 4294954976 }
 0x154   :  { %6638 = dma.done.wait [#allocation11], 64  }
 0x155   :  { %6639 = vsyncadd [#allocation11], 4294967232 }
 0x156   :  { %6640 = dma.done.wait [#allocation14], 2080  }
 0x157   :  { %6641 = vsyncadd [#allocation14], 4294965216 }
 0x158   :  { %6642 = dma.done.wait [#allocation17], 12320  }
 0x159   :  { %6643 = vsyncadd [#allocation17], 4294954976 }
 0x15a   :  { %6644 = dma.done.wait [#allocation20], 4192  }
 0x15b   :  { %6645 = vsyncadd [#allocation20], 4294963104 }
 0x15c   :  { %6646 = dma.done.wait [#allocation23], 64  }
 0x15d   :  { %6647 = vsyncadd [#allocation23], 4294967232 }
 0x15e   :  { %6648 = dma.done.wait [#allocation26], 8224  }
 0x15f   :  { %6649 = vsyncadd [#allocation26], 4294959072 }
 0x160   :  { %6650 = dma.done.wait [#allocation29], 8256  }
 0x161   :  { %6651 = vsyncadd [#allocation29], 4294959040 }
 0x162   :  { %6652 = dma.done.wait [#allocation32], 32  }
 0x163   :  { %6653 = vsyncadd [#allocation32], 4294967264  ;;  %vm297_vm0 = vcmask 253952   ;;  %v6682_v0 = vmov 0   ;;  %v6683_v1 = vmov 0.0   ;;  %s7541_s27 = sld [smem:[#allocation47_spill]]  ;;  %v532_v49 = vlaneseq }
 0x164   :  { %375 = vmatprep.mubr.bf16.mxu1 %v6682_v0  ;;  %515 = vmatprep.mubr.bf16.mxu0 %v6682_v0  ;;  %300 = vst.msk [vmem:[#allocation2 + $0x9] sm:$0x1] %vm297_vm0, %v6683_v1  ;;  %301 = vst.msk [vmem:[#allocation2 + $0x19] sm:$0x1] %vm297_vm0, %v6683_v1  ;;  %vm302_vm1 = vcmask 261120   ;;  %v295_v6 = vld [vmem:[#allocation4] sm:$0xff] }
 0x165   :  { %298 = vst.msk [vmem:[#allocation2] sm:$0x1] %vm297_vm0, %v6683_v1  ;;  %299 = vst.msk [vmem:[#allocation2 + $0x10] sm:$0x1] %vm297_vm0, %v6683_v1  ;;  %v296_v7 = vld [vmem:[#allocation4 + $0x8] sm:$0xff]  ;;  %vm656_vm2 = vcmp.lt.s32.totalorder %v532_v49, 256 }
 0x166   :  { %303 = vst.msk [vmem:[#allocation2 + $0x1] sm:$0xff] %vm302_vm1, %v295_v6  ;;  %304 = vst.msk [vmem:[#allocation2 + $0x11] sm:$0xff] %vm302_vm1, %v296_v7  ;;  %v5600_v25 = vld [vmem:[#allocation7 + $0x104] ss:$8 sps:$4 sm:$0xff]   ;;  %v5598_v26 = vld [vmem:[#allocation7 + $0x100] ss:$8 sps:$4 sm:$0xff]  }
 0x167   :  { %v5603_v27 = vld [vmem:[#allocation7 + $0x114] ss:$8 sps:$4 sm:$0xff]   ;;  %v5601_v28 = vld [vmem:[#allocation7 + $0x110] ss:$8 sps:$4 sm:$0xff]   ;;  %v5606_v29 = vld [vmem:[#allocation7 + $0x124] ss:$8 sps:$4 sm:$0xff]  }
 0x168   :  { %v5604_v30 = vld [vmem:[#allocation7 + $0x120] ss:$8 sps:$4 sm:$0xff]   ;;  %v5609_v31 = vld [vmem:[#allocation7 + $0x134] ss:$8 sps:$4 sm:$0xff]   ;;  %v5607_v32 = vld [vmem:[#allocation7 + $0x130] ss:$8 sps:$4 sm:$0xff]  }
 0x169   :  { %v5580_v2 = vld [vmem:[%s7541_s27 + $0x24] ss:$8 sps:$4 sm:$0xff]   ;;  %v5582_v3 = vld [vmem:[%s7541_s27 + $0x20] ss:$8 sps:$4 sm:$0xff]   ;;  %v5583_v4 = vld [vmem:[%s7541_s27 + $0x34] ss:$8 sps:$4 sm:$0xff]  }
 0x16a   :  { %343 = vmatprep.subr.bf16.mxu1 %v5580_v2  ;;  %v5585_v5 = vld [vmem:[%s7541_s27 + $0x30] ss:$8 sps:$4 sm:$0xff]   ;;  %v5588_v8 = vld [vmem:[%s7541_s27 + $0x4] ss:$8 sps:$4 sm:$0xff]   ;;  %v5591_v10 = vld [vmem:[%s7541_s27 + $0x40] ss:$8 sps:$4 sm:$0xff]  }
 0x16b   :  { %344 = vmatpush1.bf16.msra.mxu1 %v5582_v3  ;;  %v5589_v9 = vld [vmem:[%s7541_s27 + $0x44] ss:$8 sps:$4 sm:$0xff]   ;;  %v5592_v11 = vld [vmem:[%s7541_s27 + $0x54] ss:$8 sps:$4 sm:$0xff]   ;;  %v5597_v12 = vld [vmem:[%s7541_s27 + $0x50] ss:$8 sps:$4 sm:$0xff]  }
 0x16c   :  { %345 = vmatprep.subr.bf16.mxu1 %v5583_v4  ;;  %483 = vmatprep.subr.bf16.mxu0 %v5589_v9  ;;  %v5586_v14 = vld [vmem:[%s7541_s27] ss:$8 sps:$4 sm:$0xff]   ;;  %v5596_v17 = vld [vmem:[%s7541_s27 + $0x14] ss:$8 sps:$4 sm:$0xff]   ;;  %v5594_v21 = vld [vmem:[%s7541_s27 + $0x10] ss:$8 sps:$4 sm:$0xff]  }
 0x16d   :  { %484 = vmatpush1.bf16.msra.mxu0 %v5591_v10  ;;  %v312_v13 = vld [vmem:[#allocation2 + $0x1] sm:$0xff]  ;;  %v313_v16 = vld [vmem:[#allocation2 + $0x11] sm:$0xff]  ;;  %658 = vst.msk [vmem:[#allocation3] ss:$8 sm:$0x3] %vm656_vm2, %v6683_v1  ;;  %v7081_v62 = vshrl.u32 %v532_v49, 7 }
 0x16e   :  { %485 = vmatprep.subr.bf16.mxu0 %v5592_v11  ;;  %v452_v15 = vld [vmem:[#allocation2 + $0x2] sm:$0xff]  ;;  %v453_v18 = vld [vmem:[#allocation2 + $0x12] sm:$0xff]  ;;  %v314_v19 = vpack.c.bf16 %v313_v16, %v312_v13  ;;  %661 = vst.msk [vmem:[#allocation3 + $0x20] ss:$8 sm:$0x3] %vm656_vm2, %v6683_v1  ;;  %s7542_s20 = sld [smem:[#allocation48_spill]] }
 0x16f   :  { %346 = vmatpush1.bf16.msra.mxu1 %v5585_v5  ;;  %v454_v20 = vpack.c.bf16 %v453_v18, %v452_v15  ;;  %v305_v22 = vld [vmem:[#allocation2] sm:$0xff]  ;;  %v306_v23 = vld [vmem:[#allocation2 + $0x10] sm:$0xff]  ;;  %664 = vst.msk [vmem:[#allocation3 + $0x11] ss:$8 sm:$0x3] %vm656_vm2, %v6683_v1  ;;  %v7090_v3 = vsub.s32 1, %v7081_v62 }
 0x170   :  { %409 = vmatprep.subr.bf16.mxu1 %v5588_v8  ;;  %v307_v24 = vpack.c.bf16 %v306_v23, %v305_v22  ;;  %v5612_v33 = vld [vmem:[#allocation7 + $0x144] ss:$8 sps:$4 sm:$0xff]   ;;  %v5610_v34 = vld [vmem:[#allocation7 + $0x140] ss:$8 sps:$4 sm:$0xff]   ;;  %v5615_v35 = vld [vmem:[#allocation7 + $0x154] ss:$8 sps:$4 sm:$0xff]  }
 0x171   :  { %486 = vmatpush1.bf16.msra.mxu0 %v5597_v12  ;;  %v5613_v36 = vld [vmem:[#allocation7 + $0x150] ss:$8 sps:$4 sm:$0xff]   ;;  %v5618_v37 = vld [vmem:[#allocation7 + $0x164] ss:$8 sps:$4 sm:$0xff]   ;;  %v5616_v38 = vld [vmem:[#allocation7 + $0x160] ss:$8 sps:$4 sm:$0xff]  }
 0x172   :  { %4965 = vmatmul.mubr.msk.bf16.vlgmr.msra.gmra.mrb[0].mxu1 %vm302_vm1, %v314_v19  ;;  %v5621_v39 = vld [vmem:[#allocation7 + $0x174] ss:$8 sps:$4 sm:$0xff]   ;;  %v5619_v40 = vld [vmem:[#allocation7 + $0x170] ss:$8 sps:$4 sm:$0xff]   ;;  %v5624_v41 = vld [vmem:[#allocation7 + $0x184] ss:$8 sps:$4 sm:$0xff]  }
 0x173   :  { %410 = vmatpush1.bf16.msra.mxu1 %v5586_v14  ;;  %441 = vmatprep.mubr.bf16.mxu1 %v6682_v0  ;;  %v5622_v42 = vld [vmem:[#allocation7 + $0x180] ss:$8 sps:$4 sm:$0xff]   ;;  %v5627_v43 = vld [vmem:[#allocation7 + $0x194] ss:$8 sps:$4 sm:$0xff]   ;;  %v5625_v44 = vld [vmem:[#allocation7 + $0x190] ss:$8 sps:$4 sm:$0xff]  }
 0x174   :  { %4979 = vmatmul.mubr.msk.bf16.vlgmr.msra.gmra.mrb[0].mxu0 %vm302_vm1, %v454_v20  ;;  %411 = vmatprep.subr.bf16.mxu1 %v5596_v17  ;;  %v5630_v45 = vld [vmem:[#allocation7 + $0x1a4] ss:$8 sps:$4 sm:$0xff]   ;;  %v5628_v46 = vld [vmem:[#allocation7 + $0x1a0] ss:$8 sps:$4 sm:$0xff]   ;;  %v5633_v47 = vld [vmem:[#allocation7 + $0x1b4] ss:$8 sps:$4 sm:$0xff]  }
 0x175   :  { %v5631_v48 = vld [vmem:[#allocation7 + $0x1b0] ss:$8 sps:$4 sm:$0xff]   ;;  %v5636_v50 = vld [vmem:[#allocation7 + $0x1c4] ss:$8 sps:$4 sm:$0xff]   ;;  %v5634_v51 = vld [vmem:[#allocation7 + $0x1c0] ss:$8 sps:$4 sm:$0xff]  }
 0x176   :  { %667 = vst.msk [vmem:[#allocation3 + $0x31] ss:$8 sm:$0x3] %vm656_vm2, %v6683_v1  ;;  %v5637_v52 = vld [vmem:[#allocation7 + $0x1d0] ss:$8 sps:$4 sm:$0xff]   ;;  %v7084_v0 = vsub.s32 0, %v7081_v62 }
 0x177   :  { %412 = vmatpush1.bf16.msra.mxu1 %v5594_v21  ;;  %v5639_v53 = vld [vmem:[#allocation7 + $0x1d4] ss:$8 sps:$4 sm:$0xff]   ;;  %v5642_v54 = vld [vmem:[#allocation7 + $0x1e4] ss:$8 sps:$4 sm:$0xff]   ;;  %v5640_v55 = vld [vmem:[#allocation7 + $0x1e0] ss:$8 sps:$4 sm:$0xff]  }
 0x178   :  { %955 = vmatprep.subr.bf16.mxu1 %v5600_v25  ;;  %v5645_v56 = vld [vmem:[#allocation7 + $0x1f4] ss:$8 sps:$4 sm:$0xff]   ;;  %v5643_v57 = vld [vmem:[#allocation7 + $0x1f0] ss:$8 sps:$4 sm:$0xff]   ;;  %v5648_v58 = vld [vmem:[#allocation7 + $0x4] ss:$8 sps:$4 sm:$0xff]  }
 0x179   :  { %v530_v2 = vld [vmem:[%s7542_s20] sm:$0x3]  ;;  %vm743_vm7 = vcmask 1046528   ;;  %vm1217_vm8 = vcmask 1045504   ;;  %s7543_s23 = sld [smem:[#allocation46_spill]]  ;;  %vm6685_vm13 = vmmov 0  }
 0x17a   :  { %v535_v4 = vrot.slane %v530_v2, %v7084_v0  ;;  %v539_v6 = vrot.slane %v530_v2, %v7090_v3  ;;  %vm2416_vm14 = vcmask 523264   ;;  %vm2537_vm15 = vcmask 1043456   ;;  %s6686_s24 = smov [#allocation33]  }
 0x17b   :  { %vm2509_vm0 = vcmask 64512   ;;  %vm4662_vm2 = vcmask 1041408   ;;  %s4939_s4 = sshll.u32 %s6686_s24, 4  ;;  %s4940_s4 = int_to_ptr.vmem [resolvable:$true] %s4939_s4 }
 0x17c   :  { %s6612_s25 = scalar_lea.vmem %s4940_s4, 32  ;;  %p6617_p5 = scmp.lt.s32.totalorder %s4940_s4, %s4940_s4 }
 0x17d   :  { %p6613_p4 = scmp.ne.s32.totalorder %s4940_s4, %s6612_s25  ;;  %p6618_p6 = scmp.lt.s32.totalorder %s6612_s25, %s6612_s25 }
 0x17e   :  { %4970 = vmatmul.mubr.msk.bf16.vlgmr.msra.gmra.mrb[0].mxu1 %vm302_vm1, %v307_v24  ;;  %vm4657_vm1 = vcmask 1041409  }
 0x17f   :  { %956 = vmatpush1.bf16.msra.mxu1 %v5598_v26  ;;  %p6619_p7 = por %p6618_p6, %p6617_p5 }
 0x180   :  { %957 = vmatprep.subr.bf16.mxu1 %v5603_v27 }
 0x181   :  { %p6620_p8 = pnand %p6619_p7, %p6613_p4 }
 0x183   :  { %958 = vmatpush1.bf16.msra.mxu1 %v5601_v28 }
 0x184   :  { %959 = vmatprep.subr.bf16.mxu1 %v5606_v29 }
 0x187   :  { %960 = vmatpush1.bf16.msra.mxu1 %v5604_v30 }
 0x188   :  { %961 = vmatprep.subr.bf16.mxu1 %v5609_v31 }
 0x18b   :  { %962 = vmatpush1.bf16.msra.mxu1 %v5607_v32 }
 0x18c   :  { %963 = vmatprep.subr.bf16.mxu1 %v5612_v33 }
 0x18f   :  { %964 = vmatpush1.bf16.msra.mxu1 %v5610_v34 }
 0x190   :  { %965 = vmatprep.subr.bf16.mxu1 %v5615_v35 }
 0x193   :  { %966 = vmatpush1.bf16.msra.mxu1 %v5613_v36 }
 0x194   :  { %967 = vmatprep.subr.bf16.mxu1 %v5618_v37 }
 0x197   :  { %968 = vmatpush1.bf16.msra.mxu1 %v5616_v38 }
 0x198   :  { %969 = vmatprep.subr.bf16.mxu1 %v5621_v39 }
 0x19b   :  { %970 = vmatpush1.bf16.msra.mxu1 %v5619_v40 }
 0x19c   :  { %971 = vmatprep.subr.bf16.mxu1 %v5624_v41 }
 0x19f   :  { %972 = vmatpush1.bf16.msra.mxu1 %v5622_v42 }
 0x1a0   :  { %973 = vmatprep.subr.bf16.mxu1 %v5627_v43 }
 0x1a3   :  { %974 = vmatpush1.bf16.msra.mxu1 %v5625_v44 }
 0x1a4   :  { %975 = vmatprep.subr.bf16.mxu1 %v5630_v45 }
 0x1a7   :  { %976 = vmatpush1.bf16.msra.mxu1 %v5628_v46 }
 0x1a8   :  { %977 = vmatprep.subr.bf16.mxu1 %v5633_v47 }
 0x1ab   :  { %978 = vmatpush1.bf16.msra.mxu1 %v5631_v48 }
 0x1ac   :  { %979 = vmatprep.subr.bf16.mxu1 %v5636_v50 }
 0x1af   :  { %980 = vmatpush1.bf16.msra.mxu1 %v5634_v51 }
 0x1b0   :  { %981 = vmatprep.subr.bf16.mxu1 %v5639_v53 }
 0x1b3   :  { %982 = vmatpush1.bf16.msra.mxu1 %v5637_v52 }
 0x1b4   :  { %983 = vmatprep.subr.bf16.mxu1 %v5642_v54 }
 0x1b7   :  { %984 = vmatpush1.bf16.msra.mxu1 %v5640_v55 }
 0x1b8   :  { %985 = vmatprep.subr.bf16.mxu1 %v5645_v56 }
 0x1bb   :  { %986 = vmatpush1.bf16.msra.mxu1 %v5643_v57 }
 0x1bc   :  { %1158 = vmatprep.subr.bf16.mxu1 %v5648_v58 }
 0x247   :  { %v517_v59 = vpop.f32.mrb[0].mxu0 }
 0x248   :  { %v519_v60 = vpop.f32.mrb[1].mxu0 }
 0x249   :  { %v521_v61 = vpop.f32.mrb[2].mxu0 }
 0x24a   :  { %v523_v63 = vpop.f32.mrb[3].mxu0 }
 0x251   :  { %v443_v5 = vpop.f32.mrb[0].mxu1 }
 0x252   :  { %v5515_v7 = vadd.f32 %v517_v59, %v443_v5  ;;  %v445_v8 = vpop.f32.mrb[1].mxu1 }
 0x253   :  { %v5516_v9 = vadd.f32 %v519_v60, %v445_v8  ;;  %v447_v10 = vpop.f32.mrb[2].mxu1 }
 0x254   :  { %v7094_v11 = vadd.f32 %v5515_v7, %v535_v4  ;;  %v5517_v12 = vadd.f32 %v521_v61, %v447_v10  ;;  %v449_v13 = vpop.f32.mrb[3].mxu1 }
 0x255   :  { %v7096_v14 = vadd.f32 %v5516_v9, %v539_v6  ;;  %v5518_v15 = vadd.f32 %v523_v63, %v449_v13 }
 0x256   :  { %v7099_v16 = vmul.f32 0.70710677, %v7094_v11  ;;  %v7101_v17 = vadd.f32 %v5517_v12, %v535_v4 }
 0x257   :  { %v7104_v18 = vmul.f32 0.70710677, %v7096_v14  ;;  %v7110_v21 = vadd.f32 %v5518_v15, %v539_v6 }
 0x258   :  { %v562_v19 = vand.u32 2147483647, %v7099_v16  ;;  %v7108_v20 = vmul.f32 0.70710677, %v7101_v17  ;;  %vm554_vm3 = vcmp.ge.f32.partialorder %v7099_v16, 0.0 }
 0x259   :  { %v563_v22 = vand.u32 2147483647, %v7104_v18  ;;  %v7115_v27 = vmul.f32 0.70710677, %v7110_v21  ;;  %vm555_vm4 = vcmp.ge.f32.partialorder %v7104_v18, 0.0  ;;  %v546_v18 = vmul.f32 0.5, %v7094_v11 }
 0x25a   :  { %v566_v23 = vmul.f32 0.3275911, %v562_v19  ;;  %v564_v25 = vand.u32 2147483647, %v7108_v20  ;;  %v618_v34 = vsub.f32 0.0, %v562_v19  ;;  %vm556_vm5 = vcmp.ge.f32.partialorder %v7108_v20, 0.0 }
 0x25b   :  { %v567_v24 = vmul.f32 0.3275911, %v563_v22  ;;  %v565_v30 = vand.u32 2147483647, %v7115_v27  ;;  %v619_v35 = vsub.f32 0.0, %v563_v22  ;;  %vm557_vm6 = vcmp.ge.f32.partialorder %v7115_v27, 0.0 }
 0x25c   :  { %v570_v26 = vadd.f32 1.0, %v566_v23  ;;  %v568_v29 = vmul.f32 0.3275911, %v564_v25  ;;  %v622_v37 = vmul.f32 %v618_v34, %v562_v19  ;;  %v620_v38 = vsub.f32 0.0, %v564_v25 }
 0x25d   :  { %v571_v28 = vadd.f32 1.0, %v567_v24  ;;  %v569_v32 = vmul.f32 0.3275911, %v565_v30  ;;  %v623_v41 = vmul.f32 %v619_v35, %v563_v22  ;;  %v621_v43 = vsub.f32 0.0, %v565_v30 }
 0x25e   :  { %6142 = vrcp.f32 %v570_v26  ;;  %v572_v31 = vadd.f32 1.0, %v568_v29  ;;  %v626_v46 = vmul.f32 1.442695, %v622_v37  ;;  %v624_v48 = vmul.f32 %v620_v38, %v564_v25 }
 0x25f   :  { %6144 = vrcp.f32 %v571_v28  ;;  %v573_v33 = vadd.f32 1.0, %v569_v32  ;;  %v628_v50 = vmul.f32 1.442695, %v623_v41  ;;  %v625_v54 = vmul.f32 %v621_v43, %v565_v30 }
 0x260   :  { %6146 = vrcp.f32 %v572_v31  ;;  %v630_v59 = vmul.f32 1.442695, %v624_v48  ;;  %v6684_v41 = vmov -1.0   ;;  %v548_v11 = vmul.f32 0.5, %v7101_v17 }
 0x261   :  { %6148 = vrcp.f32 %v573_v33  ;;  %v632_v4 = vmul.f32 1.442695, %v625_v54 }
 0x262   :  { %6150 = vpow2.f32 %v626_v46 }
 0x263   :  { %6152 = vpow2.f32 %v628_v50  ;;  %v547_v50 = vmul.f32 0.5, %v7096_v14  ;;  %v549_v14 = vmul.f32 0.5, %v7110_v21 }
 0x264   :  { %6154 = vpow2.f32 %v630_v59 }
 0x265   :  { %6156 = vpow2.f32 %v632_v4 }
 0x268   :  { %v6143_v36 = vpop.eup %6142 }
 0x269   :  { %v6145_v39 = vpop.eup %6144  ;;  %v582_v40 = vmul.f32 1.0614054, %v6143_v36 }
 0x26a   :  { %v583_v42 = vmul.f32 1.0614054, %v6145_v39  ;;  %v6147_v45 = vpop.eup %6146 }
 0x26b   :  { %v586_v44 = vadd.f32 -1.4531521, %v582_v40  ;;  %v584_v51 = vmul.f32 1.0614054, %v6147_v45  ;;  %v6149_v52 = vpop.eup %6148 }
 0x26c   :  { %v587_v47 = vadd.f32 -1.4531521, %v583_v42  ;;  %v585_v57 = vmul.f32 1.0614054, %v6149_v52  ;;  %v6151_v28 = vpop.eup %6150  ;;  %v559_v42 = vsel %vm555_vm4, 1.0, %v6684_v41 }
 0x26d   :  { %v590_v49 = vmul.f32 %v6143_v36, %v586_v44  ;;  %v588_v56 = vadd.f32 -1.4531521, %v584_v51  ;;  %v6153_v30 = vpop.eup %6152 }
 0x26e   :  { %v591_v53 = vmul.f32 %v6145_v39, %v587_v47  ;;  %v589_v63 = vadd.f32 -1.4531521, %v585_v57  ;;  %v6155_v40 = vpop.eup %6154 }
 0x26f   :  { %v594_v55 = vadd.f32 1.4214138, %v590_v49  ;;  %v592_v61 = vmul.f32 %v6147_v45, %v588_v56  ;;  %v6157_v46 = vpop.eup %6156 }
 0x270   :  { %v595_v58 = vadd.f32 1.4214138, %v591_v53  ;;  %v593_v7 = vmul.f32 %v6149_v52, %v589_v63  ;;  %v560_v53 = vsel %vm556_vm5, 1.0, %v6684_v41 }
 0x271   :  { %v598_v60 = vmul.f32 %v6143_v36, %v594_v55  ;;  %v596_v6 = vadd.f32 1.4214138, %v592_v61 }
 0x272   :  { %v599_v2 = vmul.f32 %v6145_v39, %v595_v58  ;;  %v597_v12 = vadd.f32 1.4214138, %v593_v7 }
 0x273   :  { %v602_v5 = vadd.f32 -0.28449672, %v598_v60  ;;  %v600_v10 = vmul.f32 %v6147_v45, %v596_v6 }
 0x274   :  { %v603_v8 = vadd.f32 -0.28449672, %v599_v2  ;;  %v601_v22 = vmul.f32 %v6149_v52, %v597_v12 }
 0x275   :  { %v606_v9 = vmul.f32 %v6143_v36, %v602_v5  ;;  %v604_v19 = vadd.f32 -0.28449672, %v600_v10 }
 0x276   :  { %v607_v13 = vmul.f32 %v6145_v39, %v603_v8  ;;  %v605_v26 = vadd.f32 -0.28449672, %v601_v22 }
 0x277   :  { %v610_v15 = vadd.f32 0.2548296, %v606_v9  ;;  %v608_v25 = vmul.f32 %v6147_v45, %v604_v19 }
 0x278   :  { %v611_v23 = vadd.f32 0.2548296, %v607_v13  ;;  %v609_v33 = vmul.f32 %v6149_v52, %v605_v26 }
 0x279   :  { %v614_v24 = vmul.f32 %v6143_v36, %v610_v15  ;;  %v612_v32 = vadd.f32 0.2548296, %v608_v25  ;;  %v558_v36 = vsel %vm554_vm3, 1.0, %v6684_v41 }
 0x27a   :  { %v615_v29 = vmul.f32 %v6145_v39, %v611_v23  ;;  %v613_v38 = vadd.f32 0.2548296, %v609_v33 }
 0x27b   :  { %v634_v31 = vmul.f32 %v6151_v28, %v614_v24  ;;  %v616_v37 = vmul.f32 %v6147_v45, %v612_v32  ;;  %v5646_v32 = vld [vmem:[#allocation7] ss:$8 sps:$4 sm:$0xff]  }
 0x27c   :  { %v635_v34 = vmul.f32 %v6153_v30, %v615_v29  ;;  %v617_v39 = vmul.f32 %v6149_v52, %v613_v38  ;;  %v561_v52 = vsel %vm557_vm6, 1.0, %v6684_v41 }
 0x27d   :  { %v638_v35 = vsub.f32 1.0, %v634_v31  ;;  %v636_v16 = vmul.f32 %v6155_v40, %v616_v37  ;;  %v5651_v37 = vld [vmem:[#allocation7 + $0x14] ss:$8 sps:$4 sm:$0xff]   ;;  %v5649_v40 = vld [vmem:[#allocation7 + $0x10] ss:$8 sps:$4 sm:$0xff]  }
 0x27e   :  { %v639_v43 = vsub.f32 1.0, %v635_v34  ;;  %v637_v45 = vmul.f32 %v6157_v46, %v617_v39  ;;  %v5658_v39 = vld [vmem:[#allocation7 + $0x40] ss:$8 sps:$4 sm:$0xff]   ;;  %v5663_v46 = vld [vmem:[#allocation7 + $0x54] ss:$8 sps:$4 sm:$0xff]  }
 0x27f   :  { %v642_v44 = vmul.f32 %v638_v35, %v558_v36  ;;  %v640_v49 = vsub.f32 1.0, %v636_v16  ;;  %v5654_v36 = vld [vmem:[#allocation7 + $0x24] ss:$8 sps:$4 sm:$0xff]  }
 0x280   :  { %v643_v47 = vmul.f32 %v639_v43, %v559_v42  ;;  %v641_v56 = vsub.f32 1.0, %v637_v45  ;;  %v5652_v42 = vld [vmem:[#allocation7 + $0x20] ss:$8 sps:$4 sm:$0xff]   ;;  %v5657_v43 = vld [vmem:[#allocation7 + $0x34] ss:$8 sps:$4 sm:$0xff]  }
 0x281   :  { %v646_v48 = vadd.f32 1.0, %v642_v44  ;;  %v644_v55 = vmul.f32 %v640_v49, %v560_v53  ;;  %v5655_v44 = vld [vmem:[#allocation7 + $0x30] ss:$8 sps:$4 sm:$0xff]   ;;  %v5660_v16 = vld [vmem:[#allocation7 + $0x44] ss:$8 sps:$4 sm:$0xff]  }
 0x282   :  { %v647_v51 = vadd.f32 1.0, %v643_v47  ;;  %v645_v59 = vmul.f32 %v641_v56, %v561_v52  ;;  %v5666_v47 = vld [vmem:[#allocation7 + $0x64] ss:$8 sps:$4 sm:$0xff]   ;;  %v5669_v49 = vld [vmem:[#allocation7 + $0x74] ss:$8 sps:$4 sm:$0xff]  }
 0x283   :  { %v650_v54 = vmul.f32 %v646_v48, %v546_v18  ;;  %v648_v58 = vadd.f32 1.0, %v644_v55  ;;  %v5661_v18 = vld [vmem:[#allocation7 + $0x50] ss:$8 sps:$4 sm:$0xff]   ;;  %v5664_v48 = vld [vmem:[#allocation7 + $0x60] ss:$8 sps:$4 sm:$0xff]  }
 0x284   :  { %v651_v20 = vmul.f32 %v647_v51, %v547_v50  ;;  %v649_v61 = vadd.f32 1.0, %v645_v59  ;;  %v5667_v45 = vld [vmem:[#allocation7 + $0x70] ss:$8 sps:$4 sm:$0xff]   ;;  %v5672_v50 = vld [vmem:[#allocation7 + $0x84] ss:$8 sps:$4 sm:$0xff]  }
 0x285   :  { %v673_v57 = vrot.slane %v650_v54, 7  ;;  %v652_v27 = vmul.f32 %v648_v58, %v548_v11  ;;  %v5670_v51 = vld [vmem:[#allocation7 + $0x80] ss:$8 sps:$4 sm:$0xff]   ;;  %v5675_v53 = vld [vmem:[#allocation7 + $0x94] ss:$8 sps:$4 sm:$0xff]  }
 0x286   :  { %v674_v60 = vrot.slane %v651_v20, 7  ;;  %v653_v2 = vmul.f32 %v649_v61, %v549_v14  ;;  %v5673_v54 = vld [vmem:[#allocation7 + $0x90] ss:$8 sps:$4 sm:$0xff]   ;;  %v5678_v55 = vld [vmem:[#allocation7 + $0xa4] ss:$8 sps:$4 sm:$0xff]  }
 0x287   :  { %681 = vst [vmem:[#allocation3] sm:$0xfe] %v673_v57  ;;  %683 = vst [vmem:[#allocation3 + $0x10] sm:$0x1] %v673_v57  ;;  %v675_v63 = vrot.slane %v652_v27, 7 }
 0x288   :  { %682 = vst [vmem:[#allocation3 + $0x8] sm:$0xfe] %v674_v60  ;;  %684 = vst [vmem:[#allocation3 + $0x18] sm:$0x1] %v674_v60  ;;  %v676_v4 = vrot.slane %v653_v2, 7 }
 0x289   :  { %685 = vst [vmem:[#allocation3 + $0x20] sm:$0xfe] %v675_v63  ;;  %687 = vst [vmem:[#allocation3 + $0x30] sm:$0x1] %v675_v63  ;;  %v5676_v56 = vld [vmem:[#allocation7 + $0xa0] ss:$8 sps:$4 sm:$0xff]  }
 0x28a   :  { %686 = vst [vmem:[#allocation3 + $0x28] sm:$0xfe] %v676_v4  ;;  %688 = vst [vmem:[#allocation3 + $0x38] sm:$0x1] %v676_v4  ;;  %v5681_v20 = vld [vmem:[#allocation7 + $0xb4] ss:$8 sps:$4 sm:$0xff]  }
 0x28b   :  { %v5679_v52 = vld [vmem:[#allocation7 + $0xb0] ss:$8 sps:$4 sm:$0xff]   ;;  %v5684_v57 = vld [vmem:[#allocation7 + $0xc4] ss:$8 sps:$4 sm:$0xff]   ;;  %v5682_v11 = vld [vmem:[#allocation7 + $0xc0] ss:$8 sps:$4 sm:$0xff]  }
 0x28c   :  { %v5687_v58 = vld [vmem:[#allocation7 + $0xd4] ss:$8 sps:$4 sm:$0xff]   ;;  %v5685_v59 = vld [vmem:[#allocation7 + $0xd0] ss:$8 sps:$4 sm:$0xff]   ;;  %v5690_v60 = vld [vmem:[#allocation7 + $0xe4] ss:$8 sps:$4 sm:$0xff]  }
 0x28d   :  { %v5688_v27 = vld [vmem:[#allocation7 + $0xe0] ss:$8 sps:$4 sm:$0xff]   ;;  %v5693_v63 = vld [vmem:[#allocation7 + $0xf4] ss:$8 sps:$4 sm:$0xff]  }
 0x28e   :  { %v727_v6 = vld [vmem:[#allocation3] sm:$0xfe]  ;;  %v729_v7 = vld [vmem:[#allocation3 + $0x10] sm:$0x1] }
 0x28f   :  { %v728_v5 = vld [vmem:[#allocation3 + $0x8] sm:$0xfe]  ;;  %v730_v17 = vld [vmem:[#allocation3 + $0x18] sm:$0x1]  ;;  %v744_v22 = vrot.slane %v727_v6, 1  ;;  %v745_v23 = vrot.slane %v729_v7, 1 }
 0x290   :  { %v731_v8 = vld [vmem:[#allocation3 + $0x20] sm:$0xfe]  ;;  %v733_v9 = vld [vmem:[#allocation3 + $0x30] sm:$0x1]  ;;  %v747_v10 = vrot.slane %v728_v5, 1  ;;  %v748_v12 = vrot.slane %v730_v17, 1 }
 0x291   :  { %v750_v21 = vrot.slane %v731_v8, 1  ;;  %v751_v13 = vrot.slane %v733_v9, 1  ;;  %v732_v15 = vld [vmem:[#allocation3 + $0x28] sm:$0xfe]  ;;  %v734_v19 = vld [vmem:[#allocation3 + $0x38] sm:$0x1]  ;;  %v746_v33 = vsel %vm743_vm7, %v744_v22, %v745_v23 }
 0x292   :  { %v753_v24 = vrot.slane %v732_v15, 1  ;;  %v754_v25 = vrot.slane %v734_v19, 1  ;;  %v749_v28 = vsel %vm743_vm7, %v747_v10, %v748_v12  ;;  %v692_v30 = vld [vmem:[#allocation3 + $0x28] sm:$0xff]  ;;  %v1208_v61 = vld [vmem:[#allocation3 + $0x38] sm:$0x3]  ;;  %v691_v10 = vld [vmem:[#allocation3 + $0x20] sm:$0xff] }
 0x293   :  { %v752_v26 = vsel %vm743_vm7, %v750_v21, %v751_v13  ;;  %v690_v35 = vld [vmem:[#allocation3 + $0x8] sm:$0xff]  ;;  %v1204_v4 = vld [vmem:[#allocation3 + $0x18] sm:$0x3]  ;;  %v1228_v17 = vrot.slane %v1208_v61, 2  ;;  %v5696_v7 = vld [vmem:[#allocation7 + $0x204] ss:$8 sps:$4 sm:$0xff]  }
 0x294   :  { %v755_v29 = vsel %vm743_vm7, %v753_v24, %v754_v25  ;;  %v760_v34 = vpack.c.bf16 %v752_v26, %v746_v33  ;;  %v694_v38 = vpack.c.bf16 %v692_v30, %v690_v35  ;;  %v1206_v14 = vld [vmem:[#allocation3 + $0x28] sm:$0xfc]  ;;  %v1222_v9 = vrot.slane %v1204_v4, 2  ;;  %v689_v21 = vld [vmem:[#allocation3] sm:$0xff]  ;;  %v5694_v13 = vld [vmem:[#allocation7 + $0x200] ss:$8 sps:$4 sm:$0xff]  }
 0x295   :  { %v761_v31 = vpack.c.bf16 %v755_v29, %v749_v28  ;;  %v1202_v2 = vld [vmem:[#allocation3 + $0x8] sm:$0xfc]  ;;  %v1227_v5 = vrot.slane %v1206_v14, 2  ;;  %v693_v15 = vpack.c.bf16 %v691_v10, %v689_v21  ;;  %v5702_v25 = vld [vmem:[#allocation7 + $0x224] ss:$8 sps:$4 sm:$0xff]  }
 0x296   :  { %v5691_v6 = vld [vmem:[#allocation7 + $0xf0] ss:$8 sps:$4 sm:$0xff]   ;;  %v1221_v8 = vrot.slane %v1202_v2, 2  ;;  %v5699_v22 = vld [vmem:[#allocation7 + $0x214] ss:$8 sps:$4 sm:$0xff]  }
 0x297   :  { %987 = vmatprep.mubr.bf16.mxu1 %v761_v31  ;;  %v1229_v12 = vsel %vm1217_vm8, %v1227_v5, %v1228_v17  ;;  %v5697_v24 = vld [vmem:[#allocation7 + $0x210] ss:$8 sps:$4 sm:$0xff]   ;;  %v5700_v26 = vld [vmem:[#allocation7 + $0x220] ss:$8 sps:$4 sm:$0xff]   ;;  %v5705_v28 = vld [vmem:[#allocation7 + $0x234] ss:$8 sps:$4 sm:$0xff]  }
 0x298   :  { %988 = vmatmul.mubr.bf16.vlgmr.msra.gmra.mrb[4].mxu1 %v760_v34  ;;  %v1223_v19 = vsel %vm1217_vm8, %v1221_v8, %v1222_v9  ;;  %v5703_v29 = vld [vmem:[#allocation7 + $0x230] ss:$8 sps:$4 sm:$0xff]   ;;  %v5708_v30 = vld [vmem:[#allocation7 + $0x244] ss:$8 sps:$4 sm:$0xff]   ;;  %v5706_v31 = vld [vmem:[#allocation7 + $0x240] ss:$8 sps:$4 sm:$0xff]  }
 0x299   :  { %1159 = vmatpush1.bf16.msra.mxu1 %v5646_v32  ;;  %1190 = vmatprep.mubr.bf16.mxu1 %v694_v38  ;;  %v1235_v23 = vpack.c.bf16 %v1229_v12, %v1223_v19  ;;  %v5711_v32 = vld [vmem:[#allocation7 + $0x254] ss:$8 sps:$4 sm:$0xff]   ;;  %v5709_v33 = vld [vmem:[#allocation7 + $0x250] ss:$8 sps:$4 sm:$0xff]   ;;  %v5714_v34 = vld [vmem:[#allocation7 + $0x264] ss:$8 sps:$4 sm:$0xff]  }
 0x29a   :  { %1160 = vmatprep.subr.bf16.mxu1 %v5651_v37  ;;  %v5712_v35 = vld [vmem:[#allocation7 + $0x260] ss:$8 sps:$4 sm:$0xff]   ;;  %v5717_v37 = vld [vmem:[#allocation7 + $0x274] ss:$8 sps:$4 sm:$0xff]   ;;  %v5715_v38 = vld [vmem:[#allocation7 + $0x270] ss:$8 sps:$4 sm:$0xff]  }
 0x29b   :  { %v1476_v14 = vld [vmem:[#allocation9] sm:$0x3] }
 0x29c   :  { %v1481_v61 = vrot.slane %v1476_v14, %v7084_v0 }
 0x29d   :  { %1161 = vmatpush1.bf16.msra.mxu1 %v5649_v40  ;;  %v5720_v40 = vld [vmem:[#allocation7 + $0x284] ss:$8 sps:$4 sm:$0xff]  }
 0x29e   :  { %1162 = vmatprep.subr.bf16.mxu1 %v5654_v36  ;;  %v5718_v36 = vld [vmem:[#allocation7 + $0x280] ss:$8 sps:$4 sm:$0xff]  }
 0x2a1   :  { %1163 = vmatpush1.bf16.msra.mxu1 %v5652_v42  ;;  %v5723_v42 = vld [vmem:[#allocation7 + $0x294] ss:$8 sps:$4 sm:$0xff]  }
 0x2a2   :  { %1164 = vmatprep.subr.bf16.mxu1 %v5657_v43  ;;  %v5721_v43 = vld [vmem:[#allocation7 + $0x290] ss:$8 sps:$4 sm:$0xff]  }
 0x2a5   :  { %1165 = vmatpush1.bf16.msra.mxu1 %v5655_v44  ;;  %v5726_v44 = vld [vmem:[#allocation7 + $0x2a4] ss:$8 sps:$4 sm:$0xff]  }
 0x2a6   :  { %1166 = vmatprep.subr.bf16.mxu1 %v5660_v16  ;;  %v5724_v16 = vld [vmem:[#allocation7 + $0x2a0] ss:$8 sps:$4 sm:$0xff]  }
 0x2a9   :  { %1167 = vmatpush1.bf16.msra.mxu1 %v5658_v39  ;;  %v5729_v39 = vld [vmem:[#allocation7 + $0x2b4] ss:$8 sps:$4 sm:$0xff]  }
 0x2aa   :  { %1168 = vmatprep.subr.bf16.mxu1 %v5663_v46  ;;  %v5727_v46 = vld [vmem:[#allocation7 + $0x2b0] ss:$8 sps:$4 sm:$0xff]  }
 0x2ad   :  { %1169 = vmatpush1.bf16.msra.mxu1 %v5661_v18  ;;  %v5732_v18 = vld [vmem:[#allocation7 + $0x2c4] ss:$8 sps:$4 sm:$0xff]  }
 0x2ae   :  { %1170 = vmatprep.subr.bf16.mxu1 %v5666_v47  ;;  %v5730_v47 = vld [vmem:[#allocation7 + $0x2c0] ss:$8 sps:$4 sm:$0xff]  }
 0x2b1   :  { %1171 = vmatpush1.bf16.msra.mxu1 %v5664_v48  ;;  %v5735_v48 = vld [vmem:[#allocation7 + $0x2d4] ss:$8 sps:$4 sm:$0xff]  }
 0x2b2   :  { %1172 = vmatprep.subr.bf16.mxu1 %v5669_v49  ;;  %v5733_v49 = vld [vmem:[#allocation7 + $0x2d0] ss:$8 sps:$4 sm:$0xff]  }
 0x2b5   :  { %1173 = vmatpush1.bf16.msra.mxu1 %v5667_v45  ;;  %v5738_v45 = vld [vmem:[#allocation7 + $0x2e4] ss:$8 sps:$4 sm:$0xff]  }
 0x2b6   :  { %1174 = vmatprep.subr.bf16.mxu1 %v5672_v50  ;;  %v1205_v50 = vld [vmem:[#allocation3 + $0x20] sm:$0xfc] }
 0x2b9   :  { %1175 = vmatpush1.bf16.msra.mxu1 %v5670_v51  ;;  %v1207_v51 = vld [vmem:[#allocation3 + $0x30] sm:$0x3] }
 0x2ba   :  { %1176 = vmatprep.subr.bf16.mxu1 %v5675_v53  ;;  %v5736_v53 = vld [vmem:[#allocation7 + $0x2e0] ss:$8 sps:$4 sm:$0xff]  }
 0x2bd   :  { %1177 = vmatpush1.bf16.msra.mxu1 %v5673_v54  ;;  %v5741_v54 = vld [vmem:[#allocation7 + $0x2f4] ss:$8 sps:$4 sm:$0xff]  }
 0x2be   :  { %1178 = vmatprep.subr.bf16.mxu1 %v5678_v55  ;;  %v1201_v55 = vld [vmem:[#allocation3] sm:$0xfc] }
 0x2c1   :  { %1179 = vmatpush1.bf16.msra.mxu1 %v5676_v56  ;;  %v1203_v56 = vld [vmem:[#allocation3 + $0x10] sm:$0x3] }
 0x2c2   :  { %1180 = vmatprep.subr.bf16.mxu1 %v5681_v20  ;;  %v1224_v20 = vrot.slane %v1205_v50, 2 }
 0x2c5   :  { %1181 = vmatpush1.bf16.msra.mxu1 %v5679_v52  ;;  %v1225_v52 = vrot.slane %v1207_v51, 2 }
 0x2c6   :  { %1182 = vmatprep.subr.bf16.mxu1 %v5684_v57  ;;  %v5739_v57 = vld [vmem:[#allocation7 + $0x2f0] ss:$8 sps:$4 sm:$0xff]  }
 0x2c9   :  { %1183 = vmatpush1.bf16.msra.mxu1 %v5682_v11  ;;  %v1218_v11 = vrot.slane %v1201_v55, 2 }
 0x2ca   :  { %1184 = vmatprep.subr.bf16.mxu1 %v5687_v58  ;;  %v1219_v58 = vrot.slane %v1203_v56, 2 }
 0x2cd   :  { %1185 = vmatpush1.bf16.msra.mxu1 %v5685_v59  ;;  %v1226_v59 = vsel %vm1217_vm8, %v1224_v20, %v1225_v52 }
 0x2ce   :  { %1186 = vmatprep.subr.bf16.mxu1 %v5690_v60  ;;  %v1220_v60 = vsel %vm1217_vm8, %v1218_v11, %v1219_v58 }
 0x2d1   :  { %1187 = vmatpush1.bf16.msra.mxu1 %v5688_v27  ;;  %v1234_v27 = vpack.c.bf16 %v1226_v59, %v1220_v60 }
 0x2d2   :  { %1188 = vmatprep.subr.bf16.mxu1 %v5693_v63  ;;  %v1485_v63 = vrot.slane %v1476_v14, %v7090_v3 }
 0x2d5   :  { %1189 = vmatpush1.bf16.msra.mxu1 %v5691_v6 }
 0x2d6   :  { %1429 = vmatprep.subr.bf16.mxu1 %v5696_v7 }
 0x2d8   :  { %1191 = vmatmul.mubr.bf16.vlgmr.msra.gmra.mrb[4].mxu1 %v693_v15 }
 0x2d9   :  { %1430 = vmatpush1.bf16.msra.mxu1 %v5694_v13  ;;  %1461 = vmatprep.mubr.bf16.mxu1 %v1235_v23 }
 0x2da   :  { %1431 = vmatprep.subr.bf16.mxu1 %v5699_v22 }
 0x2dd   :  { %1432 = vmatpush1.bf16.msra.mxu1 %v5697_v24 }
 0x2de   :  { %1433 = vmatprep.subr.bf16.mxu1 %v5702_v25 }
 0x2e1   :  { %1434 = vmatpush1.bf16.msra.mxu1 %v5700_v26 }
 0x2e2   :  { %1435 = vmatprep.subr.bf16.mxu1 %v5705_v28 }
 0x2e5   :  { %1436 = vmatpush1.bf16.msra.mxu1 %v5703_v29 }
 0x2e6   :  { %1437 = vmatprep.subr.bf16.mxu1 %v5708_v30 }
 0x2e9   :  { %1438 = vmatpush1.bf16.msra.mxu1 %v5706_v31 }
 0x2ea   :  { %1439 = vmatprep.subr.bf16.mxu1 %v5711_v32 }
 0x2ed   :  { %1440 = vmatpush1.bf16.msra.mxu1 %v5709_v33 }
 0x2ee   :  { %1441 = vmatprep.subr.bf16.mxu1 %v5714_v34 }
 0x2f1   :  { %1442 = vmatpush1.bf16.msra.mxu1 %v5712_v35 }
 0x2f2   :  { %1443 = vmatprep.subr.bf16.mxu1 %v5717_v37 }
 0x2f5   :  { %1444 = vmatpush1.bf16.msra.mxu1 %v5715_v38 }
 0x2f6   :  { %1445 = vmatprep.subr.bf16.mxu1 %v5720_v40 }
 0x2f9   :  { %1446 = vmatpush1.bf16.msra.mxu1 %v5718_v36 }
 0x2fa   :  { %1447 = vmatprep.subr.bf16.mxu1 %v5723_v42 }
 0x2fd   :  { %1448 = vmatpush1.bf16.msra.mxu1 %v5721_v43 }
 0x2fe   :  { %1449 = vmatprep.subr.bf16.mxu1 %v5726_v44 }
 0x301   :  { %1450 = vmatpush1.bf16.msra.mxu1 %v5724_v16 }
 0x302   :  { %1451 = vmatprep.subr.bf16.mxu1 %v5729_v39 }
 0x305   :  { %1452 = vmatpush1.bf16.msra.mxu1 %v5727_v46 }
 0x306   :  { %1453 = vmatprep.subr.bf16.mxu1 %v5732_v18 }
 0x309   :  { %1454 = vmatpush1.bf16.msra.mxu1 %v5730_v47 }
 0x30a   :  { %1455 = vmatprep.subr.bf16.mxu1 %v5735_v48 }
 0x30d   :  { %1456 = vmatpush1.bf16.msra.mxu1 %v5733_v49 }
 0x30e   :  { %1457 = vmatprep.subr.bf16.mxu1 %v5738_v45 }
 0x311   :  { %1458 = vmatpush1.bf16.msra.mxu1 %v5736_v53 }
 0x312   :  { %1459 = vmatprep.subr.bf16.mxu1 %v5741_v54 }
 0x315   :  { %1460 = vmatpush1.bf16.msra.mxu1 %v5739_v57 }
 0x316   :  { %5419 = vmatprep.subr.bf16.mxu1 %v6683_v1 }
 0x318   :  { %1462 = vmatmul.mubr.bf16.vlgmr.msra.gmra.mrb[4].mxu1 %v1234_v27 }
 0x319   :  { %5421 = vmatprep.mubr.msk.bf16.mxu1 %vm6685_vm13, %v6683_v1 }
 0x3eb   :  { %v1463_v2 = vpop.f32.mrb[4].mxu1 }
 0x3ec   :  { %v7141_v4 = vadd.f32 %v1481_v61, %v1463_v2  ;;  %v1465_v5 = vpop.f32.mrb[5].mxu1 }
 0x3ed   :  { %v7143_v17 = vadd.f32 %v1485_v63, %v1465_v5  ;;  %v1467_v6 = vpop.f32.mrb[6].mxu1 }
 0x3ee   :  { %v7146_v7 = vmul.f32 0.70710677, %v7141_v4  ;;  %v7148_v8 = vadd.f32 %v1481_v61, %v1467_v6  ;;  %v1469_v9 = vpop.f32.mrb[7].mxu1 }
 0x3ef   :  { %v7151_v10 = vmul.f32 0.70710677, %v7143_v17  ;;  %v7157_v13 = vadd.f32 %v1485_v63, %v1469_v9 }
 0x3f0   :  { %v1508_v12 = vand.u32 2147483647, %v7146_v7  ;;  %v7155_v21 = vmul.f32 0.70710677, %v7148_v8  ;;  %vm1500_vm9 = vcmp.ge.f32.partialorder %v7146_v7, 0.0 }
 0x3f1   :  { %v1509_v15 = vand.u32 2147483647, %v7151_v10  ;;  %v7162_v25 = vmul.f32 0.70710677, %v7157_v13  ;;  %vm1501_vm10 = vcmp.ge.f32.partialorder %v7151_v10, 0.0  ;;  %v1492_v10 = vmul.f32 0.5, %v7141_v4 }
 0x3f2   :  { %v1512_v19 = vmul.f32 0.3275911, %v1508_v12  ;;  %v1510_v23 = vand.u32 2147483647, %v7155_v21  ;;  %v1564_v33 = vsub.f32 0.0, %v1508_v12  ;;  %vm1502_vm11 = vcmp.ge.f32.partialorder %v7155_v21, 0.0 }
 0x3f3   :  { %v1513_v22 = vmul.f32 0.3275911, %v1509_v15  ;;  %v1511_v29 = vand.u32 2147483647, %v7162_v25  ;;  %v1565_v34 = vsub.f32 0.0, %v1509_v15  ;;  %vm1503_vm12 = vcmp.ge.f32.partialorder %v7162_v25, 0.0 }
 0x3f4   :  { %v1516_v24 = vadd.f32 1.0, %v1512_v19  ;;  %v1514_v28 = vmul.f32 0.3275911, %v1510_v23  ;;  %v1568_v37 = vmul.f32 %v1564_v33, %v1508_v12  ;;  %v1566_v38 = vsub.f32 0.0, %v1510_v23  ;;  %v1600_v21 = vld [vmem:[%s7543_s23] sm:$0xff]  ;;  %v1601_v4 = vld [vmem:[%s7543_s23 + $0x8] sm:$0xff] }
 0x3f5   :  { %v1517_v26 = vadd.f32 1.0, %v1513_v22  ;;  %v1515_v31 = vmul.f32 0.3275911, %v1511_v29  ;;  %v1569_v42 = vmul.f32 %v1565_v34, %v1509_v15  ;;  %v1567_v44 = vsub.f32 0.0, %v1511_v29 }
 0x3f6   :  { %6158 = vrcp.f32 %v1516_v24  ;;  %v1518_v30 = vadd.f32 1.0, %v1514_v28  ;;  %v1572_v46 = vmul.f32 1.442695, %v1568_v37  ;;  %v1570_v47 = vmul.f32 %v1566_v38, %v1510_v23 }
 0x3f7   :  { %6160 = vrcp.f32 %v1517_v26  ;;  %v1519_v32 = vadd.f32 1.0, %v1515_v31  ;;  %v1574_v49 = vmul.f32 1.442695, %v1569_v42  ;;  %v1571_v53 = vmul.f32 %v1567_v44, %v1511_v29 }
 0x3f8   :  { %6162 = vrcp.f32 %v1518_v30  ;;  %v1576_v52 = vmul.f32 1.442695, %v1570_v47  ;;  %v1507_v25 = vsel %vm1503_vm12, 1.0, %v6684_v41 }
 0x3f9   :  { %6164 = vrcp.f32 %v1519_v32  ;;  %v1578_v60 = vmul.f32 1.442695, %v1571_v53 }
 0x3fa   :  { %6166 = vpow2.f32 %v1572_v46 }
 0x3fb   :  { %6168 = vpow2.f32 %v1574_v49  ;;  %v1493_v49 = vmul.f32 0.5, %v7143_v17 }
 0x3fc   :  { %6170 = vpow2.f32 %v1576_v52 }
 0x3fd   :  { %6172 = vpow2.f32 %v1578_v60 }
 0x400   :  { %v6159_v35 = vpop.eup %6158 }
 0x401   :  { %v6161_v40 = vpop.eup %6160  ;;  %v1528_v36 = vmul.f32 1.0614054, %v6159_v35 }
 0x402   :  { %v1529_v43 = vmul.f32 1.0614054, %v6161_v40  ;;  %v6163_v39 = vpop.eup %6162 }
 0x403   :  { %v1532_v16 = vadd.f32 -1.4531521, %v1528_v36  ;;  %v1530_v45 = vmul.f32 1.0614054, %v6163_v39  ;;  %v6165_v50 = vpop.eup %6164 }
 0x404   :  { %v1533_v18 = vadd.f32 -1.4531521, %v1529_v43  ;;  %v1531_v56 = vmul.f32 1.0614054, %v6165_v50  ;;  %v6167_v28 = vpop.eup %6166  ;;  %v1504_v43 = vsel %vm1500_vm9, 1.0, %v6684_v41 }
 0x405   :  { %v1536_v48 = vmul.f32 %v6159_v35, %v1532_v16  ;;  %v1534_v55 = vadd.f32 -1.4531521, %v1530_v45  ;;  %v6169_v30 = vpop.eup %6168 }
 0x406   :  { %v1537_v51 = vmul.f32 %v6161_v40, %v1533_v18  ;;  %v1535_v58 = vadd.f32 -1.4531521, %v1531_v56  ;;  %v6171_v42 = vpop.eup %6170  ;;  %v1494_v56 = vmul.f32 0.5, %v7148_v8 }
 0x407   :  { %v1540_v54 = vadd.f32 1.4214138, %v1536_v48  ;;  %v1538_v11 = vmul.f32 %v6163_v39, %v1534_v55  ;;  %v6173_v46 = vpop.eup %6172 }
 0x408   :  { %v1541_v20 = vadd.f32 1.4214138, %v1537_v51  ;;  %v1539_v61 = vmul.f32 %v6165_v50, %v1535_v58  ;;  %v1506_v51 = vsel %vm1502_vm11, 1.0, %v6684_v41  ;;  %v1495_v58 = vmul.f32 0.5, %v7157_v13  ;;  %v5745_v13 = vld [vmem:[#allocation18 + $0x30] ss:$24 sps:$4 sm:$0xff]  }
 0x409   :  { %v1544_v57 = vmul.f32 %v6159_v35, %v1540_v54  ;;  %v1542_v14 = vadd.f32 1.4214138, %v1538_v11 }
 0x40a   :  { %v1545_v59 = vmul.f32 %v6161_v40, %v1541_v20  ;;  %v1543_v6 = vadd.f32 1.4214138, %v1539_v61  ;;  %v5742_v61 = vld [vmem:[#allocation18] ss:$24 sps:$4 sm:$0xff]  }
 0x40b   :  { %v1548_v27 = vadd.f32 -0.28449672, %v1544_v57  ;;  %v1546_v5 = vmul.f32 %v6163_v39, %v1542_v14 }
 0x40c   :  { %v1549_v63 = vadd.f32 -0.28449672, %v1545_v59  ;;  %v1547_v19 = vmul.f32 %v6165_v50, %v1543_v6  ;;  %v5748_v6 = vld [vmem:[#allocation18 + $0x60] ss:$24 sps:$4 sm:$0xff]  }
 0x40d   :  { %v1552_v2 = vmul.f32 %v6159_v35, %v1548_v27  ;;  %v1550_v15 = vadd.f32 -0.28449672, %v1546_v5  ;;  %v5750_v5 = vld [vmem:[#allocation18 + $0x64] ss:$24 sps:$4 sm:$0xff]  }
 0x40e   :  { %v1553_v9 = vmul.f32 %v6161_v40, %v1549_v63  ;;  %v1551_v26 = vadd.f32 -0.28449672, %v1547_v19  ;;  %v5744_v63 = vld [vmem:[#allocation18 + $0x4] ss:$24 sps:$4 sm:$0xff]   ;;  %v5754_v19 = vld [vmem:[#allocation18 + $0xc0] ss:$24 sps:$4 sm:$0xff]  }
 0x40f   :  { %v1556_v12 = vadd.f32 0.2548296, %v1552_v2  ;;  %v1554_v24 = vmul.f32 %v6163_v39, %v1550_v15  ;;  %v5747_v2 = vld [vmem:[#allocation18 + $0x34] ss:$24 sps:$4 sm:$0xff]   ;;  %2281 = vmatprep.subr.bf16.mxu0 %v5744_v63  ;;  %v5756_v15 = vld [vmem:[#allocation18 + $0xc4] ss:$24 sps:$4 sm:$0xff]  }
 0x410   :  { %v1557_v22 = vadd.f32 0.2548296, %v1553_v9  ;;  %v1555_v33 = vmul.f32 %v6165_v50, %v1551_v26  ;;  %2282 = vmatpush1.bf16.msra.mxu0 %v5742_v61  ;;  %v5753_v9 = vld [vmem:[#allocation18 + $0x94] ss:$24 sps:$4 sm:$0xff]   ;;  %v5760_v26 = vld [vmem:[#allocation18 + $0x120] ss:$24 sps:$4 sm:$0xff]  }
 0x411   :  { %v1560_v23 = vmul.f32 %v6159_v35, %v1556_v12  ;;  %v1558_v32 = vadd.f32 0.2548296, %v1554_v24  ;;  %v1505_v35 = vsel %vm1501_vm10, 1.0, %v6684_v41  ;;  %2283 = vmatprep.subr.bf16.mxu0 %v5747_v2  ;;  %v5751_v12 = vld [vmem:[#allocation18 + $0x90] ss:$24 sps:$4 sm:$0xff]  }
 0x412   :  { %v1561_v29 = vmul.f32 %v6161_v40, %v1557_v22  ;;  %v1559_v36 = vadd.f32 0.2548296, %v1555_v33  ;;  %v5759_v22 = vld [vmem:[#allocation18 + $0xf4] ss:$24 sps:$4 sm:$0xff]   ;;  %v5762_v24 = vld [vmem:[#allocation18 + $0x124] ss:$24 sps:$4 sm:$0xff]  }
 0x413   :  { %v1580_v31 = vmul.f32 %v6167_v28, %v1560_v23  ;;  %v1562_v38 = vmul.f32 %v6163_v39, %v1558_v32  ;;  %v5757_v23 = vld [vmem:[#allocation18 + $0xf0] ss:$24 sps:$4 sm:$0xff]   ;;  %v5765_v28 = vld [vmem:[#allocation18 + $0x154] ss:$24 sps:$4 sm:$0xff]   ;;  %v1607_v61 = vld [vmem:[#allocation16] sm:$0x3] }
 0x414   :  { %v1581_v34 = vmul.f32 %v6169_v30, %v1561_v29  ;;  %v1563_v40 = vmul.f32 %v6165_v50, %v1559_v36  ;;  %2284 = vmatpush1.bf16.msra.mxu0 %v5745_v13  ;;  %v5763_v29 = vld [vmem:[#allocation18 + $0x150] ss:$24 sps:$4 sm:$0xff]   ;;  %v5768_v30 = vld [vmem:[#allocation18 + $0x184] ss:$24 sps:$4 sm:$0xff]   ;;  %v5771_v32 = vld [vmem:[#allocation18 + $0x1b4] ss:$24 sps:$4 sm:$0xff]  }
 0x415   :  { %v1584_v37 = vsub.f32 1.0, %v1580_v31  ;;  %v1582_v7 = vmul.f32 %v6171_v42, %v1562_v38  ;;  %2285 = vmatprep.subr.bf16.mxu0 %v5750_v5  ;;  %v5766_v31 = vld [vmem:[#allocation18 + $0x180] ss:$24 sps:$4 sm:$0xff]   ;;  %v5769_v33 = vld [vmem:[#allocation18 + $0x1b0] ss:$24 sps:$4 sm:$0xff]  }
 0x416   :  { %v1585_v44 = vsub.f32 1.0, %v1581_v34  ;;  %v1583_v39 = vmul.f32 %v6173_v46, %v1563_v40 }
 0x417   :  { %v1588_v16 = vmul.f32 %v1584_v37, %v1504_v43  ;;  %v1586_v48 = vsub.f32 1.0, %v1582_v7 }
 0x418   :  { %v1589_v18 = vmul.f32 %v1585_v44, %v1505_v35  ;;  %v1587_v54 = vsub.f32 1.0, %v1583_v39  ;;  %2286 = vmatpush1.bf16.msra.mxu0 %v5748_v6  ;;  %v5777_v39 = vld [vmem:[#allocation18 + $0x214] ss:$24 sps:$4 sm:$0xff]   ;;  %v1660_v6 = vrot.slane %v1607_v61, %v7084_v0 }
 0x419   :  { %v1592_v47 = vadd.f32 1.0, %v1588_v16  ;;  %v1590_v50 = vmul.f32 %v1586_v48, %v1506_v51  ;;  %2287 = vmatprep.subr.bf16.mxu0 %v5753_v9  ;;  %v5772_v48 = vld [vmem:[#allocation18 + $0x1e0] ss:$24 sps:$4 sm:$0xff]   ;;  %v1664_v9 = vrot.slane %v1607_v61, %v7090_v3  ;;  %v5849_v61 = vld [vmem:[#allocation18 + $0xa4] ss:$24 sps:$4 sm:$0xff]  }
 0x41a   :  { %v1593_v45 = vadd.f32 1.0, %v1589_v18  ;;  %v1591_v20 = vmul.f32 %v1587_v54, %v1507_v25  ;;  %v5778_v51 = vld [vmem:[#allocation18 + $0x240] ss:$24 sps:$4 sm:$0xff]   ;;  %v5792_v25 = vld [vmem:[#allocation18 + $0xc] ss:$24 sps:$4 sm:$0xff]  }
 0x41b   :  { %v1596_v53 = vmul.f32 %v1592_v47, %v1492_v10  ;;  %v1594_v17 = vadd.f32 1.0, %v1590_v50  ;;  %v5774_v47 = vld [vmem:[#allocation18 + $0x1e4] ss:$24 sps:$4 sm:$0xff]   ;;  %v5784_v54 = vld [vmem:[#allocation18 + $0x2a0] ss:$24 sps:$4 sm:$0xff]  }
 0x41c   :  { %v1597_v55 = vmul.f32 %v1593_v45, %v1493_v49  ;;  %v1595_v59 = vadd.f32 1.0, %v1591_v20  ;;  %2288 = vmatpush1.bf16.msra.mxu0 %v5751_v12  ;;  %v5775_v49 = vld [vmem:[#allocation18 + $0x210] ss:$24 sps:$4 sm:$0xff]   ;;  %v5780_v45 = vld [vmem:[#allocation18 + $0x244] ss:$24 sps:$4 sm:$0xff]  }
 0x41d   :  { %v7182_v52 = vadd.f32 %v1600_v21, %v1596_v53  ;;  %v1598_v11 = vmul.f32 %v1594_v17, %v1494_v56  ;;  %2289 = vmatprep.subr.bf16.mxu0 %v5756_v15  ;;  %v5781_v53 = vld [vmem:[#allocation18 + $0x270] ss:$24 sps:$4 sm:$0xff]   ;;  %v5786_v50 = vld [vmem:[#allocation18 + $0x2a4] ss:$24 sps:$4 sm:$0xff]  }
 0x41e   :  { %v7184_v57 = vadd.f32 %v1601_v4, %v1597_v55  ;;  %v1599_v27 = vmul.f32 %v1595_v59, %v1495_v58  ;;  %v5787_v55 = vld [vmem:[#allocation18 + $0x2d0] ss:$24 sps:$4 sm:$0xff]  }
 0x41f   :  { %v7189_v14 = vadd.f32 %v1600_v21, %v1598_v11  ;;  %v5783_v21 = vld [vmem:[#allocation18 + $0x274] ss:$24 sps:$4 sm:$0xff]  }
 0x420   :  { %v1608_v60 = vadd.f32 %v7184_v57, %v7182_v52  ;;  %v7191_v41 = vadd.f32 %v1601_v4, %v1599_v27  ;;  %2290 = vmatpush1.bf16.msra.mxu0 %v5754_v19  ;;  %v5789_v4 = vld [vmem:[#allocation18 + $0x2d4] ss:$24 sps:$4 sm:$0xff]  }
 0x421   :  { %2291 = vmatprep.subr.bf16.mxu0 %v5759_v22 }
 0x422   :  { %1609 = vadd.xlane.f32.xlu0 %v1608_v60  ;;  %v1611_v8 = vadd.f32 %v7191_v41, %v7189_v14  ;;  %v1606_v60 = vld [vmem:[#allocation15] sm:$0x3] }
 0x423   :  { %v1645_v2 = vrot.slane %v1606_v60, %v7084_v0  ;;  %v1649_v13 = vrot.slane %v1606_v60, %v7090_v3  ;;  %v5841_v60 = vld [vmem:[#allocation18 + $0x40] ss:$24 sps:$4 sm:$0xff]  }
 0x424   :  { %2292 = vmatpush1.bf16.msra.mxu0 %v5757_v23 }
 0x425   :  { %2293 = vmatprep.subr.bf16.mxu0 %v5762_v24 }
 0x426   :  { %1612 = vadd.xlane.f32.xlu0 %v1611_v8 }
 0x428   :  { %2294 = vmatpush1.bf16.msra.mxu0 %v5760_v26 }
 0x429   :  { %2295 = vmatprep.subr.bf16.mxu0 %v5765_v28 }
 0x42c   :  { %2296 = vmatpush1.bf16.msra.mxu0 %v5763_v29 }
 0x42d   :  { %2297 = vmatprep.subr.bf16.mxu0 %v5768_v30 }
 0x430   :  { %2298 = vmatpush1.bf16.msra.mxu0 %v5766_v31 }
 0x431   :  { %2299 = vmatprep.subr.bf16.mxu0 %v5771_v32  ;;  %v5790_v32 = vld [vmem:[#allocation18 + $0x8] ss:$24 sps:$4 sm:$0xff]  }
 0x434   :  { %2300 = vmatpush1.bf16.msra.mxu0 %v5769_v33 }
 0x435   :  { %2301 = vmatprep.subr.bf16.mxu0 %v5774_v47  ;;  %v5816_v47 = vld [vmem:[#allocation18 + $0x18c] ss:$24 sps:$4 sm:$0xff]  }
 0x438   :  { %2302 = vmatpush1.bf16.msra.mxu0 %v5772_v48  ;;  %v5814_v48 = vld [vmem:[#allocation18 + $0x188] ss:$24 sps:$4 sm:$0xff]  }
 0x439   :  { %2303 = vmatprep.subr.bf16.mxu0 %v5777_v39  ;;  %v5819_v39 = vld [vmem:[#allocation18 + $0x1bc] ss:$24 sps:$4 sm:$0xff]  }
 0x43c   :  { %2304 = vmatpush1.bf16.msra.mxu0 %v5775_v49  ;;  %v5817_v49 = vld [vmem:[#allocation18 + $0x1b8] ss:$24 sps:$4 sm:$0xff]  }
 0x43d   :  { %2305 = vmatprep.subr.bf16.mxu0 %v5780_v45  ;;  %v5822_v45 = vld [vmem:[#allocation18 + $0x1ec] ss:$24 sps:$4 sm:$0xff]  }
 0x440   :  { %2306 = vmatpush1.bf16.msra.mxu0 %v5778_v51  ;;  %v5820_v51 = vld [vmem:[#allocation18 + $0x1e8] ss:$24 sps:$4 sm:$0xff]  }
 0x441   :  { %2307 = vmatprep.subr.bf16.mxu0 %v5783_v21  ;;  %v5825_v21 = vld [vmem:[#allocation18 + $0x21c] ss:$24 sps:$4 sm:$0xff]  }
 0x444   :  { %2308 = vmatpush1.bf16.msra.mxu0 %v5781_v53  ;;  %v5823_v53 = vld [vmem:[#allocation18 + $0x218] ss:$24 sps:$4 sm:$0xff]  }
 0x445   :  { %2309 = vmatprep.subr.bf16.mxu0 %v5786_v50  ;;  %v5828_v50 = vld [vmem:[#allocation18 + $0x24c] ss:$24 sps:$4 sm:$0xff]  }
 0x448   :  { %2310 = vmatpush1.bf16.msra.mxu0 %v5784_v54  ;;  %v5826_v54 = vld [vmem:[#allocation18 + $0x248] ss:$24 sps:$4 sm:$0xff]  }
 0x449   :  { %2311 = vmatprep.subr.bf16.mxu0 %v5789_v4  ;;  %v5831_v4 = vld [vmem:[#allocation18 + $0x27c] ss:$24 sps:$4 sm:$0xff]  }
 0x44c   :  { %2312 = vmatpush1.bf16.msra.mxu0 %v5787_v55  ;;  %v5829_v55 = vld [vmem:[#allocation18 + $0x278] ss:$24 sps:$4 sm:$0xff]  }
 0x44d   :  { %2324 = vmatprep.subr.bf16.mxu0 %v5792_v25  ;;  %v5834_v25 = vld [vmem:[#allocation18 + $0x2ac] ss:$24 sps:$4 sm:$0xff]  }
 0x4af   :  { %v1610_v34 = vpop.xlane.xlu0 %1609 }
 0x4b0   :  { %v1615_v37 = vmul.f32 0.00390625, %v1610_v34  ;;  %v5795_v34 = vld [vmem:[#allocation18 + $0x3c] ss:$24 sps:$4 sm:$0xff]  }
 0x4b2   :  { %v1617_v38 = vsub.f32 %v7182_v52, %v1615_v37  ;;  %v1618_v36 = vsub.f32 %v7184_v57, %v1615_v37  ;;  %v5793_v37 = vld [vmem:[#allocation18 + $0x38] ss:$24 sps:$4 sm:$0xff]  }
 0x4b3   :  { %v1613_v42 = vpop.xlane.xlu0 %1612 }
 0x4b4   :  { %v1621_v43 = vmul.f32 %v1617_v38, %v1617_v38  ;;  %v1622_v35 = vmul.f32 %v1618_v36, %v1618_v36  ;;  %v1616_v44 = vmul.f32 0.00390625, %v1613_v42  ;;  %v5801_v42 = vld [vmem:[#allocation18 + $0x9c] ss:$24 sps:$4 sm:$0xff]  }
 0x4b6   :  { %v1625_v16 = vadd.f32 %v1622_v35, %v1621_v43  ;;  %v1619_v7 = vsub.f32 %v7189_v14, %v1616_v44  ;;  %v1620_v40 = vsub.f32 %v7191_v41, %v1616_v44  ;;  %v5799_v43 = vld [vmem:[#allocation18 + $0x98] ss:$24 sps:$4 sm:$0xff]   ;;  %v5804_v35 = vld [vmem:[#allocation18 + $0xcc] ss:$24 sps:$4 sm:$0xff]   ;;  %v5802_v44 = vld [vmem:[#allocation18 + $0xc8] ss:$24 sps:$4 sm:$0xff]  }
 0x4b8   :  { %1626 = vadd.xlane.f32.xlu1 %v1625_v16  ;;  %v1623_v46 = vmul.f32 %v1619_v7, %v1619_v7  ;;  %v1624_v10 = vmul.f32 %v1620_v40, %v1620_v40  ;;  %v5807_v16 = vld [vmem:[#allocation18 + $0xfc] ss:$24 sps:$4 sm:$0xff]  }
 0x4ba   :  { %v1628_v18 = vadd.f32 %v1624_v10, %v1623_v46  ;;  %v5808_v46 = vld [vmem:[#allocation18 + $0x128] ss:$24 sps:$4 sm:$0xff]   ;;  %v5813_v10 = vld [vmem:[#allocation18 + $0x15c] ss:$24 sps:$4 sm:$0xff]  }
 0x4bc   :  { %1629 = vadd.xlane.f32.xlu1 %v1628_v18  ;;  %v5811_v18 = vld [vmem:[#allocation18 + $0x158] ss:$24 sps:$4 sm:$0xff]  }
 0x545   :  { %v1627_v56 = vpop.xlane.xlu1 %1626 }
 0x546   :  { %v1631_v17 = vmul.f32 0.00390625, %v1627_v56  ;;  %v5832_v56 = vld [vmem:[#allocation18 + $0x2a8] ss:$24 sps:$4 sm:$0xff]  }
 0x548   :  { %v1633_v20 = vadd.f32 1e-05, %v1631_v17  ;;  %v5837_v17 = vld [vmem:[#allocation18 + $0x2dc] ss:$24 sps:$4 sm:$0xff]  }
 0x549   :  { %v1630_v11 = vpop.xlane.xlu1 %1629 }
 0x54a   :  { %6174 = vrsqrt.f32 %v1633_v20  ;;  %v1632_v58 = vmul.f32 0.00390625, %v1630_v11  ;;  %v5835_v20 = vld [vmem:[#allocation18 + $0x2d8] ss:$24 sps:$4 sm:$0xff]   ;;  %v5840_v11 = vld [vmem:[#allocation18 + $0x14] ss:$24 sps:$4 sm:$0xff]  }
 0x54c   :  { %v1634_v59 = vadd.f32 1e-05, %v1632_v58  ;;  %v5838_v58 = vld [vmem:[#allocation18 + $0x10] ss:$24 sps:$4 sm:$0xff]  }
 0x54e   :  { %6176 = vrsqrt.f32 %v1634_v59  ;;  %v5843_v59 = vld [vmem:[#allocation18 + $0x44] ss:$24 sps:$4 sm:$0xff]  }
 0x554   :  { %v6175_v27 = vpop.eup %6174 }
 0x555   :  { %v1637_v8 = vmul.f32 %v6175_v27, %v1617_v38  ;;  %v1638_v63 = vmul.f32 %v6175_v27, %v1618_v36  ;;  %v5798_v38 = vld [vmem:[#allocation18 + $0x6c] ss:$24 sps:$4 sm:$0xff]   ;;  %v5796_v36 = vld [vmem:[#allocation18 + $0x68] ss:$24 sps:$4 sm:$0xff]  }
 0x556   :  { %v5846_v27 = vld [vmem:[#allocation18 + $0x74] ss:$24 sps:$4 sm:$0xff]  }
 0x557   :  { %v1653_v19 = vmul.f32 %v1649_v13, %v1638_v63  ;;  %v1652_v22 = vmul.f32 %v1645_v2, %v1637_v8  ;;  %v5844_v8 = vld [vmem:[#allocation18 + $0x70] ss:$24 sps:$4 sm:$0xff]   ;;  %v5847_v63 = vld [vmem:[#allocation18 + $0xa0] ss:$24 sps:$4 sm:$0xff]  }
 0x558   :  { %v6177_v5 = vpop.eup %6176 }
 0x559   :  { %v1639_v12 = vmul.f32 %v6177_v5, %v1619_v7  ;;  %v1640_v15 = vmul.f32 %v6177_v5, %v1620_v40  ;;  %v1668_v26 = vadd.f32 %v1664_v9, %v1653_v19  ;;  %v1667_v29 = vadd.f32 %v1660_v6, %v1652_v22  ;;  %v5805_v7 = vld [vmem:[#allocation18 + $0xf8] ss:$24 sps:$4 sm:$0xff]   ;;  %v5810_v40 = vld [vmem:[#allocation18 + $0x12c] ss:$24 sps:$4 sm:$0xff]  }
 0x55a   :  { %v5855_v5 = vld [vmem:[#allocation18 + $0x104] ss:$24 sps:$4 sm:$0xff]   ;;  %v5859_v19 = vld [vmem:[#allocation18 + $0x160] ss:$24 sps:$4 sm:$0xff]   ;;  %v5864_v22 = vld [vmem:[#allocation18 + $0x194] ss:$24 sps:$4 sm:$0xff]  }
 0x55b   :  { %v1655_v23 = vmul.f32 %v1649_v13, %v1640_v15  ;;  %v1654_v24 = vmul.f32 %v1645_v2, %v1639_v12  ;;  %v5852_v2 = vld [vmem:[#allocation18 + $0xd4] ss:$24 sps:$4 sm:$0xff]   ;;  %v5850_v13 = vld [vmem:[#allocation18 + $0xd0] ss:$24 sps:$4 sm:$0xff]   ;;  %v5861_v15 = vld [vmem:[#allocation18 + $0x164] ss:$24 sps:$4 sm:$0xff]  }
 0x55c   :  { %v5856_v12 = vld [vmem:[#allocation18 + $0x130] ss:$24 sps:$4 sm:$0xff]  }
 0x55d   :  { %v1670_v28 = vadd.f32 %v1664_v9, %v1655_v23  ;;  %v1669_v30 = vadd.f32 %v1660_v6, %v1654_v24  ;;  %v5853_v6 = vld [vmem:[#allocation18 + $0x100] ss:$24 sps:$4 sm:$0xff]   ;;  %v5858_v9 = vld [vmem:[#allocation18 + $0x134] ss:$24 sps:$4 sm:$0xff]   ;;  %v5862_v23 = vld [vmem:[#allocation18 + $0x190] ss:$24 sps:$4 sm:$0xff]  }
 0x55e   :  { %v5867_v24 = vld [vmem:[#allocation18 + $0x1c4] ss:$24 sps:$4 sm:$0xff]  }
 0x55f   :  { %v7203_v31 = vpack.c.bf16 %v1670_v28, %v1668_v26  ;;  %v7205_v33 = vpack.c.bf16 %v1669_v30, %v1667_v29  ;;  %v5865_v26 = vld [vmem:[#allocation18 + $0x1c0] ss:$24 sps:$4 sm:$0xff]   ;;  %v5870_v28 = vld [vmem:[#allocation18 + $0x1f4] ss:$24 sps:$4 sm:$0xff]   ;;  %v5868_v29 = vld [vmem:[#allocation18 + $0x1f0] ss:$24 sps:$4 sm:$0xff]  }
 0x560   :  { %v5873_v30 = vld [vmem:[#allocation18 + $0x224] ss:$24 sps:$4 sm:$0xff]  }
 0x561   :  { %2313 = vmatprep.mubr.bf16.mxu0 %v7203_v31 }
 0x562   :  { %2314 = vmatmul.mubr.bf16.vlgmr.msra.gmra.mrb[4].mxu0 %v7205_v33 }
 0x563   :  { %2325 = vmatpush1.bf16.msra.mxu0 %v5790_v32  ;;  %2356 = vmatprep.mubr.bf16.mxu0 %v7203_v31  ;;  %v5876_v32 = vld [vmem:[#allocation18 + $0x254] ss:$24 sps:$4 sm:$0xff]  }
 0x564   :  { %2326 = vmatprep.subr.bf16.mxu0 %v5795_v34  ;;  %v5874_v34 = vld [vmem:[#allocation18 + $0x250] ss:$24 sps:$4 sm:$0xff]  }
 0x567   :  { %2327 = vmatpush1.bf16.msra.mxu0 %v5793_v37  ;;  %v5879_v37 = vld [vmem:[#allocation18 + $0x284] ss:$24 sps:$4 sm:$0xff]  }
 0x568   :  { %2328 = vmatprep.subr.bf16.mxu0 %v5798_v38  ;;  %v5877_v38 = vld [vmem:[#allocation18 + $0x280] ss:$24 sps:$4 sm:$0xff]  }
 0x56b   :  { %2329 = vmatpush1.bf16.msra.mxu0 %v5796_v36  ;;  %v5882_v36 = vld [vmem:[#allocation18 + $0x2b4] ss:$24 sps:$4 sm:$0xff]  }
 0x56c   :  { %2330 = vmatprep.subr.bf16.mxu0 %v5801_v42  ;;  %v5880_v42 = vld [vmem:[#allocation18 + $0x2b0] ss:$24 sps:$4 sm:$0xff]  }
 0x56f   :  { %2331 = vmatpush1.bf16.msra.mxu0 %v5799_v43  ;;  %v5885_v43 = vld [vmem:[#allocation18 + $0x2e4] ss:$24 sps:$4 sm:$0xff]  }
 0x570   :  { %2332 = vmatprep.subr.bf16.mxu0 %v5804_v35  ;;  %v5883_v35 = vld [vmem:[#allocation18 + $0x2e0] ss:$24 sps:$4 sm:$0xff]  }
 0x573   :  { %2333 = vmatpush1.bf16.msra.mxu0 %v5802_v44 }
 0x574   :  { %2334 = vmatprep.subr.bf16.mxu0 %v5807_v16 }
 0x577   :  { %2335 = vmatpush1.bf16.msra.mxu0 %v5805_v7 }
 0x578   :  { %2336 = vmatprep.subr.bf16.mxu0 %v5810_v40 }
 0x57b   :  { %2337 = vmatpush1.bf16.msra.mxu0 %v5808_v46  ;;  %v1781_v46 = vsub.s32 2, %v7081_v62 }
 0x57c   :  { %2338 = vmatprep.subr.bf16.mxu0 %v5813_v10  ;;  %v7223_v10 = vld [vmem:[#allocation19] sm:$0x3f] }
 0x57f   :  { %2339 = vmatpush1.bf16.msra.mxu0 %v5811_v18 }
 0x580   :  { %2340 = vmatprep.subr.bf16.mxu0 %v5816_v47 }
 0x583   :  { %2341 = vmatpush1.bf16.msra.mxu0 %v5814_v48 }
 0x584   :  { %2342 = vmatprep.subr.bf16.mxu0 %v5819_v39 }
 0x587   :  { %2343 = vmatpush1.bf16.msra.mxu0 %v5817_v49  ;;  %v1774_v49 = vrot.slane %v7223_v10, %v7084_v0 }
 0x588   :  { %2344 = vmatprep.subr.bf16.mxu0 %v5822_v45 }
 0x58b   :  { %2345 = vmatpush1.bf16.msra.mxu0 %v5820_v51 }
 0x58c   :  { %2346 = vmatprep.subr.bf16.mxu0 %v5825_v21 }
 0x58f   :  { %2347 = vmatpush1.bf16.msra.mxu0 %v5823_v53 }
 0x590   :  { %2348 = vmatprep.subr.bf16.mxu0 %v5828_v50 }
 0x593   :  { %2349 = vmatpush1.bf16.msra.mxu0 %v5826_v54 }
 0x594   :  { %2350 = vmatprep.subr.bf16.mxu0 %v5831_v4 }
 0x597   :  { %2351 = vmatpush1.bf16.msra.mxu0 %v5829_v55 }
 0x598   :  { %2352 = vmatprep.subr.bf16.mxu0 %v5834_v25 }
 0x59b   :  { %2353 = vmatpush1.bf16.msra.mxu0 %v5832_v56 }
 0x59c   :  { %2354 = vmatprep.subr.bf16.mxu0 %v5837_v17  ;;  %v1789_v17 = vsub.s32 4, %v7081_v62 }
 0x59f   :  { %2355 = vmatpush1.bf16.msra.mxu0 %v5835_v20  ;;  %v1790_v20 = vrot.slane %v7223_v10, %v1789_v17 }
 0x5a0   :  { %2367 = vmatprep.subr.bf16.mxu0 %v5840_v11 }
 0x5a2   :  { %2357 = vmatmul.mubr.bf16.vlgmr.msra.gmra.mrb[8].mxu0 %v7205_v33 }
 0x5a3   :  { %2368 = vmatpush1.bf16.msra.mxu0 %v5838_v58  ;;  %2399 = vmatprep.mubr.bf16.mxu0 %v7203_v31  ;;  %v5871_v31 = vld [vmem:[#allocation18 + $0x220] ss:$24 sps:$4 sm:$0xff]  }
 0x5a4   :  { %2369 = vmatprep.subr.bf16.mxu0 %v5843_v59 }
 0x5a7   :  { %2370 = vmatpush1.bf16.msra.mxu0 %v5841_v60 }
 0x5a8   :  { %2371 = vmatprep.subr.bf16.mxu0 %v5846_v27 }
 0x5ab   :  { %2372 = vmatpush1.bf16.msra.mxu0 %v5844_v8 }
 0x5ac   :  { %2373 = vmatprep.subr.bf16.mxu0 %v5849_v61 }
 0x5af   :  { %2374 = vmatpush1.bf16.msra.mxu0 %v5847_v63 }
 0x5b0   :  { %2375 = vmatprep.subr.bf16.mxu0 %v5852_v2 }
 0x5b3   :  { %2376 = vmatpush1.bf16.msra.mxu0 %v5850_v13 }
 0x5b4   :  { %2377 = vmatprep.subr.bf16.mxu0 %v5855_v5 }
 0x5b7   :  { %2378 = vmatpush1.bf16.msra.mxu0 %v5853_v6 }
 0x5b8   :  { %2379 = vmatprep.subr.bf16.mxu0 %v5858_v9 }
 0x5bb   :  { %2380 = vmatpush1.bf16.msra.mxu0 %v5856_v12 }
 0x5bc   :  { %2381 = vmatprep.subr.bf16.mxu0 %v5861_v15 }
 0x5bf   :  { %2382 = vmatpush1.bf16.msra.mxu0 %v5859_v19 }
 0x5c0   :  { %2383 = vmatprep.subr.bf16.mxu0 %v5864_v22 }
 0x5c3   :  { %2384 = vmatpush1.bf16.msra.mxu0 %v5862_v23 }
 0x5c4   :  { %2385 = vmatprep.subr.bf16.mxu0 %v5867_v24 }
 0x5c7   :  { %2386 = vmatpush1.bf16.msra.mxu0 %v5865_v26 }
 0x5c8   :  { %2387 = vmatprep.subr.bf16.mxu0 %v5870_v28 }
 0x5cb   :  { %2388 = vmatpush1.bf16.msra.mxu0 %v5868_v29 }
 0x5cc   :  { %2389 = vmatprep.subr.bf16.mxu0 %v5873_v30 }
 0x5cf   :  { %2390 = vmatpush1.bf16.msra.mxu0 %v5871_v31 }
 0x5d0   :  { %2391 = vmatprep.subr.bf16.mxu0 %v5876_v32 }
 0x5d3   :  { %2392 = vmatpush1.bf16.msra.mxu0 %v5874_v34 }
 0x5d4   :  { %2393 = vmatprep.subr.bf16.mxu0 %v5879_v37 }
 0x5d7   :  { %2394 = vmatpush1.bf16.msra.mxu0 %v5877_v38 }
 0x5d8   :  { %2395 = vmatprep.subr.bf16.mxu0 %v5882_v36 }
 0x5db   :  { %2396 = vmatpush1.bf16.msra.mxu0 %v5880_v42 }
 0x5dc   :  { %2397 = vmatprep.subr.bf16.mxu0 %v5885_v43 }
 0x5df   :  { %2398 = vmatpush1.bf16.msra.mxu0 %v5883_v35 }
 0x5e0   :  { %5437 = vmatprep.subr.bf16.mxu0 %v6683_v1 }
 0x5e2   :  { %2400 = vmatmul.mubr.bf16.vlgmr.msra.gmra.mrb[12].mxu0 %v7205_v33  ;;  %v1782_v33 = vrot.slane %v7223_v10, %v1781_v46 }
 0x5e3   :  { %5439 = vmatprep.mubr.msk.bf16.mxu0 %vm6685_vm13, %v6683_v1 }
 0x635   :  { %v2315_v44 = vpop.f32.mrb[4].mxu0 }
 0x636   :  { %v7218_v16 = vpop.f32.mrb[5].mxu0  ;;  %v2316_v50 = vadd.f32 %v2315_v44, %v1774_v49 }
 0x637   :  { %v2319_v7 = vpop.f32.mrb[6].mxu0 }
 0x638   :  { %v7220_v40 = vpop.f32.mrb[7].mxu0  ;;  %v2410_v4 = vpack.c.bf16 %v2316_v50, %v2316_v50  ;;  %v2320_v25 = vadd.f32 %v2319_v7, %v1774_v49 }
 0x63a   :  { %v2411_v56 = vpack.c.bf16 %v2320_v25, %v2320_v25 }
 0x675   :  { %v2358_v18 = vpop.f32.mrb[8].mxu0 }
 0x676   :  { %v2359_v47 = vadd.f32 %v2358_v18, %v1782_v33  ;;  %v7228_v48 = vpop.f32.mrb[9].mxu0 }
 0x677   :  { %v2362_v39 = vpop.f32.mrb[10].mxu0 }
 0x678   :  { %v2412_v45 = vpack.c.bf16 %v2359_v47, %v2359_v47  ;;  %v7232_v51 = vpop.f32.mrb[11].mxu0  ;;  %v2363_v53 = vadd.f32 %v2362_v39, %v1782_v33 }
 0x67a   :  { %v2421_v21 = vsel %vm2416_vm14, %v2412_v45, 0  ;;  %v2413_v54 = vpack.c.bf16 %v2363_v53, %v2363_v53 }
 0x67b   :  { %5420 = vmatpush3.bf16.xpose.msra.mxu1 %v2421_v21 }
 0x67c   :  { %5425 = vmatprep.subr.bf16.mxu1 %v6683_v1  ;;  %v2467_v55 = vsel %vm2416_vm14, %v2413_v54, 0 }
 0x682   :  { %5422 = vmatmul.mubr.msk.bf16.vlgmr.msra.gmra.mrb[8].mxu1 %vm2416_vm14, %v2410_v4 }
 0x683   :  { %5426 = vmatpush3.bf16.xpose.msra.mxu1 %v2467_v55  ;;  %5427 = vmatprep.mubr.msk.bf16.mxu1 %vm6685_vm13, %v6683_v1 }
 0x684   :  { %5431 = vmatprep.subr.bf16.mxu1 %v6683_v1 }
 0x68a   :  { %5428 = vmatmul.mubr.msk.bf16.vlgmr.msra.gmra.mrb[12].mxu1 %vm2416_vm14, %v2411_v56 }
 0x68b   :  { %5433 = vmatprep.mubr.msk.bf16.mxu1 %vm6685_vm13, %v6683_v1 }
 0x6b5   :  { %v2401_v11 = vpop.f32.mrb[12].mxu0 }
 0x6b6   :  { %v2402_v58 = vadd.f32 %v2401_v11, %v1790_v20  ;;  %v7246_v59 = vpop.f32.mrb[13].mxu0 }
 0x6b7   :  { %v2405_v60 = vpop.f32.mrb[14].mxu0 }
 0x6b8   :  { %v7248_v27 = vpack.c.bf16 %v2402_v58, %v2402_v58  ;;  %v2406_v8 = vadd.f32 %v2405_v60, %v1790_v20  ;;  %v7250_v61 = vpop.f32.mrb[15].mxu0 }
 0x6ba   :  { %v2539_v63 = vsel %vm2537_vm15, %v7248_v27, 0  ;;  %v7254_v2 = vpack.c.bf16 %v2406_v8, %v2406_v8 }
 0x6bb   :  { %5432 = vmatpush3.bf16.msra.mxu1 %v2539_v63 }
 0x6bc   :  { %v2585_v13 = vsel %vm2537_vm15, %v7254_v2, 0  ;;  %5443 = vmatprep.subr.bf16.mxu1 %v6683_v1 }
 0x6bd   :  { %5438 = vmatpush3.bf16.msra.mxu0 %v2585_v13 }
 0x6be   :  { %5449 = vmatprep.subr.bf16.mxu0 %v6683_v1 }
 0x755   :  { %v2457_v5 = vpop.f32.mrb[8].mxu1 }
 0x756   :  { %v5423_v6 = vpop.f32.mrb[9].mxu1  ;;  %v2510_v9 = vsel %vm2509_vm0, %v2457_v5, -inf }
 0x757   :  { %2511 = vmax.xlane.f32.xlu0 %v2510_v9  ;;  %v2460_v12 = vpop.f32.mrb[10].mxu1 }
 0x758   :  { %v5424_v15 = vpop.f32.mrb[11].mxu1 }
 0x75d   :  { %v2503_v19 = vpop.f32.mrb[12].mxu1 }
 0x75e   :  { %v5429_v22 = vpop.f32.mrb[13].mxu1  ;;  %v2513_v23 = vsel %vm2509_vm0, %v2503_v19, -inf }
 0x75f   :  { %2514 = vmax.xlane.f32.xlu1 %v2513_v23  ;;  %v2506_v24 = vpop.f32.mrb[14].mxu1 }
 0x760   :  { %v5430_v26 = vpop.f32.mrb[15].mxu1 }
 0x770   :  { %2683 = vrot.lane.b32.xlu1 %v2413_v54, %s6661_s30 }
 0x7e4   :  { %v2512_v28 = vpop.xlane.xlu0 %2511 }
 0x7e5   :  { %v2516_v29 = vsub.f32 %v2457_v5, %v2512_v28 }
 0x7e7   :  { %v2518_v30 = vmul.f32 1.442695, %v2516_v29 }
 0x7e9   :  { %6178 = vpow2.f32 %v2518_v30 }
 0x7ec   :  { %v2515_v31 = vpop.xlane.xlu1 %2514 }
 0x7ed   :  { %v2517_v32 = vsub.f32 %v2503_v19, %v2515_v31 }
 0x7ef   :  { %v2520_v34 = vmul.f32 1.442695, %v2517_v32 }
 0x7f0   :  { %v2684_v35 = vpop.permute.xlu1 %2683 }
 0x7f1   :  { %6180 = vpow2.f32 %v2520_v34  ;;  %v2689_v50 = vsel %vm2416_vm14, %v2684_v35, 0 }
 0x7f3   :  { %v6179_v37 = vpop.eup %6178 }
 0x7f4   :  { %v2522_v38 = vsel %vm2509_vm0, %v6179_v37, 0.0 }
 0x7f5   :  { %2523 = vadd.xlane.f32.xlu0 %v2522_v38 }
 0x7fb   :  { %v6181_v36 = vpop.eup %6180 }
 0x7fc   :  { %v2525_v42 = vsel %vm2509_vm0, %v6181_v36, 0.0 }
 0x7fd   :  { %2526 = vadd.xlane.f32.xlu1 %v2525_v42 }
 0x80b   :  { %2631 = vrot.lane.b32.xlu0 %v2412_v45, %s6661_s30 }
 0x80e   :  { %2628 = vrot.lane.b32.xlu1 %v2410_v4, %s6661_s30 }
 0x812   :  { %2680 = vrot.lane.b32.xlu1 %v2411_v56, %s6661_s30 }
 0x882   :  { %v2524_v43 = vpop.xlane.xlu0 %2523 }
 0x883   :  { %6182 = vrcp.f32 %v2524_v43 }
 0x886   :  { %v2632_v18 = vpop.permute.xlu0 %2631 }
 0x887   :  { %v2637_v39 = vsel %vm2416_vm14, %v2632_v18, 0 }
 0x88a   :  { %v2527_v44 = vpop.xlane.xlu1 %2526 }
 0x88b   :  { %6184 = vrcp.f32 %v2527_v44 }
 0x88d   :  { %v6183_v7 = vpop.eup %6182 }
 0x88e   :  { %v2530_v33 = vmul.f32 %v6183_v7, %v6179_v37  ;;  %v2629_v53 = vpop.permute.xlu1 %2628 }
 0x890   :  { %v2532_v47 = vpack.c.bf16 %v2530_v33, %v2530_v33 }
 0x892   :  { %5434 = vmatmul.mubr.msk.bf16.vlgmr.msra.gmra.mrb[16].mxu1 %vm2509_vm0, %v2532_v47  ;;  %v2681_v54 = vpop.permute.xlu1 %2680  ;;  %v1793_v47 = vsub.s32 5, %v7081_v62 }
 0x893   :  { %5444 = vmatpush3.bf16.xpose.msra.mxu1 %v2637_v39  ;;  %5445 = vmatprep.mubr.msk.bf16.mxu1 %vm6685_vm13, %v6683_v1 }
 0x894   :  { %5455 = vmatprep.subr.bf16.mxu1 %v6683_v1 }
 0x895   :  { %v6185_v49 = vpop.eup %6184 }
 0x896   :  { %v2531_v45 = vmul.f32 %v6185_v49, %v6181_v36  ;;  %v1785_v36 = vsub.s32 3, %v7081_v62 }
 0x898   :  { %v2533_v21 = vpack.c.bf16 %v2531_v45, %v2531_v45  ;;  %v1786_v43 = vrot.slane %v7223_v10, %v1785_v36  ;;  %v1794_v45 = vrot.slane %v7223_v10, %v1793_v47 }
 0x89a   :  { %5440 = vmatmul.mubr.msk.bf16.vlgmr.msra.gmra.mrb[16].mxu0 %vm2509_vm0, %v2533_v21  ;;  %5446 = vmatmul.mubr.msk.bf16.vlgmr.msra.gmra.mrb[20].mxu1 %vm2416_vm14, %v2629_v53  ;;  %v2361_v18 = vadd.f32 %v7228_v48, %v1786_v43  ;;  %v2365_v39 = vadd.f32 %v7232_v51, %v1786_v43  ;;  %v1778_v48 = vrot.slane %v7223_v10, %v7090_v3 }
 0x89b   :  { %5450 = vmatpush3.bf16.xpose.msra.mxu0 %v2689_v50  ;;  %5451 = vmatprep.mubr.msk.bf16.mxu0 %vm6685_vm13, %v6683_v1  ;;  %v2404_v51 = vadd.f32 %v7246_v59, %v1794_v45 }
 0x89c   :  { %5461 = vmatprep.subr.bf16.mxu0 %v6683_v1  ;;  %5457 = vmatprep.mubr.msk.bf16.mxu1 %vm6685_vm13, %v6683_v1  ;;  %v7308_v49 = vpack.c.bf16 %v2361_v18, %v2361_v18  ;;  %v2856_v53 = vpack.c.bf16 %v2365_v39, %v2365_v39  ;;  %v2322_v10 = vadd.f32 %v7220_v40, %v1778_v48 }
 0x8a2   :  { %5452 = vmatmul.mubr.msk.bf16.vlgmr.msra.gmra.mrb[20].mxu0 %vm2416_vm14, %v2681_v54  ;;  %v2863_v54 = vsel %vm2416_vm14, %v7308_v49, 0 }
 0x8a3   :  { %5463 = vmatprep.mubr.msk.bf16.mxu0 %vm6685_vm13, %v6683_v1 }
 0x965   :  { %v7284_v4 = vpop.f32.mrb[16].mxu1 }
 0x966   :  { %v5435_v55 = vpop.f32.mrb[17].mxu1 }
 0x967   :  { %v2578_v25 = vpop.f32.mrb[18].mxu1 }
 0x968   :  { %v5436_v56 = vpop.f32.mrb[19].mxu1  ;;  %v2318_v25 = vadd.f32 %v7218_v16, %v1778_v48 }
 0x969   :  { %v2909_v56 = vsel %vm2416_vm14, %v2856_v53, 0 }
 0x96a   :  { %v2853_v59 = vpack.c.bf16 %v2318_v25, %v2318_v25 }
 0x96d   :  { %v7286_v17 = vpop.f32.mrb[16].mxu0  ;;  %v2673_v20 = vpop.f32.mrb[20].mxu1 }
 0x96e   :  { %v5441_v11 = vpop.f32.mrb[17].mxu0  ;;  %v5447_v58 = vpop.f32.mrb[21].mxu1  ;;  %v2731_v60 = vsel %vm2509_vm0, %v2673_v20, -inf }
 0x96f   :  { %v2624_v8 = vpop.f32.mrb[18].mxu0  ;;  %2732 = vmax.xlane.f32.xlu0 %v2731_v60  ;;  %v2676_v63 = vpop.f32.mrb[22].mxu1  ;;  %v7326_v11 = vpack.c.bf16 %v2404_v51, %v2404_v51  ;;  %v2854_v58 = vpack.c.bf16 %v2322_v10, %v2322_v10 }
 0x970   :  { %v5442_v13 = vpop.f32.mrb[19].mxu0  ;;  %v5448_v5 = vpop.f32.mrb[23].mxu1 }
 0x975   :  { %v2725_v6 = vpop.f32.mrb[20].mxu0 }
 0x976   :  { %v5453_v9 = vpop.f32.mrb[21].mxu0  ;;  %v2734_v12 = vsel %vm2509_vm0, %v2725_v6, -inf }
 0x977   :  { %2735 = vmax.xlane.f32.xlu1 %v2734_v12  ;;  %v2728_v15 = vpop.f32.mrb[22].mxu0 }
 0x978   :  { %v5454_v19 = vpop.f32.mrb[23].mxu0 }
 0x988   :  { %2805 = vrot.lane.b32.xlu1 %v7254_v2, %s6661_s30 }
 0x9fc   :  { %v2733_v22 = vpop.xlane.xlu0 %2732 }
 0x9fd   :  { %v2737_v23 = vsub.f32 %v2673_v20, %v2733_v22  ;;  %v2408_v20 = vadd.f32 %v7250_v61, %v1794_v45  ;;  %v2979_v61 = vsel %vm2537_vm15, %v7326_v11, 0 }
 0x9ff   :  { %v2739_v24 = vmul.f32 1.442695, %v2737_v23  ;;  %v7329_v16 = vpack.c.bf16 %v2408_v20, %v2408_v20 }
 0xa01   :  { %6186 = vpow2.f32 %v2739_v24  ;;  %v3025_v40 = vsel %vm2537_vm15, %v7329_v16, 0 }
 0xa04   :  { %v2736_v26 = vpop.xlane.xlu1 %2735 }
 0xa05   :  { %v2738_v28 = vsub.f32 %v2725_v6, %v2736_v26 }
 0xa07   :  { %v2741_v29 = vmul.f32 1.442695, %v2738_v28 }
 0xa08   :  { %v2806_v30 = vpop.permute.xlu1 %2805 }
 0xa09   :  { %6188 = vpow2.f32 %v2741_v29  ;;  %v2811_v31 = vsel %vm2537_vm15, %v2806_v30, 0 }
 0xa0a   :  { %5462 = vmatpush3.bf16.msra.mxu0 %v2811_v31 }
 0xa0b   :  { %v6187_v32 = vpop.eup %6186  ;;  %5473 = vmatprep.subr.bf16.mxu0 %v6683_v1 }
 0xa0c   :  { %v2743_v34 = vsel %vm2509_vm0, %v6187_v32, 0.0 }
 0xa0d   :  { %2744 = vadd.xlane.f32.xlu0 %v2743_v34 }
 0xa13   :  { %v6189_v37 = vpop.eup %6188 }
 0xa14   :  { %v2746_v2 = vsel %vm2509_vm0, %v6189_v37, 0.0 }
 0xa15   :  { %2747 = vadd.xlane.f32.xlu0 %v2746_v2 }
 0xa2b   :  { %2756 = vrot.lane.b32.xlu0 %v7248_v27, %s6661_s30 }
 0xa9a   :  { %v2745_v38 = vpop.xlane.xlu0 %2744 }
 0xa9b   :  { %6190 = vrcp.f32 %v2745_v38 }
 0xaa2   :  { %v2748_v42 = vpop.xlane.xlu0 %2747 }
 0xaa3   :  { %6192 = vrcp.f32 %v2748_v42 }
 0xaa5   :  { %v6191_v35 = vpop.eup %6190 }
 0xaa6   :  { %v2751_v44 = vmul.f32 %v6191_v35, %v6187_v32  ;;  %v2757_v7 = vpop.permute.xlu0 %2756 }
 0xaa7   :  { %v2762_v33 = vsel %vm2537_vm15, %v2757_v7, 0 }
 0xaa8   :  { %5456 = vmatpush3.bf16.msra.mxu1 %v2762_v33  ;;  %v2753_v27 = vpack.c.bf16 %v2751_v44, %v2751_v44 }
 0xaa9   :  { %5467 = vmatprep.subr.bf16.mxu1 %v6683_v1 }
 0xaab   :  { %5458 = vmatmul.mubr.msk.bf16.vlgmr.msra.gmra.mrb[24].mxu1 %vm2509_vm0, %v2753_v27 }
 0xaac   :  { %5469 = vmatprep.mubr.msk.bf16.mxu1 %vm6685_vm13, %v6683_v1 }
 0xaad   :  { %v6193_v21 = vpop.eup %6192 }
 0xaae   :  { %v2752_v50 = vmul.f32 %v6193_v21, %v6189_v37 }
 0xab0   :  { %v2754_v55 = vpack.c.bf16 %v2752_v50, %v2752_v50 }
 0xab1   :  { %5468 = vmatpush3.bf16.xpose.msra.mxu1 %v2863_v54 }
 0xab2   :  { %5464 = vmatmul.mubr.msk.bf16.vlgmr.msra.gmra.mrb[24].mxu0 %vm2509_vm0, %v2754_v55  ;;  %5479 = vmatprep.subr.bf16.mxu1 %v6683_v1 }
 0xab3   :  { %5474 = vmatpush3.bf16.xpose.msra.mxu0 %v2909_v56  ;;  %5475 = vmatprep.mubr.msk.bf16.mxu0 %vm6685_vm13, %v6683_v1 }
 0xab4   :  { %5485 = vmatprep.subr.bf16.mxu0 %v6683_v1 }
 0xab8   :  { %5470 = vmatmul.mubr.msk.bf16.vlgmr.msra.gmra.mrb[28].mxu1 %vm2416_vm14, %v2853_v59 }
 0xab9   :  { %5480 = vmatpush3.bf16.msra.mxu1 %v2979_v61  ;;  %5481 = vmatprep.mubr.msk.bf16.mxu1 %vm6685_vm13, %v6683_v1 }
 0xaba   :  { %5476 = vmatmul.mubr.msk.bf16.vlgmr.msra.gmra.mrb[28].mxu0 %vm2416_vm14, %v2854_v58  ;;  %5491 = vmatprep.subr.bf16.mxu1 %v6683_v1 }
 0xabb   :  { %5486 = vmatpush3.bf16.msra.mxu0 %v3025_v40  ;;  %5487 = vmatprep.mubr.msk.bf16.mxu0 %vm6685_vm13, %v6683_v1 }
 0xabc   :  { %5497 = vmatprep.subr.bf16.mxu0 %v6683_v1 }
 0xb7e   :  { %v7343_v60 = vpop.f32.mrb[24].mxu1 }
 0xb7f   :  { %v5459_v8 = vpop.f32.mrb[25].mxu1 }
 0xb80   :  { %v2801_v63 = vpop.f32.mrb[26].mxu1 }
 0xb81   :  { %v5460_v13 = vpop.f32.mrb[27].mxu1 }
 0xb85   :  { %v7345_v5 = vpop.f32.mrb[24].mxu0 }
 0xb86   :  { %v5575_v6 = vpack.i.bf16 %v7345_v5, %v7343_v60  ;;  %v5465_v9 = vpop.f32.mrb[25].mxu0 }
 0xb87   :  { %v2850_v12 = vpop.f32.mrb[26].mxu0 }
 0xb88   :  { %v5466_v15 = vpop.f32.mrb[27].mxu0 }
 0xb8b   :  { %v2899_v19 = vpop.f32.mrb[28].mxu1 }
 0xb8c   :  { %v5471_v22 = vpop.f32.mrb[29].mxu1  ;;  %v2951_v23 = vsel %vm2509_vm0, %v2899_v19, -inf }
 0xb8d   :  { %v2945_v24 = vpop.f32.mrb[28].mxu0  ;;  %2952 = vmax.xlane.f32.xlu1 %v2951_v23  ;;  %v2902_v26 = vpop.f32.mrb[30].mxu1 }
 0xb8e   :  { %v5472_v28 = vpop.f32.mrb[31].mxu1  ;;  %v5477_v29 = vpop.f32.mrb[29].mxu0  ;;  %v2954_v30 = vsel %vm2509_vm0, %v2945_v24, -inf }
 0xb8f   :  { %2955 = vmax.xlane.f32.xlu0 %v2954_v30  ;;  %v2948_v31 = vpop.f32.mrb[30].mxu0 }
 0xb90   :  { %v5478_v32 = vpop.f32.mrb[31].mxu0 }
 0xb9e   :  { %3123 = vrot.lane.b32.xlu1 %v2856_v53, %s6661_s30 }
 0xc1a   :  { %v2953_v34 = vpop.xlane.xlu1 %2952 }
 0xc1b   :  { %v2957_v37 = vsub.f32 %v2899_v19, %v2953_v34 }
 0xc1c   :  { %v2956_v2 = vpop.xlane.xlu0 %2955 }
 0xc1d   :  { %v2959_v38 = vmul.f32 1.442695, %v2957_v37  ;;  %v2958_v42 = vsub.f32 %v2945_v24, %v2956_v2 }
 0xc1e   :  { %v3124_v18 = vpop.permute.xlu1 %3123 }
 0xc1f   :  { %6194 = vpow2.f32 %v2959_v38  ;;  %v2961_v43 = vmul.f32 1.442695, %v2958_v42 }
 0xc21   :  { %6196 = vpow2.f32 %v2961_v43 }
 0xc29   :  { %v6195_v35 = vpop.eup %6194 }
 0xc2a   :  { %v2963_v44 = vsel %vm2509_vm0, %v6195_v35, 0.0 }
 0xc2b   :  { %v6197_v7 = vpop.eup %6196  ;;  %2964 = vadd.xlane.f32.xlu0 %v2963_v44 }
 0xc2c   :  { %v2966_v33 = vsel %vm2509_vm0, %v6197_v7, 0.0 }
 0xc2d   :  { %2967 = vadd.xlane.f32.xlu1 %v2966_v33 }
 0xc3e   :  { %3068 = vrot.lane.b32.xlu1 %v2853_v59, %s6661_s30 }
 0xc41   :  { %3071 = vrot.lane.b32.xlu0 %v7308_v49, %s6661_s30  ;;  %v3129_v49 = vsel %vm2416_vm14, %v3124_v18, 0 }
 0xc42   :  { %3120 = vrot.lane.b32.xlu1 %v2854_v58, %s6661_s30 }
 0xcb8   :  { %v2965_v47 = vpop.xlane.xlu0 %2964 }
 0xcb9   :  { %6198 = vrcp.f32 %v2965_v47 }
 0xcba   :  { %v2968_v27 = vpop.xlane.xlu1 %2967 }
 0xcbb   :  { %6200 = vrcp.f32 %v2968_v27 }
 0xcbc   :  { %v3072_v48 = vpop.permute.xlu0 %3071 }
 0xcbd   :  { %v3077_v54 = vsel %vm2416_vm14, %v3072_v48, 0  ;;  %v5891_v48 = vld [vmem:[#allocation21 + $0x14] ss:$8 sps:$4 sm:$0xff]  }
 0xcbe   :  { %v3069_v55 = vpop.permute.xlu1 %3068 }
 0xcc2   :  { %v3121_v25 = vpop.permute.xlu1 %3120 }
 0xcc3   :  { %v6199_v39 = vpop.eup %6198 }
 0xcc4   :  { %v2971_v45 = vmul.f32 %v6199_v39, %v6195_v35 }
 0xcc5   :  { %v6201_v21 = vpop.eup %6200 }
 0xcc6   :  { %v2972_v53 = vmul.f32 %v6201_v21, %v6197_v7  ;;  %v2973_v50 = vpack.c.bf16 %v2971_v45, %v2971_v45  ;;  %v5886_v21 = vld [vmem:[#allocation21] ss:$8 sps:$4 sm:$0xff]  }
 0xcc8   :  { %5482 = vmatmul.mubr.msk.bf16.vlgmr.msra.gmra.mrb[32].mxu1 %vm2509_vm0, %v2973_v50  ;;  %v2974_v51 = vpack.c.bf16 %v2972_v53, %v2972_v53  ;;  %v5889_v53 = vld [vmem:[#allocation21 + $0x10] ss:$8 sps:$4 sm:$0xff]   ;;  %v5894_v50 = vld [vmem:[#allocation21 + $0x24] ss:$8 sps:$4 sm:$0xff]  }
 0xcc9   :  { %5492 = vmatpush3.bf16.xpose.msra.mxu1 %v3077_v54  ;;  %5493 = vmatprep.mubr.msk.bf16.mxu1 %vm6685_vm13, %v6683_v1  ;;  %v5892_v54 = vld [vmem:[#allocation21 + $0x20] ss:$8 sps:$4 sm:$0xff]  }
 0xcca   :  { %5488 = vmatmul.mubr.msk.bf16.vlgmr.msra.gmra.mrb[32].mxu0 %vm2509_vm0, %v2974_v51  ;;  %5503 = vmatprep.subr.bf16.mxu1 %v6683_v1  ;;  %v5897_v51 = vld [vmem:[#allocation21 + $0x34] ss:$8 sps:$4 sm:$0xff]  }
 0xccb   :  { %5498 = vmatpush3.bf16.xpose.msra.mxu0 %v3129_v49  ;;  %5499 = vmatprep.mubr.msk.bf16.mxu0 %vm6685_vm13, %v6683_v1  ;;  %v5895_v49 = vld [vmem:[#allocation21 + $0x30] ss:$8 sps:$4 sm:$0xff]  }
 0xccc   :  { %5509 = vmatprep.subr.bf16.mxu0 %v6683_v1 }
 0xcd0   :  { %5494 = vmatmul.mubr.msk.bf16.vlgmr.msra.gmra.mrb[36].mxu1 %vm2416_vm14, %v3069_v55  ;;  %v5900_v55 = vld [vmem:[#allocation21 + $0x44] ss:$8 sps:$4 sm:$0xff]  }
 0xcd1   :  { %5505 = vmatprep.mubr.msk.bf16.mxu1 %vm6685_vm13, %v6683_v1 }
 0xcd2   :  { %5500 = vmatmul.mubr.msk.bf16.vlgmr.msra.gmra.mrb[36].mxu0 %vm2416_vm14, %v3121_v25  ;;  %v5898_v25 = vld [vmem:[#allocation21 + $0x40] ss:$8 sps:$4 sm:$0xff]  }
 0xcd3   :  { %5511 = vmatprep.mubr.msk.bf16.mxu0 %vm6685_vm13, %v6683_v1 }
 0xd9b   :  { %v7374_v56 = vpop.f32.mrb[32].mxu1 }
 0xd9c   :  { %v5483_v20 = vpop.f32.mrb[33].mxu1 }
 0xd9d   :  { %v3018_v10 = vpop.f32.mrb[34].mxu1  ;;  %v7376_v59 = vpop.f32.mrb[32].mxu0  ;;  %v5903_v20 = vld [vmem:[#allocation21 + $0x54] ss:$8 sps:$4 sm:$0xff]  }
 0xd9e   :  { %v5484_v58 = vpop.f32.mrb[35].mxu1  ;;  %v5489_v61 = vpop.f32.mrb[33].mxu0  ;;  %v5901_v10 = vld [vmem:[#allocation21 + $0x50] ss:$8 sps:$4 sm:$0xff]  }
 0xd9f   :  { %v3064_v40 = vpop.f32.mrb[34].mxu0  ;;  %v5906_v58 = vld [vmem:[#allocation21 + $0x64] ss:$8 sps:$4 sm:$0xff]   ;;  %v5904_v61 = vld [vmem:[#allocation21 + $0x60] ss:$8 sps:$4 sm:$0xff]  }
 0xda0   :  { %v5490_v8 = vpop.f32.mrb[35].mxu0  ;;  %v5909_v40 = vld [vmem:[#allocation21 + $0x74] ss:$8 sps:$4 sm:$0xff]  }
 0xda1   :  { %v5907_v8 = vld [vmem:[#allocation21 + $0x70] ss:$8 sps:$4 sm:$0xff]  }
 0xda3   :  { %v3113_v63 = vpop.f32.mrb[36].mxu1 }
 0xda4   :  { %v5495_v13 = vpop.f32.mrb[37].mxu1  ;;  %v3171_v9 = vsel %vm2509_vm0, %v3113_v63, -inf }
 0xda5   :  { %v3165_v12 = vpop.f32.mrb[36].mxu0  ;;  %3172 = vmax.xlane.f32.xlu0 %v3171_v9  ;;  %v3116_v15 = vpop.f32.mrb[38].mxu1  ;;  %v5910_v13 = vld [vmem:[#allocation21 + $0x80] ss:$8 sps:$4 sm:$0xff]   ;;  %v5915_v9 = vld [vmem:[#allocation21 + $0x94] ss:$8 sps:$4 sm:$0xff]  }
 0xda6   :  { %v5496_v19 = vpop.f32.mrb[39].mxu1  ;;  %v5501_v22 = vpop.f32.mrb[37].mxu0  ;;  %v3174_v1 = vsel %vm2509_vm0, %v3165_v12, -inf  ;;  %v5918_v15 = vld [vmem:[#allocation21 + $0xa4] ss:$8 sps:$4 sm:$0xff]  }
 0xda7   :  { %3175 = vmax.xlane.f32.xlu1 %v3174_v1  ;;  %v3168_v23 = vpop.f32.mrb[38].mxu0  ;;  %v5916_v19 = vld [vmem:[#allocation21 + $0xa0] ss:$8 sps:$4 sm:$0xff]   ;;  %v5921_v22 = vld [vmem:[#allocation21 + $0xb4] ss:$8 sps:$4 sm:$0xff]  }
 0xda8   :  { %v5502_v24 = vpop.f32.mrb[39].mxu0  ;;  %v5919_v1 = vld [vmem:[#allocation21 + $0xb0] ss:$8 sps:$4 sm:$0xff]   ;;  %v5924_v23 = vld [vmem:[#allocation21 + $0xc4] ss:$8 sps:$4 sm:$0xff]  }
 0xda9   :  { %v5922_v24 = vld [vmem:[#allocation21 + $0xc0] ss:$8 sps:$4 sm:$0xff]  }
 0xdb8   :  { %3245 = vrot.lane.b32.xlu1 %v7329_v16, %s6661_s30 }
 0xe32   :  { %v3173_v26 = vpop.xlane.xlu0 %3172 }
 0xe33   :  { %v3177_v28 = vsub.f32 %v3113_v63, %v3173_v26  ;;  %v5912_v63 = vld [vmem:[#allocation21 + $0x84] ss:$8 sps:$4 sm:$0xff]   ;;  %v5927_v26 = vld [vmem:[#allocation21 + $0xd4] ss:$8 sps:$4 sm:$0xff]  }
 0xe34   :  { %v3176_v29 = vpop.xlane.xlu1 %3175 }
 0xe35   :  { %v3179_v30 = vmul.f32 1.442695, %v3177_v28  ;;  %v3178_v31 = vsub.f32 %v3165_v12, %v3176_v29  ;;  %v5913_v12 = vld [vmem:[#allocation21 + $0x90] ss:$8 sps:$4 sm:$0xff]   ;;  %v5928_v29 = vld [vmem:[#allocation21 + $0xe0] ss:$8 sps:$4 sm:$0xff]  }
 0xe36   :  { %v5925_v28 = vld [vmem:[#allocation21 + $0xd0] ss:$8 sps:$4 sm:$0xff]  }
 0xe37   :  { %6202 = vpow2.f32 %v3179_v30  ;;  %v3181_v32 = vmul.f32 1.442695, %v3178_v31  ;;  %v5930_v30 = vld [vmem:[#allocation21 + $0xe4] ss:$8 sps:$4 sm:$0xff]  }
 0xe38   :  { %v3246_v34 = vpop.permute.xlu1 %3245 }
 0xe39   :  { %6204 = vpow2.f32 %v3181_v32  ;;  %v3251_v37 = vsel %vm2537_vm15, %v3246_v34, 0  ;;  %v5933_v32 = vld [vmem:[#allocation21 + $0xf4] ss:$8 sps:$4 sm:$0xff]  }
 0xe3a   :  { %5510 = vmatpush3.bf16.msra.mxu0 %v3251_v37  ;;  %v5931_v37 = vld [vmem:[#allocation21 + $0xf0] ss:$8 sps:$4 sm:$0xff]  }
 0xe41   :  { %v6203_v2 = vpop.eup %6202 }
 0xe42   :  { %v3183_v38 = vsel %vm2509_vm0, %v6203_v2, 0.0 }
 0xe43   :  { %v6205_v42 = vpop.eup %6204  ;;  %3184 = vadd.xlane.f32.xlu0 %v3183_v38 }
 0xe44   :  { %v3186_v43 = vsel %vm2509_vm0, %v6205_v42, 0.0 }
 0xe47   :  { %3187 = vadd.xlane.f32.xlu0 %v3186_v43 }
 0xe5d   :  { %3196 = vrot.lane.b32.xlu0 %v7326_v11, %s6661_s30  ;;  %v5888_v11 = vld [vmem:[#allocation21 + $0x4] ss:$8 sps:$4 sm:$0xff]  }
 0xed0   :  { %v3185_v16 = vpop.xlane.xlu0 %3184 }
 0xed1   :  { %6206 = vrcp.f32 %v3185_v16 }
 0xed4   :  { %v3188_v35 = vpop.xlane.xlu0 %3187 }
 0xed5   :  { %6208 = vrcp.f32 %v3188_v35 }
 0xed8   :  { %v3197_v44 = vpop.permute.xlu0 %3196 }
 0xed9   :  { %v3202_v7 = vsel %vm2537_vm15, %v3197_v44, 0 }
 0xeda   :  { %5504 = vmatpush3.bf16.msra.mxu1 %v3202_v7 }
 0xedb   :  { %v6207_v33 = vpop.eup %6206  ;;  %3519 = vmatprep.subr.bf16.mxu1 %v5888_v11 }
 0xedc   :  { %v3191_v18 = vmul.f32 %v6207_v33, %v6203_v2 }
 0xede   :  { %v3193_v47 = vpack.c.bf16 %v3191_v18, %v3191_v18 }
 0xedf   :  { %v6209_v27 = vpop.eup %6208 }
 0xee0   :  { %v3192_v39 = vmul.f32 %v6209_v27, %v6205_v42  ;;  %5506 = vmatmul.mubr.msk.bf16.vlgmr.msra.gmra.mrb[40].mxu1 %vm2509_vm0, %v3193_v47 }
 0xee1   :  { %3520 = vmatpush1.bf16.msra.mxu1 %v5886_v21 }
 0xee2   :  { %v3194_v45 = vpack.c.bf16 %v3192_v39, %v3192_v39  ;;  %3521 = vmatprep.subr.bf16.mxu1 %v5891_v48 }
 0xee4   :  { %5512 = vmatmul.mubr.msk.bf16.vlgmr.msra.gmra.mrb[40].mxu0 %vm2509_vm0, %v3194_v45 }
 0xee5   :  { %3522 = vmatpush1.bf16.msra.mxu1 %v5889_v53 }
 0xee6   :  { %3523 = vmatprep.subr.bf16.mxu1 %v5894_v50 }
 0xee9   :  { %3524 = vmatpush1.bf16.msra.mxu1 %v5892_v54 }
 0xeea   :  { %3525 = vmatprep.subr.bf16.mxu1 %v5897_v51 }
 0xeed   :  { %3526 = vmatpush1.bf16.msra.mxu1 %v5895_v49 }
 0xeee   :  { %3527 = vmatprep.subr.bf16.mxu1 %v5900_v55 }
 0xef1   :  { %3528 = vmatpush1.bf16.msra.mxu1 %v5898_v25 }
 0xef2   :  { %3529 = vmatprep.subr.bf16.mxu1 %v5903_v20 }
 0xef5   :  { %3530 = vmatpush1.bf16.msra.mxu1 %v5901_v10 }
 0xef6   :  { %3531 = vmatprep.subr.bf16.mxu1 %v5906_v58 }
 0xef9   :  { %3532 = vmatpush1.bf16.msra.mxu1 %v5904_v61 }
 0xefa   :  { %3533 = vmatprep.subr.bf16.mxu1 %v5909_v40  ;;  %v5934_v40 = vld [vmem:[#allocation27] ss:$16 sps:$4 sm:$0xff]  }
 0xefd   :  { %3534 = vmatpush1.bf16.msra.mxu1 %v5907_v8  ;;  %v5936_v8 = vld [vmem:[#allocation27 + $0x4] ss:$16 sps:$4 sm:$0xff]  }
 0xefe   :  { %3535 = vmatprep.subr.bf16.mxu1 %v5912_v63  ;;  %v5937_v63 = vld [vmem:[#allocation27 + $0x8] ss:$16 sps:$4 sm:$0xff]   ;;  %4038 = vmatprep.subr.bf16.mxu0 %v5936_v8  ;;  %v5994_v8 = vld [vmem:[#allocation27 + $0x140] ss:$16 sps:$4 sm:$0xff]  }
 0xeff   :  { %4039 = vmatpush1.bf16.msra.mxu0 %v5934_v40  ;;  %v5999_v40 = vld [vmem:[#allocation27 + $0x14c] ss:$16 sps:$4 sm:$0xff]  }
 0xf01   :  { %3536 = vmatpush1.bf16.msra.mxu1 %v5910_v13  ;;  %v5942_v13 = vld [vmem:[#allocation27 + $0x24] ss:$16 sps:$4 sm:$0xff]  }
 0xf02   :  { %3537 = vmatprep.subr.bf16.mxu1 %v5915_v9  ;;  %v5945_v9 = vld [vmem:[#allocation27 + $0x2c] ss:$16 sps:$4 sm:$0xff]   ;;  %4040 = vmatprep.subr.bf16.mxu0 %v5942_v13 }
 0xf03   :  { %v6005_v13 = vld [vmem:[#allocation27 + $0x16c] ss:$16 sps:$4 sm:$0xff]  }
 0xf05   :  { %3538 = vmatpush1.bf16.msra.mxu1 %v5913_v12  ;;  %v5948_v12 = vld [vmem:[#allocation27 + $0x44] ss:$16 sps:$4 sm:$0xff]  }
 0xf06   :  { %3539 = vmatprep.subr.bf16.mxu1 %v5918_v15  ;;  %v5951_v15 = vld [vmem:[#allocation27 + $0x4c] ss:$16 sps:$4 sm:$0xff]  }
 0xf09   :  { %3540 = vmatpush1.bf16.msra.mxu1 %v5916_v19  ;;  %v5946_v19 = vld [vmem:[#allocation27 + $0x40] ss:$16 sps:$4 sm:$0xff]  }
 0xf0a   :  { %3541 = vmatprep.subr.bf16.mxu1 %v5921_v22  ;;  %v5949_v22 = vld [vmem:[#allocation27 + $0x48] ss:$16 sps:$4 sm:$0xff]  }
 0xf0d   :  { %3542 = vmatpush1.bf16.msra.mxu1 %v5919_v1  ;;  %v5954_v1 = vld [vmem:[#allocation27 + $0x64] ss:$16 sps:$4 sm:$0xff]  }
 0xf0e   :  { %3543 = vmatprep.subr.bf16.mxu1 %v5924_v23  ;;  %v5957_v23 = vld [vmem:[#allocation27 + $0x6c] ss:$16 sps:$4 sm:$0xff]  }
 0xf11   :  { %3544 = vmatpush1.bf16.msra.mxu1 %v5922_v24  ;;  %v5952_v24 = vld [vmem:[#allocation27 + $0x60] ss:$16 sps:$4 sm:$0xff]  }
 0xf12   :  { %3545 = vmatprep.subr.bf16.mxu1 %v5927_v26  ;;  %v5955_v26 = vld [vmem:[#allocation27 + $0x68] ss:$16 sps:$4 sm:$0xff]  }
 0xf15   :  { %3546 = vmatpush1.bf16.msra.mxu1 %v5925_v28  ;;  %v5960_v28 = vld [vmem:[#allocation27 + $0x84] ss:$16 sps:$4 sm:$0xff]  }
 0xf16   :  { %3547 = vmatprep.subr.bf16.mxu1 %v5930_v30  ;;  %v5958_v30 = vld [vmem:[#allocation27 + $0x80] ss:$16 sps:$4 sm:$0xff]  }
 0xf19   :  { %3548 = vmatpush1.bf16.msra.mxu1 %v5928_v29  ;;  %v5963_v29 = vld [vmem:[#allocation27 + $0x8c] ss:$16 sps:$4 sm:$0xff]  }
 0xf1a   :  { %3549 = vmatprep.subr.bf16.mxu1 %v5933_v32  ;;  %v5966_v32 = vld [vmem:[#allocation27 + $0xa4] ss:$16 sps:$4 sm:$0xff]  }
 0xf1d   :  { %3550 = vmatpush1.bf16.msra.mxu1 %v5931_v37  ;;  %v5964_v37 = vld [vmem:[#allocation27 + $0xa0] ss:$16 sps:$4 sm:$0xff]  }
 0xfb3   :  { %v3238_v31 = vpop.f32.mrb[40].mxu1 }
 0xfb4   :  { %v5507_v34 = vpop.f32.mrb[41].mxu1 }
 0xfb5   :  { %v3241_v2 = vpop.f32.mrb[42].mxu1  ;;  %v5969_v34 = vld [vmem:[#allocation27 + $0xac] ss:$16 sps:$4 sm:$0xff]  }
 0xfb6   :  { %v5508_v38 = vpop.f32.mrb[43].mxu1  ;;  %v5967_v2 = vld [vmem:[#allocation27 + $0xa8] ss:$16 sps:$4 sm:$0xff]  }
 0xfb7   :  { %v3287_v42 = vpop.f32.mrb[40].mxu0  ;;  %v5972_v38 = vld [vmem:[#allocation27 + $0xc4] ss:$16 sps:$4 sm:$0xff]  }
 0xfb8   :  { %v5570_v43 = vpack.i.bf16 %v3287_v42, %v3238_v31  ;;  %v5513_v16 = vpop.f32.mrb[41].mxu0  ;;  %v5961_v31 = vld [vmem:[#allocation27 + $0x88] ss:$16 sps:$4 sm:$0xff]   ;;  %v5975_v42 = vld [vmem:[#allocation27 + $0xcc] ss:$16 sps:$4 sm:$0xff]  }
 0xfb9   :  { %v3290_v35 = vpop.f32.mrb[42].mxu0  ;;  %v5973_v16 = vld [vmem:[#allocation27 + $0xc8] ss:$16 sps:$4 sm:$0xff]  }
 0xfba   :  { %v5514_v44 = vpop.f32.mrb[43].mxu0  ;;  %5571 = vrot.lane.b32.xlu1 %v5570_v43, %s6661_s30  ;;  %v5970_v43 = vld [vmem:[#allocation27 + $0xc0] ss:$16 sps:$4 sm:$0xff]   ;;  %v5978_v35 = vld [vmem:[#allocation27 + $0xe4] ss:$16 sps:$4 sm:$0xff]  }
 0xfbb   :  { %v5981_v44 = vld [vmem:[#allocation27 + $0xec] ss:$16 sps:$4 sm:$0xff]  }
 0xfbe   :  { %5576 = vrot.lane.b32.xlu1 %v5575_v6, %s6661_s30  ;;  %v3347_v6 = vld [vmem:[#allocation22] sm:$0x3] }
 0xfbf   :  { %v3352_v53 = vrot.slane %v3347_v6, %v7084_v0 }
0x102c   :  { %v5572_v7 = vpop.permute.xlu1 %5571 }
0x102d   :  { %v5574_v33 = vunpack.i.h.bf16 %v5572_v7  ;;  %v5573_v18 = vunpack.i.l.bf16 %v5572_v7  ;;  %v5976_v7 = vld [vmem:[#allocation27 + $0xe0] ss:$16 sps:$4 sm:$0xff]  }
0x102f   :  { %v3311_v47 = vsel %vm2416_vm14, %v7374_v56, %v5573_v18  ;;  %v3312_v27 = vsel %vm2416_vm14, %v7376_v59, %v5574_v33  ;;  %v3356_v56 = vrot.slane %v3347_v6, %v7090_v3  ;;  %v5979_v33 = vld [vmem:[#allocation27 + $0xe8] ss:$16 sps:$4 sm:$0xff]   ;;  %v5984_v18 = vld [vmem:[#allocation27 + $0x104] ss:$16 sps:$4 sm:$0xff]  }
0x1030   :  { %v5577_v39 = vpop.permute.xlu1 %5576  ;;  %v3314_v45 = vpack.c.bf16 %v3312_v27, %v3311_v47  ;;  %v5987_v47 = vld [vmem:[#allocation27 + $0x10c] ss:$16 sps:$4 sm:$0xff]   ;;  %v5982_v27 = vld [vmem:[#allocation27 + $0x100] ss:$16 sps:$4 sm:$0xff]  }
0x1031   :  { %v5579_v21 = vunpack.i.h.bf16 %v5577_v39  ;;  %v5578_v11 = vunpack.i.l.bf16 %v5577_v39  ;;  %v5985_v39 = vld [vmem:[#allocation27 + $0x108] ss:$16 sps:$4 sm:$0xff]  }
0x1032   :  { %3551 = vmatprep.mubr.bf16.mxu1 %v3314_v45 }
0x1033   :  { %v3310_v48 = vsel %vm2416_vm14, %v7286_v17, %v5579_v21  ;;  %v3309_v60 = vsel %vm2416_vm14, %v7284_v4, %v5578_v11 }
0x1034   :  { %v3313_v5 = vpack.c.bf16 %v3310_v48, %v3309_v60 }
0x1036   :  { %3552 = vmatmul.mubr.bf16.vlgmr.msra.gmra.mrb[44].mxu1 %v3313_v5 }
0x1109   :  { %v3553_v50 = vpop.f32.mrb[44].mxu1 }
0x110a   :  { %v3554_v59 = vadd.f32 %v3553_v50, %v3352_v53  ;;  %v3555_v54 = vpop.f32.mrb[45].mxu1 }
0x110b   :  { %v3556_v51 = vadd.f32 %v3555_v54, %v3356_v56  ;;  %v3557_v49 = vpop.f32.mrb[46].mxu1 }
0x110c   :  { %v7406_v55 = vadd.f32 %v3554_v59, %v7182_v52  ;;  %v3558_v25 = vadd.f32 %v3557_v49, %v3352_v53  ;;  %v3559_v17 = vpop.f32.mrb[47].mxu1 }
0x110d   :  { %v7409_v20 = vadd.f32 %v3556_v51, %v7184_v57  ;;  %v3560_v4 = vadd.f32 %v3559_v17, %v3356_v56  ;;  %v5939_v57 = vld [vmem:[#allocation27 + $0xc] ss:$16 sps:$4 sm:$0xff]  }
0x110e   :  { %v7412_v10 = vadd.f32 %v3558_v25, %v7189_v14  ;;  %4081 = vmatprep.subr.bf16.mxu1 %v5939_v57  ;;  %v5940_v14 = vld [vmem:[#allocation27 + $0x20] ss:$16 sps:$4 sm:$0xff]   ;;  %v5990_v25 = vld [vmem:[#allocation27 + $0x124] ss:$16 sps:$4 sm:$0xff]   ;;  %v5993_v17 = vld [vmem:[#allocation27 + $0x12c] ss:$16 sps:$4 sm:$0xff]  }
0x110f   :  { %v7415_v58 = vadd.f32 %v3560_v4, %v7191_v41  ;;  %v3568_v61 = vadd.f32 %v7409_v20, %v7406_v55  ;;  %4082 = vmatpush1.bf16.msra.mxu1 %v5937_v63  ;;  %v5943_v41 = vld [vmem:[#allocation27 + $0x28] ss:$16 sps:$4 sm:$0xff]   ;;  %4041 = vmatpush1.bf16.msra.mxu0 %v5940_v14  ;;  %v5988_v4 = vld [vmem:[#allocation27 + $0x120] ss:$16 sps:$4 sm:$0xff]   ;;  %v6002_v57 = vld [vmem:[#allocation27 + $0x164] ss:$16 sps:$4 sm:$0xff]  }
0x1110   :  { %4083 = vmatprep.subr.bf16.mxu1 %v5945_v9  ;;  %4042 = vmatprep.subr.bf16.mxu0 %v5948_v12  ;;  %v5997_v63 = vld [vmem:[#allocation27 + $0x148] ss:$16 sps:$4 sm:$0xff]   ;;  %v6000_v9 = vld [vmem:[#allocation27 + $0x160] ss:$16 sps:$4 sm:$0xff]   ;;  %v6011_v12 = vld [vmem:[#allocation27 + $0x18c] ss:$16 sps:$4 sm:$0xff]  }
0x1111   :  { %3569 = vadd.xlane.f32.xlu0 %v3568_v61  ;;  %v3571_v52 = vadd.f32 %v7415_v58, %v7412_v10  ;;  %v5991_v61 = vld [vmem:[#allocation27 + $0x128] ss:$16 sps:$4 sm:$0xff]  }
0x1112   :  { %v6003_v14 = vld [vmem:[#allocation27 + $0x168] ss:$16 sps:$4 sm:$0xff]  }
0x1113   :  { %3572 = vadd.xlane.f32.xlu1 %v3571_v52  ;;  %4084 = vmatpush1.bf16.msra.mxu1 %v5943_v41  ;;  %v5996_v52 = vld [vmem:[#allocation27 + $0x144] ss:$16 sps:$4 sm:$0xff]  }
0x1114   :  { %4085 = vmatprep.subr.bf16.mxu1 %v5951_v15  ;;  %4043 = vmatpush1.bf16.msra.mxu0 %v5946_v19  ;;  %v6008_v41 = vld [vmem:[#allocation27 + $0x184] ss:$16 sps:$4 sm:$0xff]   ;;  %v6006_v15 = vld [vmem:[#allocation27 + $0x180] ss:$16 sps:$4 sm:$0xff]   ;;  %v6009_v19 = vld [vmem:[#allocation27 + $0x188] ss:$16 sps:$4 sm:$0xff]  }
0x1115   :  { %4044 = vmatprep.subr.bf16.mxu0 %v5954_v1  ;;  %v6017_v1 = vld [vmem:[#allocation27 + $0x1ac] ss:$16 sps:$4 sm:$0xff]  }
0x1117   :  { %4086 = vmatpush1.bf16.msra.mxu1 %v5949_v22  ;;  %v6014_v22 = vld [vmem:[#allocation27 + $0x1a4] ss:$16 sps:$4 sm:$0xff]  }
0x1118   :  { %4087 = vmatprep.subr.bf16.mxu1 %v5957_v23  ;;  %4045 = vmatpush1.bf16.msra.mxu0 %v5952_v24  ;;  %v6012_v23 = vld [vmem:[#allocation27 + $0x1a0] ss:$16 sps:$4 sm:$0xff]   ;;  %v6015_v24 = vld [vmem:[#allocation27 + $0x1a8] ss:$16 sps:$4 sm:$0xff]  }
0x1119   :  { %4046 = vmatprep.subr.bf16.mxu0 %v5960_v28  ;;  %v6018_v28 = vld [vmem:[#allocation27 + $0x1c0] ss:$16 sps:$4 sm:$0xff]  }
0x111b   :  { %4088 = vmatpush1.bf16.msra.mxu1 %v5955_v26  ;;  %v6020_v26 = vld [vmem:[#allocation27 + $0x1c4] ss:$16 sps:$4 sm:$0xff]  }
0x111c   :  { %4089 = vmatprep.subr.bf16.mxu1 %v5963_v29  ;;  %4047 = vmatpush1.bf16.msra.mxu0 %v5958_v30  ;;  %v6021_v29 = vld [vmem:[#allocation27 + $0x1c8] ss:$16 sps:$4 sm:$0xff]   ;;  %v6023_v30 = vld [vmem:[#allocation27 + $0x1cc] ss:$16 sps:$4 sm:$0xff]  }
0x111d   :  { %4048 = vmatprep.subr.bf16.mxu0 %v5966_v32  ;;  %v6029_v32 = vld [vmem:[#allocation27 + $0x1ec] ss:$16 sps:$4 sm:$0xff]  }
0x111f   :  { %4090 = vmatpush1.bf16.msra.mxu1 %v5961_v31  ;;  %v6026_v31 = vld [vmem:[#allocation27 + $0x1e4] ss:$16 sps:$4 sm:$0xff]  }
0x1120   :  { %4091 = vmatprep.subr.bf16.mxu1 %v5969_v34  ;;  %4049 = vmatpush1.bf16.msra.mxu0 %v5964_v37  ;;  %v6024_v34 = vld [vmem:[#allocation27 + $0x1e0] ss:$16 sps:$4 sm:$0xff]   ;;  %v6027_v37 = vld [vmem:[#allocation27 + $0x1e8] ss:$16 sps:$4 sm:$0xff]  }
0x1121   :  { %4050 = vmatprep.subr.bf16.mxu0 %v5972_v38 }
0x1123   :  { %4092 = vmatpush1.bf16.msra.mxu1 %v5967_v2  ;;  %v6032_v2 = vld [vmem:[#allocation30 + $0x4] ss:$8 sps:$4 sm:$0xff]  }
0x1124   :  { %4093 = vmatprep.subr.bf16.mxu1 %v5975_v42  ;;  %4051 = vmatpush1.bf16.msra.mxu0 %v5970_v43 }
0x1125   :  { %4052 = vmatprep.subr.bf16.mxu0 %v5978_v35 }
0x1127   :  { %4094 = vmatpush1.bf16.msra.mxu1 %v5973_v16 }
0x1128   :  { %4095 = vmatprep.subr.bf16.mxu1 %v5981_v44  ;;  %4053 = vmatpush1.bf16.msra.mxu0 %v5976_v7  ;;  %v3566_v7 = vld [vmem:[#allocation24] sm:$0x3] }
0x1129   :  { %4054 = vmatprep.subr.bf16.mxu0 %v5984_v18 }
0x112b   :  { %4096 = vmatpush1.bf16.msra.mxu1 %v5979_v33 }
0x112c   :  { %4097 = vmatprep.subr.bf16.mxu1 %v5987_v47  ;;  %4055 = vmatpush1.bf16.msra.mxu0 %v5982_v27  ;;  %v3567_v47 = vld [vmem:[#allocation25] sm:$0x3] }
0x112d   :  { %4056 = vmatprep.subr.bf16.mxu0 %v5990_v25 }
0x112f   :  { %4098 = vmatpush1.bf16.msra.mxu1 %v5985_v39  ;;  %v3604_v39 = vrot.slane %v3566_v7, %v7084_v0 }
0x1130   :  { %4099 = vmatprep.subr.bf16.mxu1 %v5993_v17  ;;  %4057 = vmatpush1.bf16.msra.mxu0 %v5988_v4 }
0x1131   :  { %4058 = vmatprep.subr.bf16.mxu0 %v5996_v52  ;;  %v6030_v52 = vld [vmem:[#allocation30] ss:$8 sps:$4 sm:$0xff]  }
0x1133   :  { %4100 = vmatpush1.bf16.msra.mxu1 %v5991_v61 }
0x1134   :  { %4101 = vmatprep.subr.bf16.mxu1 %v5999_v40  ;;  %4059 = vmatpush1.bf16.msra.mxu0 %v5994_v8  ;;  %v6035_v40 = vld [vmem:[#allocation30 + $0x14] ss:$8 sps:$4 sm:$0xff]   ;;  %v6036_v8 = vld [vmem:[#allocation30 + $0x20] ss:$8 sps:$4 sm:$0xff]  }
0x1135   :  { %4060 = vmatprep.subr.bf16.mxu0 %v6002_v57  ;;  %v6039_v57 = vld [vmem:[#allocation30 + $0x30] ss:$8 sps:$4 sm:$0xff]  }
0x1137   :  { %4102 = vmatpush1.bf16.msra.mxu1 %v5997_v63  ;;  %v6041_v63 = vld [vmem:[#allocation30 + $0x34] ss:$8 sps:$4 sm:$0xff]  }
0x1138   :  { %4103 = vmatprep.subr.bf16.mxu1 %v6005_v13  ;;  %4061 = vmatpush1.bf16.msra.mxu0 %v6000_v9  ;;  %v6044_v13 = vld [vmem:[#allocation30 + $0x44] ss:$8 sps:$4 sm:$0xff]   ;;  %v6042_v9 = vld [vmem:[#allocation30 + $0x40] ss:$8 sps:$4 sm:$0xff]  }
0x1139   :  { %4062 = vmatprep.subr.bf16.mxu0 %v6008_v41  ;;  %v6045_v41 = vld [vmem:[#allocation30 + $0x50] ss:$8 sps:$4 sm:$0xff]  }
0x113b   :  { %4104 = vmatpush1.bf16.msra.mxu1 %v6003_v14  ;;  %v6047_v14 = vld [vmem:[#allocation30 + $0x54] ss:$8 sps:$4 sm:$0xff]  }
0x113c   :  { %4105 = vmatprep.subr.bf16.mxu1 %v6011_v12  ;;  %4063 = vmatpush1.bf16.msra.mxu0 %v6006_v15  ;;  %v6050_v12 = vld [vmem:[#allocation30 + $0x64] ss:$8 sps:$4 sm:$0xff]   ;;  %v6048_v15 = vld [vmem:[#allocation30 + $0x60] ss:$8 sps:$4 sm:$0xff]  }
0x113d   :  { %4064 = vmatprep.subr.bf16.mxu0 %v6014_v22  ;;  %v6051_v22 = vld [vmem:[#allocation30 + $0x70] ss:$8 sps:$4 sm:$0xff]  }
0x113f   :  { %4106 = vmatpush1.bf16.msra.mxu1 %v6009_v19  ;;  %v6053_v19 = vld [vmem:[#allocation30 + $0x74] ss:$8 sps:$4 sm:$0xff]  }
0x1140   :  { %4107 = vmatprep.subr.bf16.mxu1 %v6017_v1  ;;  %4065 = vmatpush1.bf16.msra.mxu0 %v6012_v23  ;;  %v6056_v1 = vld [vmem:[#allocation30 + $0x84] ss:$8 sps:$4 sm:$0xff]   ;;  %v6054_v23 = vld [vmem:[#allocation30 + $0x80] ss:$8 sps:$4 sm:$0xff]  }
0x1141   :  { %4066 = vmatprep.subr.bf16.mxu0 %v6020_v26  ;;  %v6057_v26 = vld [vmem:[#allocation30 + $0x90] ss:$8 sps:$4 sm:$0xff]  }
0x1143   :  { %4108 = vmatpush1.bf16.msra.mxu1 %v6015_v24  ;;  %v6059_v24 = vld [vmem:[#allocation30 + $0x94] ss:$8 sps:$4 sm:$0xff]  }
0x1144   :  { %4109 = vmatprep.subr.bf16.mxu1 %v6023_v30  ;;  %4067 = vmatpush1.bf16.msra.mxu0 %v6018_v28  ;;  %v6062_v28 = vld [vmem:[#allocation30 + $0xa4] ss:$8 sps:$4 sm:$0xff]   ;;  %v6065_v30 = vld [vmem:[#allocation30 + $0xb4] ss:$8 sps:$4 sm:$0xff]  }
0x1145   :  { %4068 = vmatprep.subr.bf16.mxu0 %v6026_v31  ;;  %v6063_v31 = vld [vmem:[#allocation30 + $0xb0] ss:$8 sps:$4 sm:$0xff]  }
0x1147   :  { %4110 = vmatpush1.bf16.msra.mxu1 %v6021_v29  ;;  %v6060_v29 = vld [vmem:[#allocation30 + $0xa0] ss:$8 sps:$4 sm:$0xff]  }
0x1148   :  { %4111 = vmatprep.subr.bf16.mxu1 %v6029_v32  ;;  %4069 = vmatpush1.bf16.msra.mxu0 %v6024_v34  ;;  %v6068_v32 = vld [vmem:[#allocation30 + $0xc4] ss:$8 sps:$4 sm:$0xff]   ;;  %v6066_v34 = vld [vmem:[#allocation30 + $0xc0] ss:$8 sps:$4 sm:$0xff]  }
0x1149   :  { %4532 = vmatprep.subr.bf16.mxu0 %v6032_v2  ;;  %v6069_v2 = vld [vmem:[#allocation30 + $0xd0] ss:$8 sps:$4 sm:$0xff]  }
0x114b   :  { %4112 = vmatpush1.bf16.msra.mxu1 %v6027_v37  ;;  %v6071_v37 = vld [vmem:[#allocation30 + $0xd4] ss:$8 sps:$4 sm:$0xff]  }
0x119e   :  { %v3570_v45 = vpop.xlane.xlu0 %3569 }
0x119f   :  { %v3574_v21 = vmul.f32 0.00390625, %v3570_v45  ;;  %v3608_v45 = vrot.slane %v3566_v7, %v7090_v3 }
0x11a0   :  { %v3573_v11 = vpop.xlane.xlu1 %3572 }
0x11a1   :  { %v7422_v48 = vsub.f32 %v7406_v55, %v3574_v21  ;;  %v7425_v60 = vsub.f32 %v7409_v20, %v3574_v21  ;;  %v3575_v5 = vmul.f32 0.00390625, %v3573_v11  ;;  %v3619_v11 = vrot.slane %v3567_v47, %v7084_v0 }
0x11a3   :  { %v7428_v6 = vsub.f32 %v7412_v10, %v3575_v5  ;;  %v7431_v53 = vsub.f32 %v7415_v58, %v3575_v5  ;;  %v3580_v56 = vmul.f32 %v7422_v48, %v7422_v48  ;;  %v3581_v50 = vmul.f32 %v7425_v60, %v7425_v60 }
0x11a4   :  { %v3623_v5 = vrot.slane %v3567_v47, %v7090_v3 }
0x11a5   :  { %v3584_v59 = vadd.f32 %v3581_v50, %v3580_v56  ;;  %v3582_v54 = vmul.f32 %v7428_v6, %v7428_v6  ;;  %v3583_v51 = vmul.f32 %v7431_v53, %v7431_v53 }
0x11a7   :  { %3585 = vadd.xlane.f32.xlu0 %v3584_v59  ;;  %v3587_v49 = vadd.f32 %v3583_v51, %v3582_v54 }
0x11ab   :  { %3588 = vadd.xlane.f32.xlu0 %v3587_v49 }
0x1234   :  { %v3586_v38 = vpop.xlane.xlu0 %3585 }
0x1235   :  { %v3590_v42 = vmul.f32 0.00390625, %v3586_v38  ;;  %v6074_v38 = vld [vmem:[#allocation30 + $0xe4] ss:$8 sps:$4 sm:$0xff]  }
0x1237   :  { %v3592_v43 = vadd.f32 1e-05, %v3590_v42  ;;  %v6072_v42 = vld [vmem:[#allocation30 + $0xe0] ss:$8 sps:$4 sm:$0xff]  }
0x1238   :  { %v3589_v16 = vpop.xlane.xlu0 %3588 }
0x1239   :  { %6210 = vrsqrt.f32 %v3592_v43  ;;  %v3591_v35 = vmul.f32 0.00390625, %v3589_v16  ;;  %v6077_v43 = vld [vmem:[#allocation30 + $0xf4] ss:$8 sps:$4 sm:$0xff]   ;;  %v6075_v16 = vld [vmem:[#allocation30 + $0xf0] ss:$8 sps:$4 sm:$0xff]  }
0x123b   :  { %v3593_v44 = vadd.f32 1e-05, %v3591_v35  ;;  %v6080_v35 = vld [vmem:[#allocation30 + $0x104] ss:$8 sps:$4 sm:$0xff]  }
0x123d   :  { %6212 = vrsqrt.f32 %v3593_v44  ;;  %v3696_v44 = vld [vmem:[#allocation28] sm:$0xf] }
0x123e   :  { %v3701_v7 = vrot.slane %v3696_v44, %v7084_v0  ;;  %v3713_v47 = vrot.slane %v3696_v44, %v1785_v36 }
0x1243   :  { %v6211_v33 = vpop.eup %6210 }
0x1244   :  { %v3596_v18 = vmul.f32 %v6211_v33, %v7422_v48  ;;  %v3597_v27 = vmul.f32 %v6211_v33, %v7425_v60  ;;  %v3709_v33 = vrot.slane %v3696_v44, %v1781_v46 }
0x1246   :  { %v3612_v59 = vmul.f32 %v3608_v45, %v3597_v27  ;;  %v3611_v54 = vmul.f32 %v3604_v39, %v3596_v18  ;;  %v3705_v18 = vrot.slane %v3696_v44, %v7090_v3  ;;  %v6119_v44 = vld [vmem:[#allocation30 + $0x1d4] ss:$8 sps:$4 sm:$0xff]  }
0x1247   :  { %v6213_v21 = vpop.eup %6212 }
0x1248   :  { %v3598_v56 = vmul.f32 %v6213_v21, %v7428_v6  ;;  %v3599_v50 = vmul.f32 %v6213_v21, %v7431_v53  ;;  %v3627_v49 = vadd.f32 %v3623_v5, %v3612_v59  ;;  %v3626_v60 = vadd.f32 %v3619_v11, %v3611_v54  ;;  %v6033_v6 = vld [vmem:[#allocation30 + $0x10] ss:$8 sps:$4 sm:$0xff]   ;;  %v6038_v53 = vld [vmem:[#allocation30 + $0x24] ss:$8 sps:$4 sm:$0xff]  }
0x124a   :  { %v3614_v51 = vmul.f32 %v3608_v45, %v3599_v50  ;;  %v3613_v48 = vmul.f32 %v3604_v39, %v3598_v56 }
0x124c   :  { %v3629_v25 = vadd.f32 %v3623_v5, %v3614_v51  ;;  %v3628_v17 = vadd.f32 %v3619_v11, %v3613_v48 }
0x124e   :  { %v3631_v4 = vpack.c.bf16 %v3629_v25, %v3627_v49  ;;  %v3630_v61 = vpack.c.bf16 %v3628_v17, %v3626_v60 }
0x1250   :  { %4070 = vmatprep.mubr.bf16.mxu0 %v3631_v4  ;;  %4113 = vmatprep.mubr.bf16.mxu1 %v3631_v4 }
0x1251   :  { %4071 = vmatmul.mubr.bf16.vlgmr.msra.gmra.mrb[44].mxu0 %v3630_v61  ;;  %4114 = vmatmul.mubr.bf16.vlgmr.msra.gmra.mrb[48].mxu1 %v3630_v61 }
0x1252   :  { %4533 = vmatpush1.bf16.msra.mxu0 %v6030_v52 }
0x1253   :  { %4534 = vmatprep.subr.bf16.mxu0 %v6035_v40 }
0x1256   :  { %4535 = vmatpush1.bf16.msra.mxu0 %v6033_v6 }
0x1257   :  { %4536 = vmatprep.subr.bf16.mxu0 %v6038_v53 }
0x125a   :  { %4537 = vmatpush1.bf16.msra.mxu0 %v6036_v8 }
0x125b   :  { %4538 = vmatprep.subr.bf16.mxu0 %v6041_v63 }
0x125e   :  { %4539 = vmatpush1.bf16.msra.mxu0 %v6039_v57 }
0x125f   :  { %4540 = vmatprep.subr.bf16.mxu0 %v6044_v13  ;;  %v6078_v13 = vld [vmem:[#allocation30 + $0x100] ss:$8 sps:$4 sm:$0xff]  }
0x1262   :  { %4541 = vmatpush1.bf16.msra.mxu0 %v6042_v9  ;;  %v6083_v9 = vld [vmem:[#allocation30 + $0x114] ss:$8 sps:$4 sm:$0xff]  }
0x1263   :  { %4542 = vmatprep.subr.bf16.mxu0 %v6047_v14  ;;  %v6081_v14 = vld [vmem:[#allocation30 + $0x110] ss:$8 sps:$4 sm:$0xff]  }
0x1266   :  { %4543 = vmatpush1.bf16.msra.mxu0 %v6045_v41  ;;  %v6086_v41 = vld [vmem:[#allocation30 + $0x124] ss:$8 sps:$4 sm:$0xff]  }
0x1267   :  { %4544 = vmatprep.subr.bf16.mxu0 %v6050_v12  ;;  %v6084_v12 = vld [vmem:[#allocation30 + $0x120] ss:$8 sps:$4 sm:$0xff]  }
0x126a   :  { %4545 = vmatpush1.bf16.msra.mxu0 %v6048_v15  ;;  %v6089_v15 = vld [vmem:[#allocation30 + $0x134] ss:$8 sps:$4 sm:$0xff]  }
0x126b   :  { %4546 = vmatprep.subr.bf16.mxu0 %v6053_v19  ;;  %v6087_v19 = vld [vmem:[#allocation30 + $0x130] ss:$8 sps:$4 sm:$0xff]  }
0x126e   :  { %4547 = vmatpush1.bf16.msra.mxu0 %v6051_v22  ;;  %v6092_v22 = vld [vmem:[#allocation30 + $0x144] ss:$8 sps:$4 sm:$0xff]  }
0x126f   :  { %4548 = vmatprep.subr.bf16.mxu0 %v6056_v1  ;;  %v6090_v1 = vld [vmem:[#allocation30 + $0x140] ss:$8 sps:$4 sm:$0xff]  }
0x1272   :  { %4549 = vmatpush1.bf16.msra.mxu0 %v6054_v23  ;;  %v6095_v23 = vld [vmem:[#allocation30 + $0x154] ss:$8 sps:$4 sm:$0xff]  }
0x1273   :  { %4550 = vmatprep.subr.bf16.mxu0 %v6059_v24  ;;  %v6093_v24 = vld [vmem:[#allocation30 + $0x150] ss:$8 sps:$4 sm:$0xff]  }
0x1276   :  { %4551 = vmatpush1.bf16.msra.mxu0 %v6057_v26  ;;  %v6098_v26 = vld [vmem:[#allocation30 + $0x164] ss:$8 sps:$4 sm:$0xff]  }
0x1277   :  { %4552 = vmatprep.subr.bf16.mxu0 %v6062_v28  ;;  %v6096_v28 = vld [vmem:[#allocation30 + $0x160] ss:$8 sps:$4 sm:$0xff]  }
0x127a   :  { %4553 = vmatpush1.bf16.msra.mxu0 %v6060_v29  ;;  %v6101_v29 = vld [vmem:[#allocation30 + $0x174] ss:$8 sps:$4 sm:$0xff]  }
0x127b   :  { %4554 = vmatprep.subr.bf16.mxu0 %v6065_v30  ;;  %v6099_v30 = vld [vmem:[#allocation30 + $0x170] ss:$8 sps:$4 sm:$0xff]  }
0x127e   :  { %4555 = vmatpush1.bf16.msra.mxu0 %v6063_v31  ;;  %v6104_v31 = vld [vmem:[#allocation30 + $0x184] ss:$8 sps:$4 sm:$0xff]  }
0x127f   :  { %4556 = vmatprep.subr.bf16.mxu0 %v6068_v32  ;;  %v6102_v32 = vld [vmem:[#allocation30 + $0x180] ss:$8 sps:$4 sm:$0xff]  }
0x1282   :  { %4557 = vmatpush1.bf16.msra.mxu0 %v6066_v34  ;;  %v6107_v34 = vld [vmem:[#allocation30 + $0x194] ss:$8 sps:$4 sm:$0xff]  }
0x1283   :  { %4558 = vmatprep.subr.bf16.mxu0 %v6071_v37  ;;  %v6105_v37 = vld [vmem:[#allocation30 + $0x190] ss:$8 sps:$4 sm:$0xff]  }
0x1286   :  { %4559 = vmatpush1.bf16.msra.mxu0 %v6069_v2  ;;  %v6110_v2 = vld [vmem:[#allocation30 + $0x1a4] ss:$8 sps:$4 sm:$0xff]  }
0x1287   :  { %4560 = vmatprep.subr.bf16.mxu0 %v6074_v38  ;;  %v6108_v38 = vld [vmem:[#allocation30 + $0x1a0] ss:$8 sps:$4 sm:$0xff]  }
0x128a   :  { %4561 = vmatpush1.bf16.msra.mxu0 %v6072_v42  ;;  %v6113_v42 = vld [vmem:[#allocation30 + $0x1b4] ss:$8 sps:$4 sm:$0xff]  }
0x128b   :  { %4562 = vmatprep.subr.bf16.mxu0 %v6077_v43  ;;  %v6111_v43 = vld [vmem:[#allocation30 + $0x1b0] ss:$8 sps:$4 sm:$0xff]  }
0x128e   :  { %4563 = vmatpush1.bf16.msra.mxu0 %v6075_v16  ;;  %v6116_v16 = vld [vmem:[#allocation30 + $0x1c4] ss:$8 sps:$4 sm:$0xff]  }
0x128f   :  { %4575 = vmatprep.subr.bf16.mxu0 %v6080_v35  ;;  %v6114_v35 = vld [vmem:[#allocation30 + $0x1c0] ss:$8 sps:$4 sm:$0xff]  }
0x1324   :  { %v4072_v27 = vpop.f32.mrb[44].mxu0  ;;  %v4115_v39 = vpop.f32.mrb[48].mxu1 }
0x1325   :  { %v4073_v45 = vadd.f32 %v4072_v27, %v3701_v7  ;;  %v4116_v21 = vadd.f32 %v4115_v39, %v3709_v33  ;;  %v4074_v11 = vpop.f32.mrb[45].mxu0  ;;  %v4117_v5 = vpop.f32.mrb[49].mxu1  ;;  %v6123_v27 = vld [vmem:[#allocation30 + $0x1f0] ss:$8 sps:$4 sm:$0xff]   ;;  %v4200_v39 = vld [vmem:[#allocation31] sm:$0x3] }
0x1326   :  { %v4075_v56 = vadd.f32 %v4074_v11, %v3705_v18  ;;  %v4118_v50 = vadd.f32 %v4117_v5, %v3713_v47  ;;  %v4076_v59 = vpop.f32.mrb[46].mxu0  ;;  %v4119_v54 = vpop.f32.mrb[50].mxu1 }
0x1327   :  { %v4077_v51 = vadd.f32 %v4076_v59, %v3701_v7  ;;  %v4120_v48 = vadd.f32 %v4119_v54, %v3709_v33  ;;  %v4078_v49 = vpop.f32.mrb[47].mxu0  ;;  %v4121_v25 = vpop.f32.mrb[51].mxu1  ;;  %v4124_v17 = vmax.f32 %v4073_v45, 0.0  ;;  %v4126_v4 = vmax.f32 %v4116_v21, 0.0  ;;  %v6117_v7 = vld [vmem:[#allocation30 + $0x1d0] ss:$8 sps:$4 sm:$0xff]  }
0x1328   :  { %v4079_v46 = vadd.f32 %v4078_v49, %v3705_v18  ;;  %v4122_v60 = vadd.f32 %v4121_v25, %v3713_v47  ;;  %v4125_v61 = vmax.f32 %v4075_v56, 0.0  ;;  %v4127_v52 = vmax.f32 %v4118_v50, 0.0  ;;  %v6122_v33 = vld [vmem:[#allocation30 + $0x1e4] ss:$8 sps:$4 sm:$0xff]   ;;  %v6120_v18 = vld [vmem:[#allocation30 + $0x1e0] ss:$8 sps:$4 sm:$0xff]  }
0x1329   :  { %v4128_v62 = vmax.f32 %v4077_v51, 0.0  ;;  %v4130_v36 = vmax.f32 %v4120_v48, 0.0  ;;  %v6125_v47 = vld [vmem:[#allocation30 + $0x1f4] ss:$8 sps:$4 sm:$0xff]   ;;  %v4205_v45 = vrot.slane %v4200_v39, %v7084_v0  ;;  %v4209_v21 = vrot.slane %v4200_v39, %v7090_v3 }
0x132a   :  { %v4129_v40 = vmax.f32 %v4079_v46, 0.0  ;;  %v4131_v6 = vmax.f32 %v4122_v60, 0.0 }
0x132b   :  { %v4132_v53 = vpack.c.bf16 %v4128_v62, %v4124_v17  ;;  %v7455_v8 = vpack.c.bf16 %v4130_v36, %v4126_v4 }
0x132c   :  { %v4133_v63 = vpack.c.bf16 %v4129_v40, %v4125_v61  ;;  %v4135_v57 = vpack.c.bf16 %v4131_v6, %v4127_v52 }
0x132e   :  { %4564 = vmatprep.mubr.bf16.mxu0 %v4133_v63 }
0x132f   :  { %4565 = vmatmul.mubr.bf16.vlgmr.msra.gmra.mrb[48].mxu0 %v4132_v53 }
0x1330   :  { %4576 = vmatpush1.bf16.msra.mxu0 %v6078_v13  ;;  %4607 = vmatprep.mubr.bf16.mxu0 %v4135_v57 }
0x1331   :  { %4577 = vmatprep.subr.bf16.mxu0 %v6083_v9 }
0x1334   :  { %4578 = vmatpush1.bf16.msra.mxu0 %v6081_v14 }
0x1335   :  { %4579 = vmatprep.subr.bf16.mxu0 %v6086_v41 }
0x1338   :  { %4580 = vmatpush1.bf16.msra.mxu0 %v6084_v12 }
0x1339   :  { %4581 = vmatprep.subr.bf16.mxu0 %v6089_v15 }
0x133c   :  { %4582 = vmatpush1.bf16.msra.mxu0 %v6087_v19 }
0x133d   :  { %4583 = vmatprep.subr.bf16.mxu0 %v6092_v22 }
0x1340   :  { %4584 = vmatpush1.bf16.msra.mxu0 %v6090_v1 }
0x1341   :  { %4585 = vmatprep.subr.bf16.mxu0 %v6095_v23 }
0x1344   :  { %4586 = vmatpush1.bf16.msra.mxu0 %v6093_v24 }
0x1345   :  { %4587 = vmatprep.subr.bf16.mxu0 %v6098_v26 }
0x1348   :  { %4588 = vmatpush1.bf16.msra.mxu0 %v6096_v28 }
0x1349   :  { %4589 = vmatprep.subr.bf16.mxu0 %v6101_v29 }
0x134c   :  { %4590 = vmatpush1.bf16.msra.mxu0 %v6099_v30 }
0x134d   :  { %4591 = vmatprep.subr.bf16.mxu0 %v6104_v31 }
0x1350   :  { %4592 = vmatpush1.bf16.msra.mxu0 %v6102_v32 }
0x1351   :  { %4593 = vmatprep.subr.bf16.mxu0 %v6107_v34 }
0x1354   :  { %4594 = vmatpush1.bf16.msra.mxu0 %v6105_v37 }
0x1355   :  { %4595 = vmatprep.subr.bf16.mxu0 %v6110_v2 }
0x1358   :  { %4596 = vmatpush1.bf16.msra.mxu0 %v6108_v38 }
0x1359   :  { %4597 = vmatprep.subr.bf16.mxu0 %v6113_v42 }
0x135c   :  { %4598 = vmatpush1.bf16.msra.mxu0 %v6111_v43 }
0x135d   :  { %4599 = vmatprep.subr.bf16.mxu0 %v6116_v16 }
0x1360   :  { %4600 = vmatpush1.bf16.msra.mxu0 %v6114_v35 }
0x1361   :  { %4601 = vmatprep.subr.bf16.mxu0 %v6119_v44 }
0x1364   :  { %4602 = vmatpush1.bf16.msra.mxu0 %v6117_v7 }
0x1365   :  { %4603 = vmatprep.subr.bf16.mxu0 %v6122_v33 }
0x1368   :  { %4604 = vmatpush1.bf16.msra.mxu0 %v6120_v18 }
0x1369   :  { %4605 = vmatprep.subr.bf16.mxu0 %v6125_v47 }
0x136c   :  { %4606 = vmatpush1.bf16.msra.mxu0 %v6123_v27 }
0x136f   :  { %4608 = vmatmul.mubr.bf16.vlgmr.msra.gmra.mrb[48].mxu0 %v7455_v8 }
0x1442   :  { %v4609_v11 = vpop.f32.mrb[48].mxu0 }
0x1443   :  { %v5519_v5 = vadd.f32 %v4609_v11, %v4205_v45  ;;  %v4611_v56 = vpop.f32.mrb[49].mxu0 }
0x1444   :  { %v5520_v50 = vadd.f32 %v4611_v56, %v4209_v21  ;;  %v4613_v59 = vpop.f32.mrb[50].mxu0  ;;  %v6127_v56 = vld [vmem:[#allocation13] sm:$0xff]  }
0x1445   :  { %v4618_v54 = vadd.f32 %v5519_v5, %v7406_v55  ;;  %v5521_v51 = vadd.f32 %v4613_v59, %v4205_v45  ;;  %v4615_v48 = vpop.f32.mrb[51].mxu0  ;;  %v6126_v5 = vld [vmem:[#allocation13 + $0x40] sm:$0xff]   ;;  %v6129_v59 = vld [vmem:[#allocation13 + $0x8] sm:$0xff]  }
0x1446   :  { %v4619_v49 = vadd.f32 %v5520_v50, %v7409_v20  ;;  %v5522_v25 = vadd.f32 %v4615_v48, %v4209_v21  ;;  %5397 = vmatprep.subr.bf16.mxu1 %v6126_v5  ;;  %v6128_v50 = vld [vmem:[#allocation13 + $0x48] sm:$0xff]   ;;  %v6132_v48 = vld [vmem:[#allocation13 + $0x58] sm:$0xff]  }
0x1447   :  { %v4622_v46 = vrot.slane %v4618_v54, 4  ;;  %v4620_v60 = vadd.f32 %v5521_v51, %v7412_v10  ;;  %5398 = vmatpush3.bf16.msra.mxu1 %v6127_v56  ;;  %v6131_v51 = vld [vmem:[#allocation13 + $0x10] sm:$0xff]  }
0x1448   :  { %v4628_v17 = vrot.slane %v4619_v49, 4  ;;  %v4621_v4 = vadd.f32 %v5522_v25, %v7415_v58  ;;  %5399 = vmatprep.subr.bf16.mxu1 %v6128_v50  ;;  %v6134_v25 = vld [vmem:[#allocation13 + $0x60] sm:$0xff]  }
0x1449   :  { %v4623_v62 = vadd.f32 %v4622_v46, %v4618_v54  ;;  %v4634_v36 = vrot.slane %v4620_v60, 4  ;;  %v6130_v54 = vld [vmem:[#allocation13 + $0x50] sm:$0xff]   ;;  %v6135_v46 = vld [vmem:[#allocation13 + $0x20] sm:$0xff]  }
0x144a   :  { %v4629_v61 = vadd.f32 %v4628_v17, %v4619_v49  ;;  %v4640_v52 = vrot.slane %v4621_v4, 4  ;;  %v6133_v49 = vld [vmem:[#allocation13 + $0x18] sm:$0xff]   ;;  %v6137_v17 = vld [vmem:[#allocation13 + $0x28] sm:$0xff]  }
0x144b   :  { %v4624_v40 = vrot.slane %v4623_v62, 2  ;;  %v4635_v6 = vadd.f32 %v4634_v36, %v4620_v60  ;;  %5400 = vmatpush3.bf16.msra.mxu1 %v6129_v59  ;;  %v6136_v60 = vld [vmem:[#allocation13 + $0x68] sm:$0xff]   ;;  %v6140_v36 = vld [vmem:[#allocation13 + $0x78] sm:$0xff]  }
0x144c   :  { %v4630_v53 = vrot.slane %v4629_v61, 2  ;;  %v4641_v8 = vadd.f32 %v4640_v52, %v4621_v4  ;;  %5401 = vmatprep.subr.bf16.mxu1 %v6130_v54  ;;  %v6138_v4 = vld [vmem:[#allocation13 + $0x70] sm:$0xff]  }
0x144d   :  { %v4625_v55 = vadd.f32 %v4624_v40, %v4623_v62  ;;  %v4636_v63 = vrot.slane %v4635_v6, 2  ;;  %v6139_v62 = vld [vmem:[#allocation13 + $0x30] sm:$0xff]  }
0x144e   :  { %v4631_v57 = vadd.f32 %v4630_v53, %v4629_v61  ;;  %v4642_v13 = vrot.slane %v4641_v8, 2  ;;  %v6141_v61 = vld [vmem:[#allocation13 + $0x38] sm:$0xff]  }
0x144f   :  { %v4626_v20 = vrot.slane %v4625_v55, 1  ;;  %v4637_v9 = vadd.f32 %v4636_v63, %v4635_v6  ;;  %5402 = vmatpush3.bf16.msra.mxu1 %v6131_v51  ;;  %v4651_v53 = vld [vmem:[#allocation10] sm:$0x3] }
0x1450   :  { %v4632_v14 = vrot.slane %v4631_v57, 1  ;;  %v4643_v41 = vadd.f32 %v4642_v13, %v4641_v8  ;;  %5403 = vmatprep.subr.bf16.mxu1 %v6132_v48  ;;  %v4652_v8 = vld [vmem:[#allocation12] sm:$0x3]  ;;  %v4715_v63 = vrot.slane %v4651_v53, %v7090_v3 }
0x1451   :  { %v4638_v10 = vrot.slane %v4637_v9, 1  ;;  %v4627_v12 = vadd.f32 %v4626_v20, %v4625_v55  ;;  %v4711_v55 = vrot.slane %v4651_v53, %v7084_v0  ;;  %v4726_v13 = vrot.slane %v4652_v8, %v7084_v0 }
0x1452   :  { %v4644_v15 = vrot.slane %v4643_v41, 1  ;;  %v4633_v58 = vadd.f32 %v4632_v14, %v4631_v57  ;;  %v4730_v14 = vrot.slane %v4652_v8, %v7090_v3 }
0x1453   :  { %v4639_v19 = vadd.f32 %v4638_v10, %v4637_v9  ;;  %v4647_v1 = vmul.f32 0.125, %v4627_v12  ;;  %5404 = vmatpush3.bf16.msra.mxu1 %v6133_v49 }
0x1454   :  { %v4645_v22 = vadd.f32 %v4644_v15, %v4643_v41  ;;  %v4648_v24 = vmul.f32 0.125, %v4633_v58  ;;  %5405 = vmatprep.subr.bf16.mxu1 %v6134_v25 }
0x1455   :  { %v4649_v23 = vmul.f32 0.125, %v4639_v19 }
0x1456   :  { %v4650_v26 = vmul.f32 0.125, %v4645_v22 }
0x1457   :  { %v4658_v28 = vsel %vm4657_vm1, %v4649_v23, %v4647_v1  ;;  %5406 = vmatpush3.bf16.msra.mxu1 %v6135_v46 }
0x1458   :  { %v4659_v29 = vsel %vm4657_vm1, %v4650_v26, %v4648_v24  ;;  %v4663_v30 = vsel %vm4662_vm2, %v4658_v28, 0.0  ;;  %5407 = vmatprep.subr.bf16.mxu1 %v6136_v60 }
0x1459   :  { %v4664_v31 = vsel %vm4662_vm2, %v4659_v29, 0.0 }
0x145a   :  { %v4665_v32 = vadd.f32 %v4664_v31, %v4663_v30 }
0x145b   :  { %5408 = vmatpush3.bf16.msra.mxu1 %v6137_v17 }
0x145c   :  { %4666 = vadd.xlane.f32.xlu0 %v4665_v32  ;;  %5409 = vmatprep.subr.bf16.mxu1 %v6138_v4 }
0x145f   :  { %5410 = vmatpush3.bf16.msra.mxu1 %v6139_v62 }
0x1460   :  { %5411 = vmatprep.subr.bf16.mxu1 %v6140_v36 }
0x1463   :  { %5412 = vmatpush3.bf16.msra.mxu1 %v6141_v61 }
0x14e9   :  { %v4667_v34 = vpop.xlane.xlu0 %4666 }
0x14ea   :  { %v4668_v37 = vmul.f32 0.00390625, %v4667_v34 }
0x14ec   :  { %v4670_v2 = vrot.slane %v4668_v37, 1  ;;  %v4673_v38 = vsub.f32 %v4647_v1, %v4668_v37  ;;  %v4674_v42 = vsub.f32 %v4648_v24, %v4668_v37 }
0x14ee   :  { %v4675_v43 = vsub.f32 %v4649_v23, %v4670_v2  ;;  %v4676_v16 = vsub.f32 %v4650_v26, %v4670_v2  ;;  %v4677_v7 = vmul.f32 %v4673_v38, %v4673_v38  ;;  %v4678_v33 = vmul.f32 %v4674_v42, %v4674_v42 }
0x14f0   :  { %v4679_v35 = vmul.f32 %v4675_v43, %v4675_v43  ;;  %v4680_v44 = vmul.f32 %v4676_v16, %v4676_v16 }
0x14f2   :  { %v4685_v18 = vrot.slane %v4679_v35, 7  ;;  %v4687_v47 = vrot.slane %v4680_v44, 7  ;;  %v5348_v44 = vld [vmem:[%s7502_s9] ss:$0 sm:$0xff] }
0x14f4   :  { %v4686_v27 = vsel %vm4657_vm1, %v4685_v18, %v4677_v7  ;;  %v4688_v39 = vsel %vm4657_vm1, %v4687_v47, %v4678_v33 }
0x14f5   :  { %v4691_v45 = vsel %vm4662_vm2, %v4686_v27, 0.0  ;;  %v4692_v21 = vsel %vm4662_vm2, %v4688_v39, 0.0 }
0x14f6   :  { %v4693_v11 = vadd.f32 %v4692_v21, %v4691_v45 }
0x14f8   :  { %4694 = vadd.xlane.f32.xlu1 %v4693_v11 }
0x1585   :  { %v4695_v52 = vpop.xlane.xlu1 %4694 }
0x1586   :  { %v4696_v40 = vmul.f32 0.00390625, %v4695_v52 }
0x1588   :  { %v4697_v6 = vadd.f32 1e-05, %v4696_v40 }
0x158a   :  { %6214 = vrsqrt.f32 %v4697_v6 }
0x1594   :  { %v6215_v57 = vpop.eup %6214 }
0x1595   :  { %v4700_v20 = vrot.slane %v6215_v57, 1  ;;  %v4704_v9 = vmul.f32 %v6215_v57, %v4674_v42  ;;  %v4703_v41 = vmul.f32 %v6215_v57, %v4673_v38 }
0x1597   :  { %v4706_v10 = vmul.f32 %v4700_v20, %v4676_v16  ;;  %v4719_v12 = vmul.f32 %v4715_v63, %v4704_v9  ;;  %v4705_v15 = vmul.f32 %v4700_v20, %v4675_v43  ;;  %v4718_v58 = vmul.f32 %v4711_v55, %v4703_v41 }
0x1599   :  { %v4721_v19 = vmul.f32 %v4715_v63, %v4706_v10  ;;  %v4734_v22 = vadd.f32 %v4730_v14, %v4719_v12  ;;  %v4720_v1 = vmul.f32 %v4711_v55, %v4705_v15  ;;  %v4733_v23 = vadd.f32 %v4726_v13, %v4718_v58 }
0x159b   :  { %v4736_v24 = vadd.f32 %v4730_v14, %v4721_v19  ;;  %v4735_v26 = vadd.f32 %v4726_v13, %v4720_v1  ;;  %v4738_v28 = vpack.c.bf16 %v4734_v22, %v4734_v22  ;;  %v4737_v30 = vpack.c.bf16 %v4733_v23, %v4733_v23 }
0x159d   :  { %v4740_v29 = vpack.c.bf16 %v4736_v24, %v4736_v24  ;;  %v4739_v31 = vpack.c.bf16 %v4735_v26, %v4735_v26  ;;  %v4785_v34 = vunpack.c.l.b16 %v4738_v28  ;;  %v4784_v3 = vunpack.c.l.b16 %v4737_v30 }
0x159f   :  { %v4787_v0 = vunpack.c.l.b16 %v4740_v29  ;;  %v4786_v32 = vunpack.c.l.b16 %v4739_v31 }
0x15a1   :  { %v4790_v37 = vrot.slane %v4787_v0, 7  ;;  %v4788_v2 = vrot.slane %v4786_v32, 7 }
0x15a3   :  { %v4791_v38 = vsel %vm4657_vm1, %v4790_v37, %v4785_v34  ;;  %v4789_v42 = vsel %vm4657_vm1, %v4788_v2, %v4784_v3 }
0x15a4   :  { %v4793_v43 = vpack.c.b16 %v4791_v38, %v4791_v38  ;;  %v4792_v16 = vpack.c.b16 %v4789_v42, %v4789_v42 }
0x15a6   :  { %4924 = vmatprep.mubr.bf16.mxu1 %v4793_v43 }
0x15a7   :  { %4925 = vmatmul.mubr.bf16.vlgmr.msra.gmra.mrb[52].mxu1 %v4792_v16 }
0x167a   :  { %v5413_v35 = vpop.f32.mrb[52].mxu1 }
0x167b   :  { %v5414_v7 = vpop.f32.mrb[53].mxu1 }
0x167c   :  { %v5415_v33 = vadd.f32 %v5414_v7, %v5413_v35  ;;  %v5416_v18 = vpop.f32.mrb[54].mxu1 }
0x167d   :  { %v5417_v47 = vpop.f32.mrb[55].mxu1 }
0x167e   :  { %v4927_v27 = vadd.f32 %v5415_v33, %v5348_v44 }
0x1680   :  { %4932 = vst [vmem:[#allocation33] sm:$0x3] %v4927_v27 }
0x1681   :  { %6623 = shalt.err (!%p6620_p8)
}
0x1682   :  { %s7544_s26 = sld [smem:[#allocation52_spill]] }
0x1688   :  { %s6624_s9 = scalar_lea.hbm %s7544_s26, 32 }
0x1689   :  { %p6625_p9 = scmp.ne.s32.totalorder %s7544_s26, %s6624_s9  ;;  %p6628_p10 = scmp.lt.u32.totalorder %s6624_s9, %s7544_s26 }
0x168b   :  { %p6630_p11 = pnand %p6628_p10, %p6625_p9 }
0x168d   :  { %6633 = shalt.err (!%p6630_p11)
}
0x168e   :  { %4942 = dma.vmem_to_hbm [thread:$0]  %s4940_s4, 32, %s7544_s26, [#allocation6]  }
0x168f   :  { %6654 = dma.done.wait [#allocation6], 32  }
0x1690   :  { %6655 = vsyncadd [#allocation6], 4294967264 }
0x1691   :  { %4946 = vsyncpa [#allocation5], 1 }
0x1692   :  { %4947 = vsyncpa [#allocation8], 1 }
0x1693   :  { %4948 = vsyncpa [#allocation11], 1 }
0x1694   :  { %4949 = vsyncpa [#allocation14], 1 }
0x1695   :  { %4950 = vsyncpa [#allocation17], 1 }
0x1696   :  { %4951 = vsyncpa [#allocation20], 1 }
0x1697   :  { %4952 = vsyncpa [#allocation23], 1 }
0x1698   :  { %4953 = vsyncpa [#allocation26], 1 }
0x1699   :  { %4954 = vsyncpa [#allocation29], 1 }
0x169a   :  { %4955 = vsyncpa [#allocation32], 1 }
0x169b   :  { %4956 = vsyncpa [#allocation6], 1 }

</bundles_post_ra>
